<compile_context>
chip_gen: v7x
topology: tpu7x:2x2x1
jax: 0.10.0
libtpu: 0.0.40
codegen_flags: <defaults>
</compile_context>

<pallas_src>
import functools

import jax
import jax.numpy as jnp
import numpy as np
from jax import lax
from jax.experimental import pallas as pl
from jax.experimental.pallas import tpu as pltpu

LANE = 128


def _round_up(n, m):
    return (n + m - 1) // m * m


def _physical_vmem_bytes():
    try:
        return int(pltpu.get_tpu_info().vmem_capacity_bytes)
    except Exception:
        return 128 * 1024 * 1024


# --------------------------------------------------------------------------
# kernel
# --------------------------------------------------------------------------
def _bottleneck_kernel(xt_ref, xb_ref, xd_ref, roff_ref, col_ref,
                       w1_ref, b1_ref, w2_ref, b2_ref, w3_ref, b3_ref,
                       *rest, H, W, TH, mm_dtype, has_skip, conv2_split):
    """One (batch, row-tile) grid step.

    xt/xb/xd are the top-halo (W rows), body (TH*W rows) and bottom-halo
    (W rows) windows of the same HBM array; halo rows that fall outside the
    image arrive as clamped duplicates and are zeroed after conv1.
    """
    if has_skip:
        ws_ref, bs_ref, o_ref = rest
    else:
        (o_ref,) = rest

    N = TH * W                 # output rows of this tile
    Nh = (TH + 2) * W          # rows incl. halo
    cmid = w2_ref.shape[1]
    j = pl.program_id(1)

    # Assemble the working window in matmul dtype (halves the concat for bf16).
    x = jnp.concatenate([xt_ref[0].astype(mm_dtype),
                         xb_ref[0].astype(mm_dtype),
                         xd_ref[0].astype(mm_dtype)], axis=0)       # (Nh, cin_p)

    # ---- conv1 (1x1) + bias + ReLU, halo rows included (conv2 needs them) ----
    h = jnp.dot(x, w1_ref[...], preferred_element_type=jnp.float32) + b1_ref[...]
    h = jnp.maximum(h, 0.0)

    # Rows outside the image (conv2's zero padding) must be zero after conv1.
    img_row = j * TH + roff_ref[...]                                # (Nh, 1)
    h = jnp.where((img_row >= 0) & (img_row < H), h, 0.0)           # (Nh, cmid)

    # ---- conv2 (3x3, stride 1, same) ----
    # dx = -1 / +1 neighbours via XLU sublane rolls (non-negative shifts only);
    # the column masks also neutralise the roll wrap-around at buffer ends.
    col = col_ref[...]                                              # (Nh, 1)
    h_xm = jnp.where(col == 0, 0.0, pltpu.roll(h, 1, axis=0))       # value at x-1
    h_xp = jnp.where(col == W - 1, 0.0, pltpu.roll(h, Nh - 1, axis=0))  # x+1

    if conv2_split:
        # VMEM-lean variant: three accumulating matmuls with K = 3*cmid.
        h3 = jnp.concatenate([h_xm.astype(mm_dtype), h.astype(mm_dtype),
                              h_xp.astype(mm_dtype)], axis=-1)      # (Nh, 3*cmid)
        h2 = jnp.zeros((N, cmid), jnp.float32)
        for ky in range(3):                                         # dy = ky - 1
            h2 = h2 + jnp.dot(h3[ky * W:ky * W + N, :],
                              w2_ref[ky * 3 * cmid:(ky + 1) * 3 * cmid, :],
                              preferred_element_type=jnp.float32)
    else:
        # Single deep matmul (K = 9*cmid): best MXU fill when VMEM allows.
        shifted = tuple(a.astype(mm_dtype) for a in (h_xm, h, h_xp))
        taps = []
        for ky in range(3):                                         # dy = ky - 1
            base = ky * W                                           # 8-aligned
            for s in shifted:                                       # kx = 0,1,2
                taps.append(s[base:base + N, :])
        im2col = jnp.concatenate(taps, axis=-1)                     # (N, 9*cmid)
        h2 = jnp.dot(im2col, w2_ref[...], preferred_element_type=jnp.float32)

    h2 = jnp.maximum(h2 + b2_ref[...], 0.0).astype(mm_dtype)        # (N, cmid)

    # ---- conv3 (1x1) ----
    out = jnp.dot(h2, w3_ref[...], preferred_element_type=jnp.float32) + b3_ref[...]

    # ---- skip path, evaluated last (short live range of its (N, cout) temp) --
    if has_skip:
        out = out + (jnp.dot(xb_ref[0].astype(mm_dtype), ws_ref[...],
                             preferred_element_type=jnp.float32) + bs_ref[...])
    else:
        out = out + xb_ref[0].astype(jnp.float32)                   # nn.Identity

    o_ref[0] = out.astype(o_ref.dtype)


# --------------------------------------------------------------------------
# wrapper helpers
# --------------------------------------------------------------------------
def _vmem_estimate(th, W, cin_p, cmid_p, cout_p, io_bytes, mm_bytes, split):
    """Rough per-step VMEM footprint (blocks double-buffered + kernel temps)."""
    N, Nh = th * W, (th + 2) * W
    est = 2 * (N + 2 * W) * cin_p * io_bytes            # input blocks (x2 buf)
    est += 2 * N * cout_p * 4                           # output block (x2 buf)
    est += 2 * (cin_p * cmid_p + 9 * cmid_p * cmid_p    # weights (x2 buf)
                + cmid_p * cout_p + cin_p * cout_p) * mm_bytes
    est += Nh * cin_p * mm_bytes                        # concatenated window
    est += 3 * Nh * cmid_p * 4                          # h, h_xm, h_xp (f32)
    est += Nh * 3 * cmid_p * mm_bytes                   # shifted taps / h3
    if not split:
        est += N * 9 * cmid_p * mm_bytes                # im2col
    est += N * cmid_p * (4 + mm_bytes)                  # h2 (+ cast)
    est += 2 * N * cout_p * 4                           # conv3 out + skip temp
    est += N * cin_p * mm_bytes                         # skip matmul operand
    return est


def _choose_tiling(H, W, cin_p, cmid_p, cout_p, io_bytes, mm_bytes, *,
                   budget, cap, prefer_even):
    """Largest divisor of H (<= cap) fitting the budget (+ even-T bias on v7x)."""
    cap = H if cap is None else max(1, min(int(cap), H))

    def est(th, split):
        return _vmem_estimate(th, W, cin_p, cmid_p, cout_p, io_bytes,
                              mm_bytes, split)

    # TODO(synk): support awkward (e.g. prime) H via a cdiv grid + masked
    # partial last tile instead of falling back to small divisors.
    divisors = [d for d in range(1, cap + 1) if H % d == 0]
    feasible = [d for d in divisors if est(d, True) <= budget] or [1]
    th = max(feasible)
    if prefer_even and (H // th) % 2 == 1:
        even = [d for d in feasible if (H // d) % 2 == 0 and 2 * d >= th]
        if even:
            th = max(even)                               # even split across 2 TCs
    split = est(th, False) > budget                      # big im2col only if it fits
    return th, split


def _prep_weights(params, cin_p, cmid_p, cout_p, mm_dtype):
    """Zero-pad channel dims to 128-lane multiples; matmul operands -> mm_dtype."""
    w1, b1, w2, b2, w3, b3, ws, bs = params

    def pad2(a, r, c):
        return jnp.pad(a, ((0, r - a.shape[0]), (0, c - a.shape[1])))

    mid = w2.shape[1]
    w2p = jnp.pad(w2, ((0, 0), (0, cmid_p - mid), (0, cmid_p - mid)))
    args = [pad2(w1, cin_p, cmid_p).astype(mm_dtype),
            pad2(b1, 1, cmid_p).astype(jnp.float32),
            w2p.reshape(9 * cmid_p, cmid_p).astype(mm_dtype),   # tap-major weight
            pad2(b2, 1, cmid_p).astype(jnp.float32),
            pad2(w3, cmid_p, cout_p).astype(mm_dtype),
            pad2(b3, 1, cout_p).astype(jnp.float32)]
    if ws is not None:
        args += [pad2(ws, cin_p, cout_p).astype(mm_dtype),
                 pad2(bs, 1, cout_p).astype(jnp.float32)]
    return args


# --------------------------------------------------------------------------
# entry points
# --------------------------------------------------------------------------
def residual_bottleneck_block_nhwc(x_nhwc, params, *, tile_rows=None,
                                   mm_dtype=jnp.bfloat16, io_dtype=None,
                                   out_dtype=None, conv2_split=None,
                                   vmem_budget_bytes=None):
    """NHWC entry point: (B, H, W, Cin) -> (B, H, W, Cout)."""
    w1, _, _, _, w3, _, ws, _ = params
    has_skip = ws is not None
    B, H, W, Cin = x_nhwc.shape
    Cout = w3.shape[1]
    if W % 8 != 0:
        raise ValueError("W must be a multiple of 8 (TPU sublane tiling).")

    cin_p = _round_up(Cin, LANE)
    cmid_p = _round_up(w1.shape[1], LANE)
    cout_p = _round_up(Cout, LANE)
    io_dtype = x_nhwc.dtype if io_dtype is None else io_dtype
    out_dtype = x_nhwc.dtype if out_dtype is None else out_dtype
    io_bytes = jnp.dtype(io_dtype).itemsize
    mm_bytes = jnp.dtype(mm_dtype).itemsize

    phys_vmem = _physical_vmem_bytes()
    budget = (min(int(phys_vmem * 0.45), 56 * 1024 * 1024)
              if vmem_budget_bytes is None else vmem_budget_bytes)
    dual_core = phys_vmem <= 96 * 1024 * 1024            # v7x heuristic (2 TCs)

    TH, auto_split = _choose_tiling(H, W, cin_p, cmid_p, cout_p, io_bytes,
                                    mm_bytes, budget=budget, cap=tile_rows,
                                    prefer_even=dual_core and B == 1)
    split = auto_split if conv2_split is None else bool(conv2_split)
    T = H // TH
    N, Nh = TH * W, (TH + 2) * W

    # Channel pad (no-op when Cin % 128 == 0), optional I/O cast, flatten H,W.
    x_cp = x_nhwc.astype(io_dtype) if io_dtype != x_nhwc.dtype else x_nhwc
    if cin_p != Cin:
        x_cp = jnp.pad(x_cp, ((0, 0), (0, 0), (0, 0), (0, cin_p - Cin)))
    x_cp = x_cp.reshape(B, H * W, cin_p)

    # Tiny constant index/mask vectors (avoid vector int div/mod in-kernel).
    rowoff = jnp.asarray((np.arange(Nh) // W - 1).reshape(Nh, 1), jnp.int32)
    colidx = jnp.asarray((np.arange(Nh) % W).reshape(Nh, 1), jnp.int32)

    wargs = _prep_weights(params, cin_p, cmid_p, cout_p, mm_dtype)

    kernel = functools.partial(_bottleneck_kernel, H=H, W=W, TH=TH,
                               mm_dtype=mm_dtype, has_skip=has_skip,
                               conv2_split=split)

    def const_spec(a):                       # whole array, every grid step
        nd = a.ndim
        return pl.BlockSpec(a.shape, lambda b, j, _nd=nd: (0,) * _nd)

    body_spec = pl.BlockSpec((1, N, cin_p), lambda b, j: (b, j, 0))
    top_spec = pl.BlockSpec((1, W, cin_p),
                            lambda b, j: (b, jnp.maximum(j * TH - 1, 0), 0))
    bot_spec = pl.BlockSpec((1, W, cin_p),
                            lambda b, j: (b, jnp.minimum((j + 1) * TH, H - 1), 0))

    est = _vmem_estimate(TH, W, cin_p, cmid_p, cout_p, io_bytes, mm_bytes, split)
    vmem_limit = int(est * 1.25) + (4 << 20)
    vmem_limit = min(max(vmem_limit, 24 << 20), phys_vmem * 3 // 4)

    out = pl.pallas_call(
        kernel,
        out_shape=jax.ShapeDtypeStruct((B, H * W, cout_p), out_dtype),
        grid=(B, T),
        in_specs=[top_spec, body_spec, bot_spec,
                  const_spec(rowoff), const_spec(colidx)]
                 + [const_spec(a) for a in wargs],
        out_specs=pl.BlockSpec((1, N, cout_p), lambda b, j: (b, j, 0)),
        compiler_params=pltpu.CompilerParams(
            dimension_semantics=("parallel", "parallel"),
            vmem_limit_bytes=int(vmem_limit)),
    )(x_cp, x_cp, x_cp, rowoff, colidx, *wargs)

    out = out.reshape(B, H, W, cout_p)
    if cout_p != Cout:                        # skip the slice when lane-exact
        out = out[..., :Cout]
    return out


def residual_bottleneck_block(x_nchw, params, **kwargs):
    """PyTorch-parity entry point (NCHW).  The transposes are edge glue only —
    use residual_bottleneck_block_nhwc on the hot path."""
    x = jnp.transpose(x_nchw, (0, 2, 3, 1))
    y = residual_bottleneck_block_nhwc(x, params, **kwargs)
    return jnp.transpose(y, (0, 3, 1, 2))


# --------------------------------------------------------------------------
# params + pure-JAX reference
# --------------------------------------------------------------------------
def init_params(key, in_ch, out_ch):
    """Deterministic synthetic params (PyTorch-style uniform fan-in init)."""
    mid = min(in_ch, out_ch) // 2
    ks = jax.random.split(key, 8)

    def u(k, shape, fan_in):
        bound = 1.0 / np.sqrt(fan_in)
        return jax.random.uniform(k, shape, jnp.float32, -bound, bound)

    w1 = u(ks[0], (in_ch, mid), in_ch)            # 1x1: (Cin, Cmid)
    b1 = u(ks[1], (1, mid), in_ch)
    w2 = u(ks[2], (9, mid, mid), 9 * mid)         # 3x3: (ky*3+kx, Cin, Cout)
    b2 = u(ks[3], (1, mid), 9 * mid)
    w3 = u(ks[4], (mid, out_ch), mid)             # 1x1: (Cmid, Cout)
    b3 = u(ks[5], (1, out_ch), mid)
    if in_ch != out_ch:
        ws = u(ks[6], (in_ch, out_ch), in_ch)     # skip 1x1 conv
        bs = u(ks[7], (1, out_ch), in_ch)
    else:
        ws = bs = None                            # nn.Identity
    return (w1, b1, w2, b2, w3, b3, ws, bs)


def reference(x_nchw, params):
    """Pure-JAX reference (lax.conv) with identical semantics."""
    w1, b1, w2, b2, w3, b3, ws, bs = params
    x = jnp.transpose(x_nchw, (0, 2, 3, 1))       # NHWC
    dn = ("NHWC", "HWIO", "NHWC")

    def conv2d(inp, w_hwio, b):
        y = lax.conv_general_dilated(inp, w_hwio, (1, 1), "SAME",
                                     dimension_numbers=dn)
        return y + b.reshape(1, 1, 1, -1)

    mid = w1.shape[1]
    identity = x if ws is None else conv2d(x, ws.reshape(1, 1, *ws.shape), bs)
    h = jax.nn.relu(conv2d(x, w1.reshape(1, 1, *w1.shape), b1))
    h = jax.nn.relu(conv2d(h, w2.reshape(3, 3, mid, mid), b2))
    out = conv2d(h, w3.reshape(1, 1, *w3.shape), b3)
    return jnp.transpose(out + identity, (0, 3, 1, 2))


# --------------------------------------------------------------------------
# test
# --------------------------------------------------------------------------
if __name__ == "__main__":
    key = jax.random.PRNGKey(0)
    kx, kp, kx2, kp2 = jax.random.split(key, 4)

    # Config A: in_ch != out_ch (real 1x1 skip conv), bf16 MXU path, big im2col.
    B, in_ch, out_ch, H, W = 2, 4, 8, 16, 16
    x = jax.random.normal(kx, (B, in_ch, H, W), jnp.float32)
    params = init_params(kp, in_ch, out_ch)
    y_ref = reference(x, params)

    y = jax.block_until_ready(residual_bottleneck_block(x, params))
    np.testing.assert_allclose(np.asarray(y), np.asarray(y_ref),
                               rtol=3e-2, atol=3e-2)

    # Same config: f32 matmuls, forced spatial tiling, split-conv2 variant.
    y32 = jax.block_until_ready(
        residual_bottleneck_block(x, params, tile_rows=4,
                                  mm_dtype=jnp.float32, conv2_split=True))
    np.testing.assert_allclose(np.asarray(y32), np.asarray(y_ref),
                               rtol=1e-3, atol=1e-3)

    # Config B: in_ch == out_ch -> identity skip (no skip matmul), multi-tile.
    B2, ch, H2, W2 = 1, 8, 32, 16
    x2 = jax.random.normal(kx2, (B2, ch, H2, W2), jnp.float32)
    params2 = init_params(kp2, ch, ch)
    y2 = jax.block_until_ready(
        residual_bottleneck_block(x2, params2, tile_rows=8))
    y2_ref = reference(x2, params2)
    np.testing.assert_allclose(np.asarray(y2), np.asarray(y2_ref),
                               rtol=3e-2, atol=3e-2)

    print("KERNEL_OK")
</pallas_src>

<mosaic_0001>
module attributes {stable_mosaic.version = 11 : i64} {
  func.func @_bottleneck_kernel(%arg0: i32, %arg1: i32, %arg2: memref<1x16x128xf32, #tpu.memory_space<vmem>>, %arg3: memref<1x256x128xf32, #tpu.memory_space<vmem>>, %arg4: memref<1x16x128xf32, #tpu.memory_space<vmem>>, %arg5: memref<288x1xi32, #tpu.memory_space<vmem>>, %arg6: memref<288x1xi32, #tpu.memory_space<vmem>>, %arg7: memref<128x128xbf16, #tpu.memory_space<vmem>>, %arg8: memref<1x128xf32, #tpu.memory_space<vmem>>, %arg9: memref<1152x128xbf16, #tpu.memory_space<vmem>>, %arg10: memref<1x128xf32, #tpu.memory_space<vmem>>, %arg11: memref<128x128xbf16, #tpu.memory_space<vmem>>, %arg12: memref<1x128xf32, #tpu.memory_space<vmem>>, %arg13: memref<128x128xbf16, #tpu.memory_space<vmem>>, %arg14: memref<1x128xf32, #tpu.memory_space<vmem>>, %arg15: memref<1x256x128xf32, #tpu.memory_space<vmem>>) attributes {dimension_semantics = [#tpu.dimension_semantics<parallel>, #tpu.dimension_semantics<parallel>], iteration_bounds = array<i64: 2, 1>, scalar_prefetch = 0 : i64, scratch_operands = 0 : i64, tpu.core_type = #tpu.core_type<tc>, window_params = [{transform_indices = @transform_0, window_bounds = array<i64: 1, 16, 128>}, {transform_indices = @transform_1, window_bounds = array<i64: 1, 256, 128>}, {transform_indices = @transform_2, window_bounds = array<i64: 1, 16, 128>}, {pipeline_mode = #tpu.pipeline_mode<synchronous>, transform_indices = @transform_3, window_bounds = array<i64: 288, 1>}, {pipeline_mode = #tpu.pipeline_mode<synchronous>, transform_indices = @transform_4, window_bounds = array<i64: 288, 1>}, {pipeline_mode = #tpu.pipeline_mode<synchronous>, transform_indices = @transform_5, window_bounds = array<i64: 128, 128>}, {pipeline_mode = #tpu.pipeline_mode<synchronous>, transform_indices = @transform_6, window_bounds = array<i64: 1, 128>}, {pipeline_mode = #tpu.pipeline_mode<synchronous>, transform_indices = @transform_7, window_bounds = array<i64: 1152, 128>}, {pipeline_mode = #tpu.pipeline_mode<synchronous>, transform_indices = @transform_8, window_bounds = array<i64: 1, 128>}, {pipeline_mode = #tpu.pipeline_mode<synchronous>, transform_indices = @transform_9, window_bounds = array<i64: 128, 128>}, {pipeline_mode = #tpu.pipeline_mode<synchronous>, transform_indices = @transform_10, window_bounds = array<i64: 1, 128>}, {pipeline_mode = #tpu.pipeline_mode<synchronous>, transform_indices = @transform_11, window_bounds = array<i64: 128, 128>}, {pipeline_mode = #tpu.pipeline_mode<synchronous>, transform_indices = @transform_12, window_bounds = array<i64: 1, 128>}, {transform_indices = @transform_13, window_bounds = array<i64: 1, 256, 128>}]} {
    %c0 = arith.constant 0 : index
    %c0_0 = arith.constant 0 : index
    %c0_1 = arith.constant 0 : index
    %0 = vector.load %arg2[%c0, %c0_0, %c0_1] : memref<1x16x128xf32, #tpu.memory_space<vmem>>, vector<1x16x128xf32>
    %1 = vector.shape_cast %0 : vector<1x16x128xf32> to vector<16x128xf32>
    %2 = arith.truncf %1 : vector<16x128xf32> to vector<16x128xbf16>
    %c0_2 = arith.constant 0 : index
    %c0_3 = arith.constant 0 : index
    %c0_4 = arith.constant 0 : index
    %3 = vector.load %arg3[%c0_2, %c0_3, %c0_4] : memref<1x256x128xf32, #tpu.memory_space<vmem>>, vector<1x256x128xf32>
    %4 = vector.shape_cast %3 : vector<1x256x128xf32> to vector<256x128xf32>
    %5 = arith.truncf %4 : vector<256x128xf32> to vector<256x128xbf16>
    %c0_5 = arith.constant 0 : index
    %c0_6 = arith.constant 0 : index
    %c0_7 = arith.constant 0 : index
    %6 = vector.load %arg4[%c0_5, %c0_6, %c0_7] : memref<1x16x128xf32, #tpu.memory_space<vmem>>, vector<1x16x128xf32>
    %7 = vector.shape_cast %6 : vector<1x16x128xf32> to vector<16x128xf32>
    %8 = arith.truncf %7 : vector<16x128xf32> to vector<16x128xbf16>
    %9 = tpu.concatenate %2, %5, %8 in 0 : vector<16x128xbf16>, vector<256x128xbf16>, vector<16x128xbf16> -> vector<288x128xbf16>
    %c0_8 = arith.constant 0 : index
    %c0_9 = arith.constant 0 : index
    %10 = vector.load %arg7[%c0_8, %c0_9] : memref<128x128xbf16, #tpu.memory_space<vmem>>, vector<128x128xbf16>
    %cst = arith.constant dense<0.000000e+00> : vector<288x128xf32>
    %11 = tpu.matmul %9, %10, %cst {dimension_numbers = #tpu.dot_dimension_numbers<[1], [0], [0], [1], [0, 0, 1, 1], [], []>} : vector<288x128xbf16>, vector<128x128xbf16>, vector<288x128xf32> -> vector<288x128xf32>
    %c0_10 = arith.constant 0 : index
    %c0_11 = arith.constant 0 : index
    %12 = vector.load %arg8[%c0_10, %c0_11] : memref<1x128xf32, #tpu.memory_space<vmem>>, vector<1x128xf32>
    %13 = vector.broadcast %12 : vector<1x128xf32> to vector<288x128xf32>
    %14 = arith.addf %11, %13 : vector<288x128xf32>
    %cst_12 = arith.constant 0.000000e+00 : f32
    %15 = vector.broadcast %cst_12 : f32 to vector<288x128xf32>
    %16 = arith.maximumf %14, %15 : vector<288x128xf32>
    %c16_i32 = arith.constant 16 : i32
    %17 = arith.muli %arg1, %c16_i32 : i32
    %c0_13 = arith.constant 0 : index
    %c0_14 = arith.constant 0 : index
    %18 = vector.load %arg5[%c0_13, %c0_14] : memref<288x1xi32, #tpu.memory_space<vmem>>, vector<288x1xi32>
    %19 = vector.broadcast %17 : i32 to vector<288x1xi32>
    %20 = arith.addi %19, %18 : vector<288x1xi32>
    %c0_i32 = arith.constant 0 : i32
    %21 = vector.broadcast %c0_i32 : i32 to vector<288x1xi32>
    %22 = arith.cmpi sge, %20, %21 : vector<288x1xi32>
    %c16_i32_15 = arith.constant 16 : i32
    %23 = vector.broadcast %c16_i32_15 : i32 to vector<288x1xi32>
    %24 = arith.cmpi slt, %20, %23 : vector<288x1xi32>
    %25 = arith.andi %22, %24 : vector<288x1xi1>
    %cst_16 = arith.constant 0.000000e+00 : f32
    %26 = vector.shape_cast %25 : vector<288x1xi1> to vector<288x1xi1>
    %27 = vector.broadcast %26 : vector<288x1xi1> to vector<288x128xi1>
    %28 = vector.broadcast %cst_16 : f32 to vector<288x128xf32>
    %29 = arith.select %27, %16, %28 : vector<288x128xi1>, vector<288x128xf32>
    %c0_17 = arith.constant 0 : index
    %c0_18 = arith.constant 0 : index
    %30 = vector.load %arg6[%c0_17, %c0_18] : memref<288x1xi32, #tpu.memory_space<vmem>>, vector<288x1xi32>
    %c0_i32_19 = arith.constant 0 : i32
    %31 = vector.broadcast %c0_i32_19 : i32 to vector<288x1xi32>
    %32 = arith.cmpi eq, %30, %31 : vector<288x1xi32>
    %c1_i32 = arith.constant 1 : i32
    %33 = tpu.dynamic_rotate %29 by %c1_i32 dim 0 : vector<288x128xf32>, i32 -> vector<288x128xf32>
    %cst_20 = arith.constant 0.000000e+00 : f32
    %34 = vector.shape_cast %32 : vector<288x1xi1> to vector<288x1xi1>
    %35 = vector.broadcast %34 : vector<288x1xi1> to vector<288x128xi1>
    %36 = vector.broadcast %cst_20 : f32 to vector<288x128xf32>
    %37 = arith.select %35, %36, %33 : vector<288x128xi1>, vector<288x128xf32>
    %c15_i32 = arith.constant 15 : i32
    %38 = vector.broadcast %c15_i32 : i32 to vector<288x1xi32>
    %39 = arith.cmpi eq, %30, %38 : vector<288x1xi32>
    %c287_i32 = arith.constant 287 : i32
    %40 = tpu.dynamic_rotate %29 by %c287_i32 dim 0 : vector<288x128xf32>, i32 -> vector<288x128xf32>
    %cst_21 = arith.constant 0.000000e+00 : f32
    %41 = vector.shape_cast %39 : vector<288x1xi1> to vector<288x1xi1>
    %42 = vector.broadcast %41 : vector<288x1xi1> to vector<288x128xi1>
    %43 = vector.broadcast %cst_21 : f32 to vector<288x128xf32>
    %44 = arith.select %42, %43, %40 : vector<288x128xi1>, vector<288x128xf32>
    %45 = arith.truncf %37 : vector<288x128xf32> to vector<288x128xbf16>
    %46 = arith.truncf %29 : vector<288x128xf32> to vector<288x128xbf16>
    %47 = arith.truncf %44 : vector<288x128xf32> to vector<288x128xbf16>
    %48 = vector.extract_strided_slice %45 {offsets = [0, 0], sizes = [256, 128], strides = [1, 1]} : vector<288x128xbf16> to vector<256x128xbf16>
    %49 = vector.extract_strided_slice %46 {offsets = [0, 0], sizes = [256, 128], strides = [1, 1]} : vector<288x128xbf16> to vector<256x128xbf16>
    %50 = vector.extract_strided_slice %47 {offsets = [0, 0], sizes = [256, 128], strides = [1, 1]} : vector<288x128xbf16> to vector<256x128xbf16>
    %51 = vector.extract_strided_slice %45 {offsets = [16, 0], sizes = [256, 128], strides = [1, 1]} : vector<288x128xbf16> to vector<256x128xbf16>
    %52 = vector.extract_strided_slice %46 {offsets = [16, 0], sizes = [256, 128], strides = [1, 1]} : vector<288x128xbf16> to vector<256x128xbf16>
    %53 = vector.extract_strided_slice %47 {offsets = [16, 0], sizes = [256, 128], strides = [1, 1]} : vector<288x128xbf16> to vector<256x128xbf16>
    %54 = vector.extract_strided_slice %45 {offsets = [32, 0], sizes = [256, 128], strides = [1, 1]} : vector<288x128xbf16> to vector<256x128xbf16>
    %55 = vector.extract_strided_slice %46 {offsets = [32, 0], sizes = [256, 128], strides = [1, 1]} : vector<288x128xbf16> to vector<256x128xbf16>
    %56 = vector.extract_strided_slice %47 {offsets = [32, 0], sizes = [256, 128], strides = [1, 1]} : vector<288x128xbf16> to vector<256x128xbf16>
    %57 = tpu.concatenate %48, %49, %50, %51, %52, %53, %54, %55, %56 in 1 : vector<256x128xbf16>, vector<256x128xbf16>, vector<256x128xbf16>, vector<256x128xbf16>, vector<256x128xbf16>, vector<256x128xbf16>, vector<256x128xbf16>, vector<256x128xbf16>, vector<256x128xbf16> -> vector<256x1152xbf16>
    %c0_22 = arith.constant 0 : index
    %c0_23 = arith.constant 0 : index
    %58 = vector.load %arg9[%c0_22, %c0_23] : memref<1152x128xbf16, #tpu.memory_space<vmem>>, vector<1152x128xbf16>
    %cst_24 = arith.constant dense<0.000000e+00> : vector<256x128xf32>
    %59 = tpu.matmul %57, %58, %cst_24 {dimension_numbers = #tpu.dot_dimension_numbers<[1], [0], [0], [1], [0, 0, 1, 1], [], []>} : vector<256x1152xbf16>, vector<1152x128xbf16>, vector<256x128xf32> -> vector<256x128xf32>
    %c0_25 = arith.constant 0 : index
    %c0_26 = arith.constant 0 : index
    %60 = vector.load %arg10[%c0_25, %c0_26] : memref<1x128xf32, #tpu.memory_space<vmem>>, vector<1x128xf32>
    %61 = vector.broadcast %60 : vector<1x128xf32> to vector<256x128xf32>
    %62 = arith.addf %59, %61 : vector<256x128xf32>
    %cst_27 = arith.constant 0.000000e+00 : f32
    %63 = vector.broadcast %cst_27 : f32 to vector<256x128xf32>
    %64 = arith.maximumf %62, %63 : vector<256x128xf32>
    %65 = arith.truncf %64 : vector<256x128xf32> to vector<256x128xbf16>
    %c0_28 = arith.constant 0 : index
    %c0_29 = arith.constant 0 : index
    %66 = vector.load %arg11[%c0_28, %c0_29] : memref<128x128xbf16, #tpu.memory_space<vmem>>, vector<128x128xbf16>
    %cst_30 = arith.constant dense<0.000000e+00> : vector<256x128xf32>
    %67 = tpu.matmul %65, %66, %cst_30 {dimension_numbers = #tpu.dot_dimension_numbers<[1], [0], [0], [1], [0, 0, 1, 1], [], []>} : vector<256x128xbf16>, vector<128x128xbf16>, vector<256x128xf32> -> vector<256x128xf32>
    %c0_31 = arith.constant 0 : index
    %c0_32 = arith.constant 0 : index
    %68 = vector.load %arg12[%c0_31, %c0_32] : memref<1x128xf32, #tpu.memory_space<vmem>>, vector<1x128xf32>
    %69 = vector.broadcast %68 : vector<1x128xf32> to vector<256x128xf32>
    %70 = arith.addf %67, %69 : vector<256x128xf32>
    %c0_33 = arith.constant 0 : index
    %c0_34 = arith.constant 0 : index
    %c0_35 = arith.constant 0 : index
    %71 = vector.load %arg3[%c0_33, %c0_34, %c0_35] : memref<1x256x128xf32, #tpu.memory_space<vmem>>, vector<1x256x128xf32>
    %72 = vector.shape_cast %71 : vector<1x256x128xf32> to vector<256x128xf32>
    %73 = arith.truncf %72 : vector<256x128xf32> to vector<256x128xbf16>
    %c0_36 = arith.constant 0 : index
    %c0_37 = arith.constant 0 : index
    %74 = vector.load %arg13[%c0_36, %c0_37] : memref<128x128xbf16, #tpu.memory_space<vmem>>, vector<128x128xbf16>
    %cst_38 = arith.constant dense<0.000000e+00> : vector<256x128xf32>
    %75 = tpu.matmul %73, %74, %cst_38 {dimension_numbers = #tpu.dot_dimension_numbers<[1], [0], [0], [1], [0, 0, 1, 1], [], []>} : vector<256x128xbf16>, vector<128x128xbf16>, vector<256x128xf32> -> vector<256x128xf32>
    %c0_39 = arith.constant 0 : index
    %c0_40 = arith.constant 0 : index
    %76 = vector.load %arg14[%c0_39, %c0_40] : memref<1x128xf32, #tpu.memory_space<vmem>>, vector<1x128xf32>
    %77 = vector.broadcast %76 : vector<1x128xf32> to vector<256x128xf32>
    %78 = arith.addf %75, %77 : vector<256x128xf32>
    %79 = arith.addf %70, %78 : vector<256x128xf32>
    %c0_41 = arith.constant 0 : index
    %c0_42 = arith.constant 0 : index
    %c0_43 = arith.constant 0 : index
    %80 = vector.load %arg15[%c0_41, %c0_42, %c0_43] : memref<1x256x128xf32, #tpu.memory_space<vmem>>, vector<1x256x128xf32>
    %81 = vector.shape_cast %80 : vector<1x256x128xf32> to vector<256x128xf32>
    %82 = vector.shape_cast %79 : vector<256x128xf32> to vector<1x256x128xf32>
    tpu.vector_store %arg15[%c0_41, %c0_42, %c0_43], %82 {strides = array<i32>} : memref<1x256x128xf32, #tpu.memory_space<vmem>>, vector<1x256x128xf32>,
    return
  }
  func.func @transform_0(%arg0: i32, %arg1: i32) -> (i32, i32, i32) {
    %c16_i32 = arith.constant 16 : i32
    %0 = arith.muli %arg1, %c16_i32 : i32
    %c1_i32 = arith.constant 1 : i32
    %1 = arith.subi %0, %c1_i32 : i32
    %c0_i32 = arith.constant 0 : i32
    %2 = arith.maxsi %1, %c0_i32 : i32
    %c0_i32_0 = arith.constant 0 : i32
    %c0_i32_1 = arith.constant 0 : i32
    return %arg0, %2, %c0_i32_0 : i32, i32, i32
  }
  func.func @transform_1(%arg0: i32, %arg1: i32) -> (i32, i32, i32) {
    %c0_i32 = arith.constant 0 : i32
    %c0_i32_0 = arith.constant 0 : i32
    return %arg0, %arg1, %c0_i32 : i32, i32, i32
  }
  func.func @transform_2(%arg0: i32, %arg1: i32) -> (i32, i32, i32) {
    %c1_i32 = arith.constant 1 : i32
    %0 = arith.addi %arg1, %c1_i32 : i32
    %c16_i32 = arith.constant 16 : i32
    %1 = arith.muli %0, %c16_i32 : i32
    %c15_i32 = arith.constant 15 : i32
    %2 = arith.minsi %1, %c15_i32 : i32
    %c0_i32 = arith.constant 0 : i32
    %c0_i32_0 = arith.constant 0 : i32
    return %arg0, %2, %c0_i32 : i32, i32, i32
  }
  func.func @transform_3(%arg0: i32, %arg1: i32) -> (i32, i32) {
    %c0_i32 = arith.constant 0 : i32
    %c0_i32_0 = arith.constant 0 : i32
    %c0_i32_1 = arith.constant 0 : i32
    return %c0_i32, %c0_i32_0 : i32, i32
  }
  func.func @transform_4(%arg0: i32, %arg1: i32) -> (i32, i32) {
    %c0_i32 = arith.constant 0 : i32
    %c0_i32_0 = arith.constant 0 : i32
    %c0_i32_1 = arith.constant 0 : i32
    return %c0_i32, %c0_i32_0 : i32, i32
  }
  func.func @transform_5(%arg0: i32, %arg1: i32) -> (i32, i32) {
    %c0_i32 = arith.constant 0 : i32
    %c0_i32_0 = arith.constant 0 : i32
    %c0_i32_1 = arith.constant 0 : i32
    return %c0_i32, %c0_i32_0 : i32, i32
  }
  func.func @transform_6(%arg0: i32, %arg1: i32) -> (i32, i32) {
    %c0_i32 = arith.constant 0 : i32
    %c0_i32_0 = arith.constant 0 : i32
    %c0_i32_1 = arith.constant 0 : i32
    return %c0_i32, %c0_i32_0 : i32, i32
  }
  func.func @transform_7(%arg0: i32, %arg1: i32) -> (i32, i32) {
    %c0_i32 = arith.constant 0 : i32
    %c0_i32_0 = arith.constant 0 : i32
    %c0_i32_1 = arith.constant 0 : i32
    return %c0_i32, %c0_i32_0 : i32, i32
  }
  func.func @transform_8(%arg0: i32, %arg1: i32) -> (i32, i32) {
    %c0_i32 = arith.constant 0 : i32
    %c0_i32_0 = arith.constant 0 : i32
    %c0_i32_1 = arith.constant 0 : i32
    return %c0_i32, %c0_i32_0 : i32, i32
  }
  func.func @transform_9(%arg0: i32, %arg1: i32) -> (i32, i32) {
    %c0_i32 = arith.constant 0 : i32
    %c0_i32_0 = arith.constant 0 : i32
    %c0_i32_1 = arith.constant 0 : i32
    return %c0_i32, %c0_i32_0 : i32, i32
  }
  func.func @transform_10(%arg0: i32, %arg1: i32) -> (i32, i32) {
    %c0_i32 = arith.constant 0 : i32
    %c0_i32_0 = arith.constant 0 : i32
    %c0_i32_1 = arith.constant 0 : i32
    return %c0_i32, %c0_i32_0 : i32, i32
  }
  func.func @transform_11(%arg0: i32, %arg1: i32) -> (i32, i32) {
    %c0_i32 = arith.constant 0 : i32
    %c0_i32_0 = arith.constant 0 : i32
    %c0_i32_1 = arith.constant 0 : i32
    return %c0_i32, %c0_i32_0 : i32, i32
  }
  func.func @transform_12(%arg0: i32, %arg1: i32) -> (i32, i32) {
    %c0_i32 = arith.constant 0 : i32
    %c0_i32_0 = arith.constant 0 : i32
    %c0_i32_1 = arith.constant 0 : i32
    return %c0_i32, %c0_i32_0 : i32, i32
  }
  func.func @transform_13(%arg0: i32, %arg1: i32) -> (i32, i32, i32) {
    %c0_i32 = arith.constant 0 : i32
    %c0_i32_0 = arith.constant 0 : i32
    return %arg0, %arg1, %c0_i32 : i32, i32, i32
  }
}

</mosaic_0001>

<bundles_post_ra>
// kernel: tpu_custom_call.1
= control target key start
LH: loop header
LB: loop body
LE: loop exit
PB: predicated region body
PF: predicated region fallthrough
CT: control target
= control target key end

     0   :  { %s9919_s0 = inlined_call_operand.hbm [shape: f32[2,256,128], index: 0, kind: input, shape index: {}]   ;;  %s9920_s1 = inlined_call_operand.hbm [shape: f32[2,256,128], index: 1, kind: input, shape index: {}]   ;;  %s9921_s2 = inlined_call_operand.hbm [shape: f32[2,256,128], index: 2, kind: input, shape index: {}]   ;;  %s9922_s3 = inlined_call_operand.vmem [shape: s32[288,1], index: 3, kind: input, shape index: {}]   ;;  %s9923_s4 = inlined_call_operand.vmem [shape: s32[288,1], index: 4, kind: input, shape index: {}]   ;;  %s9924_s5 = inlined_call_operand.hbm [shape: bf16[128,128], index: 5, kind: input, shape index: {}]   ;;  %s9925_s6 = inlined_call_operand.vmem [shape: f32[1,128], index: 6, kind: input, shape index: {}]   ;;  %s9926_s7 = inlined_call_operand.vmem [shape: bf16[1152,128], index: 7, kind: input, shape index: {}]   ;;  %s9927_s8 = inlined_call_operand.vmem [shape: f32[1,128], index: 8, kind: input, shape index: {}]   ;;  %s9928_s9 = inlined_call_operand.hbm [shape: bf16[128,128], index: 9, kind: input, shape index: {}]   ;;  %s9929_s10 = inlined_call_operand.vmem [shape: f32[1,128], index: 10, kind: input, shape index: {}]   ;;  %s9930_s11 = inlined_call_operand.hbm [shape: bf16[128,128], index: 11, kind: input, shape index: {}]   ;;  %s9931_s12 = inlined_call_operand.vmem [shape: f32[1,128], index: 12, kind: input, shape index: {}]   ;;  %s9932_s13 = inlined_call_operand.hbm [shape: f32[2,256,128], index: 13, kind: output, shape index: {}]  }
   0x1   :  { %10190 = sst [smem:[#allocation137_spill]] %s9920_s1 }
   0x2   :  { %10191 = sst [smem:[#allocation138_spill]] %s9924_s5 }
   0x3   :  { %10192 = sst [smem:[#allocation139_spill]] %s9925_s6 }
   0x4   :  { %10193 = sst [smem:[#allocation140_spill]] %s9926_s7 }
   0x5   :  { %10194 = sst [smem:[#allocation141_spill]] %s9927_s8 }
   0x6   :  { %10195 = sst [smem:[#allocation142_spill]] %s9929_s10 }
   0x7   :  { %10196 = sst [smem:[#allocation143_spill]] %s9931_s12 }
   0x8   :  { %10197 = sst [smem:[#allocation144_spill]] %s9932_s13 }
   0x9   :  { %18 = vsyncpa [#allocation3], 0 }
   0xa   :  { %20 = vsyncpa [#allocation3 + $0x1], 0 }
   0xb   :  { %21 = vsyncpa [#allocation6], 0 }
   0xc   :  { %23 = vsyncpa [#allocation6 + $0x1], 0 }
   0xd   :  { %24 = vsyncpa [#allocation9], 0 }
   0xe   :  { %25 = vsyncpa [#allocation12], 0 }
   0xf   :  { %26 = vsyncpa [#allocation4], 0 }
  0x10   :  { %28 = vsyncpa [#allocation4 + $0x1], 0  ;;  %s6513_s25 = smov 0   ;;  %s6515_s26 = smov 0  }
  0x11   :  { %s6517_s27 = smov 0   ;;  %s6519_s28 = smov 0  }
  0x12   :  { %s6521_s29 = smov 0   ;;  %s6523_s30 = smov 0  }
  0x13 LB: > { %10198 = sst [smem:[#allocation19_spill]] %s6407_s25  ;;  %s6544_s14 = sadd.s32 4294967295, %s6427_s30   ;;  %s6427_s30 = sphi %s6523_s30, %s34_s30   ;;  %s6423_s29 = sphi %s6521_s29, %s10915_s29   ;;  %s6419_s28 = sphi %s6519_s28, %s10914_s28   ;;  %s6415_s27 = sphi %s6517_s27, %s10913_s27   ;;  %s6411_s26 = sphi %s6515_s26, %s10917_s26   ;;  %s6407_s25 = sphi %s6513_s25, %s10916_s25  }
  0x14   : > { %10199 = sst [smem:[#allocation20_spill]] %s6415_s27  ;;  %s4267_s15 = sadd.s32 4294967294, %s6427_s30  }
  0x15   : > { %10200 = sst [smem:[#allocation21_spill]] %s6419_s28  ;;  %p70_p0 = scmp.ne.s32.totalorder %s6415_s27, %s6411_s26 }
  0x16   : > { %10201 = sst [smem:[#allocation22_spill]] %s6423_s29  ;;  %p71_p1 = scmp.eq.s32.totalorder %s6427_s30, 0 }
  0x17   : > { %10202 = sst [smem:[#allocation23_spill]] %s6427_s30  ;;  %p76_p2 = scmp.ne.s32.totalorder %s6411_s26, %s6407_s25 }
  0x18   : > { %p9938_p3 = scmp.eq.s32.totalorder %s6544_s14, 0  ;;  %p6553_p4 = por %p71_p1, %p70_p0 }
  0x19   : > { %p376_p5 = scmp.eq.s32.totalorder %s6544_s14, 1  ;;  %p382_p7 = scmp.eq.s32.totalorder %s4267_s15, 1 }
  0x1a   : > { %p6560_p6 = por %p9938_p3, %p76_p2  ;;  %p4268_p9 = scmp.ge.s32.totalorder %s6427_s30, 1 }
  0x1b   : > { %p6564_p8 = por %p376_p5, %p70_p0  ;;  %p6569_p10 = por %p382_p7, %p76_p2 }
  0x1c   : > { %s10204_s17 = scalar_select %p6560_p6, 1, 0 }
  0x1d   : > { %s10205_s18 = scalar_select %p6564_p8, 1, 0 }
  0x1e   : > { %s10207_s19 = scalar_select %p6569_p10, 1, 0 }
  0x1f   : > { %10206 = sst [smem:[#allocation24_spill]] %s10205_s18  ;;  %p389_p11 = scmp.lt.s32.totalorder %s6427_s30, 3 }
  0x20   : > { %10208 = sst [smem:[#allocation25_spill]] %s10207_s19  ;;  %s6429_s21 = smov [#allocation8]  }
  0x21   : > { %p6574_p12 = pnand %p4268_p9, %p389_p11  ;;  %s407_s22 = sshll.u32 %s6429_s21, 4  ;;  %s6578_s22 = int_to_ptr.vmem [resolvable:$true] %s407_s22 }
  0x22   : > { %s46_s24 = sadd.s32 1, %s6423_s29  ;;  %s10212_s5 = sld [smem:[#allocation138_spill]] }
  0x23   : > { %s10209_s20 = scalar_select %p6574_p12, 1, 0 }
  0x24   : > { %p5971_p13 = pneg %p6574_p12  ;;  %p6591_p2 = scmp.ge.s32.totalorder %s46_s24, 2 }
  0x26   : > { %p6585_p1 = pnand %p5971_p13, %p9938_p3 }
  0x28   : > { %s10210_s23 = scalar_select %p6585_p1, 1, 0 }
  0x29   : > { %s6159_s21 = scalar_lea.hbm %s10212_s5, 1024  ;;  %p6603_p7 = pneg %p6585_p1 }
  0x2a   : > { %p6160_p5 = scmp.ne.s32.totalorder %s10212_s5, %s6159_s21  ;;  %p6166_p13 = scmp.lt.u32.totalorder %s6159_s21, %s10212_s5 }
  0x2b   : > { %s10213_s12 = scalar_select %p6603_p7, 1, 0 }
  0x2c   : > { %p6162_p9 = pnand %p6603_p7, %p6160_p5 }
  0x2e   : > { %p6163_p11 = pneg %p6162_p9 }
  0x30   : > { %p6168_p0 = pnand %p6166_p13, %p6163_p11 }
  0x32   : > { %6171 = shalt.err (!%p6168_p0)
}
  0x33   : > { %s6172_s13 = scalar_lea.vmem %s6578_s22, 1024  ;;  %p6180_p6 = scmp.lt.s32.totalorder %s6578_s22, %s6578_s22 }
  0x34   : > { %p6173_p3 = scmp.ne.s32.totalorder %s6578_s22, %s6172_s13  ;;  %p6181_p12 = scmp.lt.s32.totalorder %s6172_s13, %s6172_s13 }
  0x36   : > { %p6175_p10 = pnand %p6173_p3, %p6603_p7  ;;  %p6182_p5 = por %p6181_p12, %p6180_p6 }
  0x38   : > { %p6176_p8 = pneg %p6175_p10 }
  0x3a   : > { %p6183_p9 = pnand %p6182_p5, %p6176_p8 }
  0x3c   : > { %6186 = shalt.err (!%p6183_p9)
}
  0x3d   : > { %s9942_s25 = smov 64   ;;  %s9944_s10 = smov 4  }
  0x3e   : > { %5974 = dma.hbm_to_vmem [thread:$0]  (!%p6585_p1), %s10212_s5, 1024, %s6578_s22, [#allocation9], %s9942_s25, %s9942_s25, %s9944_s10  }
  0x3f   : > { %s10919_s24 = smov (%p6591_p2, %s46_s24), 0  ;;  %p5998_p3 = scmp.lt.s32.totalorder %s6427_s30, 2 }
  0x40   : > { %10214 = sst [smem:[#allocation26_spill]] %s10919_s24  ;;  %s6633_s15 = sand.u32 1, %s6415_s27  }
  0x41   : > { %s58_s21 = ssub.s32 %s6423_s29, %s10919_s24  ;;  %s6638_s13 = sshll.u32 %s6423_s29, 12 }
  0x42   : > { %p61_p6 = scmp.eq.s32.totalorder %s58_s21, 0  ;;  %p6642_p8 = pnand %p5998_p3, %p6553_p4 }
  0x43   : > { %s10216_s28 = sadd.s32 1, %s6415_s27  ;;  %s489_s22 = sand.u32 1, %s6427_s30  }
  0x44   : > { %s10215_s8 = scalar_select %p6642_p8, 1, 0 }
  0x45   : > { %s6649_s19 = scalar_select %p61_p6, %s6415_s27, %s10216_s28  }
  0x46   : > { %s4276_s18 = sshll.u32 %s6633_s15, 8  ;;  %s10218_s1 = sld [smem:[#allocation137_spill]] }
  0x47   : > { %10217 = sst [smem:[#allocation27_spill]] %s6649_s19  ;;  %s493_s16 = scalar_lea.vmem [#allocation5], %s4276_s18 }
  0x48   : > { %s502_s21 = sshll.u32 %s493_s16, 4  ;;  %s6432_s24 = smov [#allocation10]   ;;  %s6659_s21 = int_to_ptr.vmem [resolvable:$true] %s502_s21 }
  0x49   : > { %s6661_s29 = sshll.u32 %s6432_s24, 4  ;;  %s6663_s28 = scalar_lea.sflag [#allocation6], %s489_s22  ;;  %s430_s29 = int_to_ptr.vmem [resolvable:$true] %s6661_s29 }
  0x4a   : > { %p6669_p10 = pneg %p6642_p8 }
  0x4c   : > { %s6657_s5 = scalar_lea.hbm %s10218_s1, %s6638_s13  ;;  %s6192_s16 = scalar_lea.hbm %s10218_s1, 8192 }
  0x4d   : > { %s6187_s19 = scalar_lea.hbm %s6657_s5, 4096  ;;  %p6193_p2 = scmp.lt.u32.totalorder %s6657_s5, %s10218_s1 }
  0x4e   : > { %p6188_p4 = scmp.ne.s32.totalorder %s6657_s5, %s6187_s19  ;;  %p6194_p11 = scmp.lt.u32.totalorder %s6192_s16, %s6187_s19 }
  0x4f   : > { %s10219_s25 = scalar_select %p6669_p10, 1, 0 }
  0x50   : > { %p6190_p12 = pnand %p6669_p10, %p6188_p4  ;;  %p6195_p13 = por %p6194_p11, %p6193_p2 }
  0x51   : > { %p6196_p5 = scmp.lt.u32.totalorder %s6187_s19, %s6657_s5 }
  0x52   : > { %p6191_p0 = pneg %p6190_p12 }
  0x53   : > { %p6197_p9 = por %p6196_p5, %p6195_p13 }
  0x55   : > { %p6198_p3 = pnand %p6197_p9, %p6191_p0 }
  0x57   : > { %6201 = shalt.err (!%p6198_p3)
}
  0x58   : > { %s6202_s22 = scalar_lea.vmem %s6659_s21, 4096  ;;  %s6433_s10 = smov [#allocation5]  }
  0x59   : > { %p6203_p6 = scmp.ne.s32.totalorder %s6659_s21, %s6202_s22  ;;  %s6207_s18 = sshll.u32 %s6433_s10, 4  ;;  %s6208_s18 = int_to_ptr.vmem [resolvable:$false] %s6207_s18 }
  0x5a   : > { %s6209_s27 = scalar_lea.vmem %s6208_s18, 8192  ;;  %p6210_p1 = scmp.lt.s32.totalorder %s6659_s21, %s6208_s18 }
  0x5b   : > { %p6205_p4 = pnand %p6203_p6, %p6669_p10  ;;  %p6211_p7 = scmp.lt.s32.totalorder %s6209_s27, %s6202_s22 }
  0x5d   : > { %p6206_p12 = pneg %p6205_p4  ;;  %p6212_p2 = por %p6211_p7, %p6210_p1 }
  0x5f   : > { %p6213_p11 = pnand %p6212_p2, %p6206_p12 }
  0x61   : > { %6216 = shalt.err (!%p6213_p11)
}
  0x62   : > { %s9957_s19 = smov 128   ;;  %s9959_s16 = smov 8  }
  0x63   : > { %5987 = dma.hbm_to_vmem [thread:$0]  (!%p6642_p8), %s6657_s5, 4096, %s6659_s21, %s6663_s28, %s9957_s19, %s9957_s19, %s9959_s16  }
  0x64   : > { %s6217_s22 = scalar_lea.hbm %s9928_s9, 1024  ;;  %p10220_p7 = scmp.ne.s32.totalorder %s10213_s12, 0 }
  0x65   : > { %p6218_p1 = scmp.ne.s32.totalorder %s9928_s9, %s6217_s22  ;;  %p6224_p5 = scmp.lt.u32.totalorder %s6217_s22, %s9928_s9 }
  0x67   : > { %p6220_p0 = pnand %p6218_p1, %p10220_p7 }
  0x69   : > { %p6221_p13 = pneg %p6220_p0 }
  0x6b   : > { %p6226_p9 = pnand %p6224_p5, %p6221_p13 }
  0x6d   : > { %6229 = shalt.err (!%p6226_p9)
}
  0x6e   : > { %s6230_s6 = scalar_lea.vmem %s430_s29, 1024  ;;  %p6238_p12 = scmp.lt.s32.totalorder %s430_s29, %s430_s29 }
  0x6f   : > { %p6231_p3 = scmp.ne.s32.totalorder %s430_s29, %s6230_s6  ;;  %p6239_p2 = scmp.lt.s32.totalorder %s6230_s6, %s6230_s6 }
  0x71   : > { %p6233_p6 = pnand %p6231_p3, %p10220_p7  ;;  %p6240_p11 = por %p6239_p2, %p6238_p12 }
  0x73   : > { %p6234_p4 = pneg %p6233_p6 }
  0x75   : > { %p6241_p8 = pnand %p6240_p11, %p6234_p4 }
  0x77   : > { %6244 = shalt.err (!%p6241_p8)
}
  0x78   : > { %p10221_p1 = scmp.ne.s32.totalorder %s10210_s23, 0  ;;  %s10222_s5 = smov 4  }
  0x79   : > { %s10223_s21 = smov 64   ;;  %s6436_s24 = smov [#allocation11]  }
  0x7a   : > { %5977 = dma.hbm_to_vmem [thread:$0]  (!%p10221_p1), %s9928_s9, 1024, %s430_s29, [#allocation9], %s10223_s21, %s10223_s21, %s10222_s5  }
  0x7b   : > { %s445_s10 = sshll.u32 %s6436_s24, 4  ;;  %s4273_s22 = sshll.u32 %s6633_s15, 4  ;;  %s446_s10 = int_to_ptr.vmem [resolvable:$true] %s445_s10 }
  0x7c   : > { %s6245_s27 = scalar_lea.hbm %s9930_s11, 1024 }
  0x7d   : > { %p6246_p8 = scmp.ne.s32.totalorder %s9930_s11, %s6245_s27  ;;  %p6252_p5 = scmp.lt.u32.totalorder %s6245_s27, %s9930_s11 }
  0x7f   : > { %p6248_p0 = pnand %p6246_p8, %p10220_p7 }
  0x81   : > { %p6249_p13 = pneg %p6248_p0 }
  0x83   : > { %p6254_p9 = pnand %p6252_p5, %p6249_p13 }
  0x85   : > { %6257 = shalt.err (!%p6254_p9)
}
  0x86   : > { %s6258_s29 = scalar_lea.vmem %s446_s10, 1024  ;;  %p6266_p12 = scmp.lt.s32.totalorder %s446_s10, %s446_s10 }
  0x87   : > { %p6259_p3 = scmp.ne.s32.totalorder %s446_s10, %s6258_s29  ;;  %p6267_p2 = scmp.lt.s32.totalorder %s6258_s29, %s6258_s29 }
  0x89   : > { %p6261_p6 = pnand %p6259_p3, %p10220_p7  ;;  %p6268_p11 = por %p6267_p2, %p6266_p12 }
  0x8b   : > { %p6262_p4 = pneg %p6261_p6 }
  0x8d   : > { %p6269_p10 = pnand %p6268_p11, %p6262_p4 }
  0x8f   : > { %6272 = shalt.err (!%p6269_p10)
}
  0x90   : > { %5980 = dma.hbm_to_vmem [thread:$0]  (!%p10221_p1), %s9930_s11, 1024, %s446_s10, [#allocation12], %s10223_s21, %s10223_s21, %s10222_s5  }
  0x91   : > { %s6744_s30 = scalar_lea.hbm %s9919_s0, %s6638_s13  ;;  %s466_s23 = scalar_lea.vmem [#allocation2], %s4273_s22 }
  0x92   : > { %s479_s24 = sshll.u32 %s466_s23, 4  ;;  %s6748_s18 = scalar_lea.vmem [#allocation7], %s4273_s22  ;;  %s6746_s24 = int_to_ptr.vmem [resolvable:$true] %s479_s24 }
  0x93   : > { %s529_s6 = sshll.u32 %s6748_s18, 4  ;;  %s463_s27 = scalar_lea.sflag [#allocation3], %s6633_s15  ;;  %s6780_s6 = int_to_ptr.vmem [resolvable:$true] %s529_s6 }
  0x94   : > { %s6273_s1 = scalar_lea.hbm %s6744_s30, 256  ;;  %p10224_p7 = scmp.ne.s32.totalorder %s10219_s25, 0 }
  0x95   : > { %p6274_p10 = scmp.ne.s32.totalorder %s6744_s30, %s6273_s1  ;;  %s6278_s10 = scalar_lea.hbm %s9919_s0, 8192 }
  0x96   : > { %p6279_p0 = scmp.lt.u32.totalorder %s6744_s30, %s9919_s0  ;;  %p6280_p13 = scmp.lt.u32.totalorder %s6278_s10, %s6273_s1 }
  0x97   : > { %p6276_p1 = pnand %p6274_p10, %p10224_p7  ;;  %p6282_p9 = scmp.lt.u32.totalorder %s6273_s1, %s6744_s30 }
  0x98   : > { %p6281_p5 = por %p6280_p13, %p6279_p0 }
  0x99   : > { %p6277_p8 = pneg %p6276_p1 }
  0x9a   : > { %p6283_p3 = por %p6282_p9, %p6281_p5 }
  0x9c   : > { %p6284_p6 = pnand %p6283_p3, %p6277_p8 }
  0x9e   : > { %6287 = shalt.err (!%p6284_p6)
}
  0x9f   : > { %s6288_s22 = scalar_lea.vmem %s6746_s24, 256  ;;  %s6437_s19 = smov [#allocation2]  }
  0xa0   : > { %p6289_p4 = scmp.ne.s32.totalorder %s6746_s24, %s6288_s22  ;;  %s6293_s12 = sshll.u32 %s6437_s19, 4  ;;  %s6294_s12 = int_to_ptr.vmem [resolvable:$false] %s6293_s12 }
  0xa1   : > { %s6295_s16 = scalar_lea.vmem %s6294_s12, 512  ;;  %p6296_p11 = scmp.lt.s32.totalorder %s6746_s24, %s6294_s12 }
  0xa2   : > { %p6291_p12 = pnand %p6289_p4, %p10224_p7  ;;  %p6297_p10 = scmp.lt.s32.totalorder %s6295_s16, %s6288_s22 }
  0xa4   : > { %p6292_p2 = pneg %p6291_p12  ;;  %p6298_p1 = por %p6297_p10, %p6296_p11 }
  0xa6   : > { %p6299_p0 = pnand %p6298_p1, %p6292_p2 }
  0xa8   : > { %6302 = shalt.err (!%p6299_p0)
}
  0xa9   : > { %p10225_p8 = scmp.ne.s32.totalorder %s10215_s8, 0  ;;  %s10226_s23 = smov 8  }
  0xaa   : > { %s10227_s1 = smov 128   ;;  %s5022_s5 = sadd.s32 3840, %s6638_s13 }
  0xab   : > { %5984 = dma.hbm_to_vmem [thread:$0]  (!%p10225_p8), %s6744_s30, 256, %s6746_s24, %s463_s27, %s10227_s1, %s10227_s1, %s10226_s23  }
  0xac   : > { %s6786_s29 = scalar_lea.hbm %s9921_s2, %s5022_s5  ;;  %s6308_s24 = scalar_lea.hbm %s9921_s2, 8192 }
  0xad   : > { %s6303_s15 = scalar_lea.hbm %s6786_s29, 256  ;;  %p6309_p3 = scmp.lt.u32.totalorder %s6786_s29, %s9921_s2 }
  0xae   : > { %p6304_p13 = scmp.ne.s32.totalorder %s6786_s29, %s6303_s15  ;;  %p6310_p6 = scmp.lt.u32.totalorder %s6308_s24, %s6303_s15 }
  0xaf   : > { %p6312_p12 = scmp.lt.u32.totalorder %s6303_s15, %s6786_s29 }
  0xb0   : > { %p6306_p5 = pnand %p6304_p13, %p10224_p7  ;;  %p6311_p4 = por %p6310_p6, %p6309_p3 }
  0xb2   : > { %p6307_p9 = pneg %p6306_p5  ;;  %p6313_p2 = por %p6312_p12, %p6311_p4 }
  0xb4   : > { %p6314_p11 = pnand %p6313_p2, %p6307_p9 }
  0xb6   : > { %6317 = shalt.err (!%p6314_p11)
}
  0xb7   : > { %s6318_s27 = scalar_lea.vmem %s6780_s6, 256  ;;  %s6438_s22 = smov [#allocation7]  }
  0xb8   : > { %p6319_p10 = scmp.ne.s32.totalorder %s6780_s6, %s6318_s27  ;;  %s6323_s19 = sshll.u32 %s6438_s22, 4  ;;  %s6324_s19 = int_to_ptr.vmem [resolvable:$false] %s6323_s19 }
  0xb9   : > { %s6325_s12 = scalar_lea.vmem %s6324_s19, 512  ;;  %p6326_p13 = scmp.lt.s32.totalorder %s6780_s6, %s6324_s19 }
  0xba   : > { %p6321_p1 = pnand %p6319_p10, %p10224_p7  ;;  %p6327_p5 = scmp.lt.s32.totalorder %s6325_s12, %s6318_s27 }
  0xbc   : > { %p6322_p0 = pneg %p6321_p1  ;;  %p6328_p3 = por %p6327_p5, %p6326_p13 }
  0xbe   : > { %p6329_p6 = pnand %p6328_p3, %p6322_p0 }
  0xc0   : > { %6332 = shalt.err (!%p6329_p6)
}
  0xc1   : > { %5990 = dma.hbm_to_vmem [thread:$0]  (!%p10225_p8), %s6786_s29, 256, %s6780_s6, %s6663_s28, %s10227_s1, %s10227_s1, %s10226_s23  }
  0xc2   : > { %p10228_p7 = scmp.ne.s32.totalorder %s10209_s20, 0 }
  0xc4   : > { %541 = sbr.rel (%p10228_p7) target bundleno = 1393 (0x571), region = 72 }
  0xcb   : > { %s6816_s25 = sand.u32 1, %s6411_s26   ;;  %p10229_p9 = scmp.ne.s32.totalorder %s10204_s17, 0 }
  0xcc   : > { %s4283_s16 = sshll.u32 %s6816_s25, 4  ;;  %s544_s5 = scalar_lea.sflag [#allocation3], %s6816_s25 }
  0xcd   : > { %s6820_s21 = scalar_lea.vmem [#allocation2], %s4283_s16 }
  0xce   : > { %6386 = dma.done.wait (%p10229_p9), %s544_s5, 256  }
  0xcf   : > { %6388 = vsyncadd (%p10229_p9), %s544_s5, 4294967040  ;;  %s552_s8 = sand.u32 1, %s6544_s14   ;;  %s4284_s20 = sshll.u32 %s6816_s25, 8 }
  0xd0   : > { %s553_s28 = scalar_lea.sflag [#allocation6], %s552_s8  ;;  %s6830_s6 = scalar_lea.vmem [#allocation5], %s4284_s20 }
  0xd1   : > { %6390 = dma.done.wait (%p10229_p9), %s553_s28, 4352  }
  0xd2   : > { %6392 = vsyncadd (%p10229_p9), %s553_s28, 4294962944  ;;  %s6836_s23 = scalar_lea.vmem [#allocation7], %s4283_s16  ;;  %p10230_p8 = scmp.eq.s32.totalorder %s6544_s14, 0 }
  0xd4   : > { %6394 = dma.done.wait (%p10230_p8), [#allocation9], 2048   ;;  %p10231_p4 = pmov %p10230_p8 }
  0xd6   : > { %6396 = vsyncadd (%p10231_p4), [#allocation9], 4294965248  ;;  %p10232_p12 = pmov %p10231_p4 }
  0xd7   : > { %p10233_p2 = pmov %p10231_p4 }
  0xd8   : > { %6398 = dma.done.wait (%p10232_p12), [#allocation12], 1024  }
  0xd9   : > { %6400 = vsyncadd (%p10233_p2), [#allocation12], 4294966272  ;;  %v6439_v0 = vmov 0   ;;  %v6851_v1 = vld [vmem:[%s9923_s4 + $0x8] sm:$0xff]  ;;  %v6856_v2 = vld [vmem:[%s9923_s4] sm:$0xff]  ;;  %s10310_s28 = sld [smem:[#allocation139_spill]] }
  0xda   : > { %6062 = vset.pattern.permute.xlu0 %v6439_v0  ;;  %6061 = vset.pattern.permute.xlu1 %v6439_v0  ;;  %vm1416_vm0 = vcmp.eq.s32.totalorder %v6851_v1, 0  ;;  %vm1415_vm1 = vcmp.eq.s32.totalorder %v6856_v2, 0  ;;  %v6063_v3 = vld [vmem:[#allocation8] sm:$0xff]   ;;  %v1017_v4 = vld [vmem:[%s9922_s3 + $0x118] sm:$0xff]  ;;  %v6064_v8 = vld [vmem:[#allocation8 + $0x8] sm:$0xff]   ;;  %s10901_s7 = sld [smem:[#allocation142_spill]] }
  0xdb   : > { %v1527_v5 = vsel %vm1416_vm0, 1, %v6439_v0  ;;  %v1526_v6 = vsel %vm1415_vm1, 1, %v6439_v0  ;;  %vm1090_vm2 = vcmp.ge.s32.totalorder %v1017_v4, 0  ;;  %vm1126_vm3 = vcmp.lt.s32.totalorder %v1017_v4, 16  ;;  %v982_v7 = vld [vmem:[%s9922_s3] sm:$0xff]  ;;  %5643 = vmatprep.subr.bf16.mxu0 %v6063_v3  ;;  %v984_v10 = vld [vmem:[%s9922_s3 + $0x10] sm:$0xff] }
  0xdc   : > { %1566 = vperm.xlu0 %6062, %v1527_v5   ;;  %1563 = vperm.xlu1 %6061, %v1526_v6   ;;  %vm1162_vm4 = vmand %vm1090_vm2, %vm1126_vm3  ;;  %vm1055_vm5 = vcmp.ge.s32.totalorder %v982_v7, 0  ;;  %vm1091_vm6 = vcmp.lt.s32.totalorder %v982_v7, 16  ;;  %v983_v11 = vld [vmem:[%s9922_s3 + $0x8] sm:$0xff]  ;;  %vm1057_vm8 = vcmp.ge.s32.totalorder %v984_v10, 0  ;;  %vm1093_vm9 = vcmp.lt.s32.totalorder %v984_v10, 16  ;;  %v6065_v13 = vld [vmem:[#allocation8 + $0x10] sm:$0xff]  }
  0xdd   : > { %v1198_v9 = vsel %vm1162_vm4, 1, %v6439_v0  ;;  %vm1127_vm7 = vmand %vm1055_vm5, %vm1091_vm6  ;;  %5644 = vmatpush3.bf16.msra.mxu0 %v6063_v3  ;;  %vm1056_vm10 = vcmp.ge.s32.totalorder %v983_v11, 0  ;;  %vm1092_vm12 = vcmp.lt.s32.totalorder %v983_v11, 16  ;;  %v6879_v14 = vld [vmem:[%s9923_s4 + $0x10] sm:$0xff]  ;;  %v985_v15 = vld [vmem:[%s9922_s3 + $0x18] sm:$0xff]  ;;  %s10902_s18 = sld [smem:[#allocation143_spill]] }
  0xde   : > { %v1163_v12 = vsel %vm1127_vm7, 1, %v6439_v0  ;;  %5645 = vmatprep.subr.bf16.mxu0 %v6064_v8  ;;  %vm1129_vm11 = vmand %vm1057_vm8, %vm1093_vm9  ;;  %vm1058_vm14 = vcmp.ge.s32.totalorder %v985_v15, 0  ;;  %vm1094_vm15 = vcmp.lt.s32.totalorder %v985_v15, 16  ;;  %vm1417_vm0 = vcmp.eq.s32.totalorder %v6879_v14, 0  ;;  %v6066_v18 = vld [vmem:[#allocation8 + $0x18] sm:$0xff]   ;;  %v986_v19 = vld [vmem:[%s9922_s3 + $0x20] sm:$0xff] }
  0xdf   : > { %vm1128_vm13 = vmand %vm1056_vm10, %vm1092_vm12  ;;  %v1165_v16 = vsel %vm1129_vm11, 1, %v6439_v0  ;;  %v6893_v20 = vld [vmem:[%s9923_s4 + $0x18] sm:$0xff]  ;;  %vm1059_vm2 = vcmp.ge.s32.totalorder %v986_v19, 0  ;;  %vm1095_vm3 = vcmp.lt.s32.totalorder %v986_v19, 16  ;;  %v1528_v21 = vsel %vm1417_vm0, 1, %v6439_v0  ;;  %v987_v23 = vld [vmem:[%s9922_s3 + $0x28] sm:$0xff] }
  0xe0   : > { %1305 = vperm.xlu1 %6061, %v1198_v9   ;;  %1200 = vperm.xlu0 %6062, %v1163_v12   ;;  %v1164_v17 = vsel %vm1128_vm13, 1, %v6439_v0  ;;  %vm1130_vm1 = vmand %vm1058_vm14, %vm1094_vm15  ;;  %vm1418_vm5 = vcmp.eq.s32.totalorder %v6893_v20, 0  ;;  %v6067_v24 = vld [vmem:[#allocation8 + $0x20] sm:$0xff]   ;;  %vm1060_vm6 = vcmp.ge.s32.totalorder %v987_v23, 0  ;;  %vm1096_vm7 = vcmp.lt.s32.totalorder %v987_v23, 16  ;;  %v988_v26 = vld [vmem:[%s9922_s3 + $0x30] sm:$0xff] }
  0xe1   : > { %5646 = vmatpush3.bf16.msra.mxu0 %v6064_v8  ;;  %v1166_v22 = vsel %vm1130_vm1, 1, %v6439_v0  ;;  %vm1131_vm4 = vmand %vm1059_vm2, %vm1095_vm3  ;;  %v6904_v25 = vld [vmem:[%s9923_s4 + $0x20] sm:$0xff]  ;;  %v1529_v28 = vsel %vm1418_vm5, 1, %v6439_v0  ;;  %v6068_v29 = vld [vmem:[#allocation8 + $0x28] sm:$0xff]   ;;  %vm1061_vm10 = vcmp.ge.s32.totalorder %v988_v26, 0  ;;  %vm1097_vm11 = vcmp.lt.s32.totalorder %v988_v26, 16 }
  0xe2   : > { %5647 = vmatprep.subr.bf16.mxu0 %v6065_v13  ;;  %v1167_v27 = vsel %vm1131_vm4, 1, %v6439_v0  ;;  %vm1419_vm8 = vcmp.eq.s32.totalorder %v6904_v25, 0  ;;  %vm1132_vm9 = vmand %vm1060_vm6, %vm1096_vm7  ;;  %v6915_v30 = vld [vmem:[%s9923_s4 + $0x28] sm:$0xff]  ;;  %v989_v31 = vld [vmem:[%s9922_s3 + $0x38] sm:$0xff]  ;;  %s9801_s13 = scalar_lea.vmem [#allocation13], %s4284_s20  ;;  %s10903_s20 = sld [smem:[#allocation21_spill]] }
  0xe3   : > { %v1530_v32 = vsel %vm1419_vm8, 1, %v6439_v0  ;;  %v1168_v33 = vsel %vm1132_vm9, 1, %v6439_v0  ;;  %v643_v34 = vld [vmem:[%s6820_s21] sm:$0xff]  ;;  %v644_v35 = vld [vmem:[%s6820_s21 + $0x8] sm:$0xff]  ;;  %vm1133_vm12 = vmand %vm1061_vm10, %vm1097_vm11  ;;  %vm1420_vm13 = vcmp.eq.s32.totalorder %v6915_v30, 0  ;;  %vm1062_vm14 = vcmp.ge.s32.totalorder %v989_v31, 0 }
  0xe4   : > { %1206 = vperm.xlu1 %6061, %v1165_v16   ;;  %1203 = vperm.xlu0 %6062, %v1164_v17   ;;  %v645_v36 = vpack.c.bf16 %v644_v35, %v643_v34  ;;  %v6069_v37 = vld [vmem:[#allocation8 + $0x30] sm:$0xff]   ;;  %vm1098_vm15 = vcmp.lt.s32.totalorder %v989_v31, 16  ;;  %v990_v39 = vld [vmem:[%s9922_s3 + $0x40] sm:$0xff]  ;;  %v1169_v40 = vsel %vm1133_vm12, 1, %v6439_v0  ;;  %v1531_v41 = vsel %vm1420_vm13, 1, %v6439_v0  ;;  %v6070_v42 = vld [vmem:[#allocation8 + $0x38] sm:$0xff]  }
  0xe5   : > { %5648 = vmatpush3.bf16.msra.mxu0 %v6065_v13  ;;  %v6928_v38 = vld [vmem:[%s9923_s4 + $0x30] sm:$0xff]  ;;  %vm1134_vm1 = vmand %vm1062_vm14, %vm1098_vm15  ;;  %vm1063_vm2 = vcmp.ge.s32.totalorder %v990_v39, 0  ;;  %vm1099_vm3 = vcmp.lt.s32.totalorder %v990_v39, 16  ;;  %v6939_v43 = vld [vmem:[%s9923_s4 + $0x38] sm:$0xff]  ;;  %s10265_s21 = sld [smem:[#allocation140_spill]]  ;;  %s4101_s22 = sshll.u32 %s9801_s13, 4  ;;  %s9866_s22 = int_to_ptr.vmem [resolvable:$true] %s4101_s22 }
  0xe6   : > { %5649 = vmatprep.subr.bf16.mxu0 %v6066_v18  ;;  %5659 = vmatprep.mubr.bf16.mxu0 %v645_v36  ;;  %vm1421_vm0 = vcmp.eq.s32.totalorder %v6928_v38, 0  ;;  %v991_v44 = vld [vmem:[%s9922_s3 + $0x48] sm:$0xff]  ;;  %v1170_v46 = vsel %vm1134_vm1, 1, %v6439_v0  ;;  %vm1135_vm4 = vmand %vm1063_vm2, %vm1099_vm3  ;;  %vm1422_vm5 = vcmp.eq.s32.totalorder %v6939_v43, 0  ;;  %v646_v47 = vld [vmem:[%s6830_s6] sm:$0xff]  ;;  %s10904_s19 = sld [smem:[#allocation24_spill]] }
  0xe7   : > { %v1532_v45 = vsel %vm1421_vm0, 1, %v6439_v0  ;;  %v647_v48 = vld [vmem:[%s6830_s6 + $0x8] sm:$0xff]  ;;  %v6952_v49 = vld [vmem:[%s9923_s4 + $0x40] sm:$0xff]  ;;  %vm1064_vm6 = vcmp.ge.s32.totalorder %v991_v44, 0  ;;  %vm1100_vm7 = vcmp.lt.s32.totalorder %v991_v44, 16  ;;  %v648_v50 = vld [vmem:[%s6830_s6 + $0x10] sm:$0xff] }
  0xe8   : > { %1569 = vperm.xlu1 %6061, %v1528_v21   ;;  %1209 = vperm.xlu0 %6062, %v1166_v22   ;;  %v649_v51 = vld [vmem:[%s6830_s6 + $0x18] sm:$0xff]  ;;  %v992_v52 = vld [vmem:[%s9922_s3 + $0x50] sm:$0xff]  ;;  %v1171_v53 = vsel %vm1135_vm4, 1, %v6439_v0  ;;  %v1533_v54 = vsel %vm1422_vm5, 1, %v6439_v0  ;;  %v6961_v55 = vpack.c.bf16 %v647_v48, %v646_v47  ;;  %vm1423_vm8 = vcmp.eq.s32.totalorder %v6952_v49, 0  ;;  %vm1136_vm9 = vmand %vm1064_vm6, %vm1100_vm7  ;;  %s5023_s27 = sshll.u32 %s10903_s20, 12 }
  0xe9   : > { %5650 = vmatpush3.bf16.msra.mxu0 %v6066_v18  ;;  %v6964_v56 = vpack.c.bf16 %v649_v51, %v648_v50  ;;  %vm1065_vm10 = vcmp.ge.s32.totalorder %v992_v52, 0  ;;  %vm1101_vm11 = vcmp.lt.s32.totalorder %v992_v52, 16  ;;  %v6969_v57 = vld [vmem:[%s9923_s4 + $0x48] sm:$0xff]  ;;  %v993_v58 = vld [vmem:[%s9922_s3 + $0x58] sm:$0xff]  ;;  %v1534_v59 = vsel %vm1423_vm8, 1, %v6439_v0  ;;  %v650_v61 = vld [vmem:[%s6830_s6 + $0x20] sm:$0xff] }
  0xea   : > { %5651 = vmatprep.subr.bf16.mxu0 %v6067_v24  ;;  %10234 = vst [vmem:[#allocation28_spill] sm:$0xff] %v6961_v55  ;;  %v1172_v60 = vsel %vm1136_vm9, 1, %v6439_v0  ;;  %vm1137_vm12 = vmand %vm1065_vm10, %vm1101_vm11  ;;  %vm1424_vm13 = vcmp.eq.s32.totalorder %v6969_v57, 0  ;;  %v651_v62 = vld [vmem:[%s6830_s6 + $0x28] sm:$0xff]  ;;  %v6984_v63 = vld [vmem:[%s9923_s4 + $0x50] sm:$0xff]  ;;  %vm1066_vm14 = vcmp.ge.s32.totalorder %v993_v58, 0 }
  0xeb   : > { %10235 = vst [vmem:[#allocation29_spill] sm:$0xff] %v6964_v56  ;;  %vm1102_vm15 = vcmp.lt.s32.totalorder %v993_v58, 16  ;;  %v652_v3 = vld [vmem:[%s6830_s6 + $0x30] sm:$0xff]  ;;  %v653_v4 = vld [vmem:[%s6830_s6 + $0x38] sm:$0xff]  ;;  %v994_v5 = vld [vmem:[%s9922_s3 + $0x60] sm:$0xff]  ;;  %v1173_v6 = vsel %vm1137_vm12, 1, %v6439_v0  ;;  %v6993_v8 = vpack.c.bf16 %v651_v62, %v650_v61 }
  0xec   : > { %1212 = vperm.xlu1 %6061, %v1167_v27   ;;  %1572 = vperm.xlu0 %6062, %v1529_v28   ;;  %v1535_v7 = vsel %vm1424_vm13, 1, %v6439_v0  ;;  %vm1425_vm0 = vcmp.eq.s32.totalorder %v6984_v63, 0  ;;  %vm1138_vm1 = vmand %vm1066_vm14, %vm1102_vm15  ;;  %v6996_v9 = vpack.c.bf16 %v653_v4, %v652_v3  ;;  %vm1067_vm2 = vcmp.ge.s32.totalorder %v994_v5, 0  ;;  %v7001_v10 = vld [vmem:[%s9923_s4 + $0x58] sm:$0xff]  ;;  %v996_v11 = vld [vmem:[%s9922_s3 + $0x70] sm:$0xff]  ;;  %s10905_s5 = sld [smem:[#allocation144_spill]] }
  0xed   : > { %5652 = vmatpush3.bf16.msra.mxu0 %v6067_v24  ;;  %10236 = vst [vmem:[#allocation30_spill] sm:$0xff] %v6993_v8  ;;  %vm1103_vm3 = vcmp.lt.s32.totalorder %v994_v5, 16  ;;  %v995_v12 = vld [vmem:[%s9922_s3 + $0x68] sm:$0xff]  ;;  %v1536_v13 = vsel %vm1425_vm0, 1, %v6439_v0  ;;  %v1174_v15 = vsel %vm1138_vm1, 1, %v6439_v0  ;;  %vm1426_vm5 = vcmp.eq.s32.totalorder %v7001_v10, 0 }
  0xee   : > { %5653 = vmatprep.subr.bf16.mxu0 %v6068_v29  ;;  %10237 = vst [vmem:[#allocation31_spill] sm:$0xff] %v6996_v9  ;;  %vm1139_vm4 = vmand %vm1067_vm2, %vm1103_vm3  ;;  %v654_v16 = vld [vmem:[%s6830_s6 + $0x40] sm:$0xff]  ;;  %v655_v17 = vld [vmem:[%s6830_s6 + $0x48] sm:$0xff]  ;;  %vm1069_vm6 = vcmp.ge.s32.totalorder %v996_v11, 0  ;;  %vm1105_vm7 = vcmp.lt.s32.totalorder %v996_v11, 16  ;;  %vm1068_vm8 = vcmp.ge.s32.totalorder %v995_v12, 0 }
  0xef   : > { %vm1104_vm9 = vcmp.lt.s32.totalorder %v995_v12, 16  ;;  %v656_v18 = vld [vmem:[%s6830_s6 + $0x50] sm:$0xff]  ;;  %v657_v19 = vld [vmem:[%s6830_s6 + $0x58] sm:$0xff]  ;;  %v1175_v22 = vsel %vm1139_vm4, 1, %v6439_v0  ;;  %v1537_v23 = vsel %vm1426_vm5, 1, %v6439_v0  ;;  %v7023_v24 = vpack.c.bf16 %v655_v17, %v654_v16  ;;  %vm1141_vm10 = vmand %vm1069_vm6, %vm1105_vm7  ;;  %s6333_s17 = scalar_lea.vmem %s9866_s22, 4096 }
  0xf0   : > { %1575 = vperm.xlu1 %6061, %v1530_v32   ;;  %1215 = vperm.xlu0 %6062, %v1168_v33   ;;  %v997_v21 = vld [vmem:[%s9922_s3 + $0x78] sm:$0xff]  ;;  %vm1140_vm11 = vmand %vm1068_vm8, %vm1104_vm9  ;;  %v7025_v26 = vpack.c.bf16 %v657_v19, %v656_v18  ;;  %v7030_v27 = vld [vmem:[%s9923_s4 + $0x60] sm:$0xff]  ;;  %vm1742_vm14 = vcmp.eq.s32.totalorder %v6856_v2, 15  ;;  %vm1743_vm15 = vcmp.eq.s32.totalorder %v6851_v1, 15  ;;  %v1177_v28 = vsel %vm1141_vm10, 1, %v6439_v0  ;;  %p6334_p11 = scmp.ne.s32.totalorder %s9866_s22, %s6333_s17  ;;  %p10906_p10 = scmp.ne.s32.totalorder %s10904_s19, 0 }
  0xf1   : > { %5654 = vmatpush3.bf16.msra.mxu0 %v6068_v29  ;;  %10238 = vst [vmem:[#allocation32_spill] sm:$0xff] %v7023_v24  ;;  %vm1070_vm12 = vcmp.ge.s32.totalorder %v997_v21, 0  ;;  %vm1106_vm13 = vcmp.lt.s32.totalorder %v997_v21, 16  ;;  %v1176_v29 = vsel %vm1140_vm11, 1, %v6439_v0  ;;  %vm1427_vm0 = vcmp.eq.s32.totalorder %v7030_v27, 0  ;;  %v658_v31 = vld [vmem:[%s6830_s6 + $0x60] sm:$0xff] }
  0xf2   : > { %5655 = vmatprep.subr.bf16.mxu0 %v6069_v37  ;;  %10239 = vst [vmem:[#allocation33_spill] sm:$0xff] %v7025_v26  ;;  %v659_v32 = vld [vmem:[%s6830_s6 + $0x68] sm:$0xff]  ;;  %vm1744_vm1 = vcmp.eq.s32.totalorder %v6879_v14, 15  ;;  %vm1142_vm2 = vmand %vm1070_vm12, %vm1106_vm13  ;;  %v7045_v33 = vld [vmem:[%s9923_s4 + $0x70] sm:$0xff]  ;;  %vm1745_vm3 = vcmp.eq.s32.totalorder %v6893_v20, 15  ;;  %v1538_v14 = vsel %vm1427_vm0, 1, %v6439_v0  ;;  %s9864_s8 = scalar_lea.hbm %s10905_s5, %s5023_s27  ;;  %p6335_p1 = pnand %p6334_p11, %p10906_p10 }
  0xf3   : > { %v7050_v34 = vld [vmem:[%s9923_s4 + $0x68] sm:$0xff]  ;;  %v660_v35 = vld [vmem:[%s6830_s6 + $0x70] sm:$0xff]  ;;  %v661_v36 = vld [vmem:[%s6830_s6 + $0x78] sm:$0xff]  ;;  %v7062_v39 = vsel %vm1742_vm14, 1, %v6439_v0  ;;  %v7070_v20 = vsel %vm1744_vm1, 1, %v6439_v0  ;;  %vm1429_vm4 = vcmp.eq.s32.totalorder %v7045_v33, 0 }
  0xf4   : > { %1218 = vperm.xlu1 %6061, %v1169_v40   ;;  %1578 = vperm.xlu0 %6062, %v1531_v41   ;;  %v7067_v40 = vsel %vm1743_vm15, 1, %v6439_v0  ;;  %v1178_v41 = vsel %vm1142_vm2, 1, %v6439_v0  ;;  %vm1428_vm5 = vcmp.eq.s32.totalorder %v7050_v34, 0  ;;  %v7077_v2 = vpack.c.bf16 %v661_v36, %v660_v35  ;;  %v999_v1 = vld [vmem:[%s9922_s3 + $0x88] sm:$0xff]  ;;  %v662_v50 = vld [vmem:[%s6830_s6 + $0x80] sm:$0xff]  ;;  %v1001_v51 = vld [vmem:[%s9922_s3 + $0x98] sm:$0xff]  ;;  %p6336_p0 = pneg %p6335_p1 }
  0xf5   : > { %5656 = vmatpush3.bf16.msra.mxu0 %v6069_v37  ;;  %v998_v37 = vld [vmem:[%s9922_s3 + $0x80] sm:$0xff]  ;;  %v7083_v44 = vsel %vm1745_vm3, 1, %v6439_v0  ;;  %vm1746_vm6 = vcmp.eq.s32.totalorder %v6904_v25, 15  ;;  %vm1747_vm7 = vcmp.eq.s32.totalorder %v6915_v30, 15  ;;  %v1540_v47 = vsel %vm1429_vm4, 1, %v6439_v0  ;;  %v663_v52 = vld [vmem:[%s6830_s6 + $0x88] sm:$0xff] }
  0xf6   : > { %5657 = vmatprep.subr.bf16.mxu0 %v6070_v42  ;;  %10241 = vst [vmem:[#allocation35_spill] sm:$0xff] %v7077_v2  ;;  %vm1071_vm8 = vcmp.ge.s32.totalorder %v998_v37, 0  ;;  %vm1107_vm9 = vcmp.lt.s32.totalorder %v998_v37, 16  ;;  %v1539_v48 = vsel %vm1428_vm5, 1, %v6439_v0  ;;  %vm1072_vm10 = vcmp.ge.s32.totalorder %v999_v1, 0  ;;  %v7115_v58 = vld [vmem:[%s9923_s4 + $0x80] sm:$0xff] }
  0xf7   : > { %vm1108_vm11 = vcmp.lt.s32.totalorder %v999_v1, 16  ;;  %vm7107_vm12 = vmand %vm1071_vm8, %vm1107_vm9  ;;  %vm1748_vm0 = vcmp.eq.s32.totalorder %v6928_v38, 15  ;;  %vm1074_vm1 = vcmp.ge.s32.totalorder %v1001_v51, 0  ;;  %vm1110_vm2 = vcmp.lt.s32.totalorder %v1001_v51, 16  ;;  %v7127_v61 = vld [vmem:[%s9923_s4 + $0x90] sm:$0xff]  ;;  %v1002_v11 = vld [vmem:[%s9922_s3 + $0xa0] sm:$0xff] }
  0xf8   : > { %1581 = vperm.xlu1 %6061, %v1532_v45   ;;  %1221 = vperm.xlu0 %6062, %v1170_v46   ;;  %v7090_v45 = vld [vmem:[%s9923_s4 + $0x78] sm:$0xff]  ;;  %v1000_v46 = vld [vmem:[%s9922_s3 + $0x90] sm:$0xff]  ;;  %v7129_v62 = vpack.c.bf16 %v663_v52, %v662_v50  ;;  %vm7133_vm3 = vmand %vm1072_vm10, %vm1108_vm11  ;;  %vm1749_vm4 = vcmp.eq.s32.totalorder %v6939_v43, 15  ;;  %vm1750_vm5 = vcmp.eq.s32.totalorder %v6952_v49, 15  ;;  %vm1751_vm8 = vcmp.eq.s32.totalorder %v6969_v57, 15  ;;  %s6440_s1 = smov [#allocation13]  }
  0xf9   : > { %5658 = vmatpush3.bf16.msra.mxu0 %v6070_v42  ;;  %v7073_v42 = vpack.c.bf16 %v659_v32, %v658_v31  ;;  %vm1430_vm13 = vcmp.eq.s32.totalorder %v7090_v45, 0  ;;  %vm1073_vm14 = vcmp.ge.s32.totalorder %v1000_v46, 0  ;;  %vm1109_vm15 = vcmp.lt.s32.totalorder %v1000_v46, 16  ;;  %v666_v16 = vld [vmem:[%s6830_s6 + $0xa0] sm:$0xff]  ;;  %v667_v17 = vld [vmem:[%s6830_s6 + $0xa8] sm:$0xff]  ;;  %v7221_v31 = vld [vmem:[%s9923_s4 + $0x98] sm:$0xff] }
  0xfa   : > { %10244 = vst [vmem:[#allocation36_spill] sm:$0xff] %v7129_v62  ;;  %v1179_v4 = vsel %vm7107_vm12, 1, %v6439_v0  ;;  %v1541_v5 = vsel %vm1430_vm13, 1, %v6439_v0  ;;  %vm1431_vm9 = vcmp.eq.s32.totalorder %v7115_v58, 0  ;;  %vm7149_vm10 = vmand %vm1073_vm14, %vm1109_vm15  ;;  %vm1433_vm13 = vcmp.eq.s32.totalorder %v7127_v61, 0  ;;  %v1003_v19 = vld [vmem:[%s9922_s3 + $0xa8] sm:$0xff] }
  0xfb   : > { %10240 = vst [vmem:[#allocation34_spill] sm:$0xff] %v7073_v42  ;;  %vm7158_vm12 = vmand %vm1074_vm1, %vm1110_vm2  ;;  %v7166_v57 = vsel %vm1746_vm6, 1, %v6439_v0  ;;  %v7179_v12 = vsel %vm1748_vm0, 1, %v6439_v0  ;;  %v7182_v25 = vsel %vm1749_vm4, 1, %v6439_v0  ;;  %v7188_v30 = vsel %vm1751_vm8, 1, %v6439_v0  ;;  %v7227_v32 = vld [vmem:[%s9923_s4 + $0xa0] sm:$0xff] }
  0xfc   : > { %1224 = vperm.xlu1 %6061, %v1171_v53   ;;  %1584 = vperm.xlu0 %6062, %v1533_v54   ;;  %v664_v53 = vld [vmem:[%s6830_s6 + $0x90] sm:$0xff]  ;;  %v1542_v38 = vsel %vm1431_vm9, 1, %v6439_v0  ;;  %v1181_v21 = vsel %vm7149_vm10, 1, %v6439_v0  ;;  %vm1075_vm6 = vcmp.ge.s32.totalorder %v1002_v11, 0  ;;  %vm1076_vm14 = vcmp.ge.s32.totalorder %v1003_v19, 0  ;;  %v7235_v36 = vld [vmem:[%s9923_s4 + $0xa8] sm:$0xff] }
  0xfd   : > { %5660 = vmatmul.mubr.bf16.vlgmr.msra.gmra.mrb[0].mxu0 %v6961_v55  ;;  %v1004_v35 = vld [vmem:[%s9922_s3 + $0xb0] sm:$0xff]  ;;  %vm1434_vm15 = vcmp.eq.s32.totalorder %v7221_v31, 0  ;;  %vm1112_vm0 = vcmp.lt.s32.totalorder %v1003_v19, 16  ;;  %v7242_v37 = vpack.c.bf16 %v667_v17, %v666_v16  ;;  %vm1435_vm1 = vcmp.eq.s32.totalorder %v7227_v32, 0  ;;  %v670_v46 = vld [vmem:[%s6830_s6 + $0xc0] sm:$0xff]  ;;  %v673_v51 = vld [vmem:[%s6830_s6 + $0xd8] sm:$0xff] }
  0xfe   : > { %5663 = vmatprep.mubr.bf16.mxu0 %v6964_v56  ;;  %vm1077_vm2 = vcmp.ge.s32.totalorder %v1004_v35, 0  ;;  %v672_v50 = vld [vmem:[%s6830_s6 + $0xd0] sm:$0xff]  ;;  %v1007_v52 = vld [vmem:[%s9922_s3 + $0xc8] sm:$0xff]  ;;  %v1545_v3 = vsel %vm1434_vm15, 1, %v6439_v0  ;;  %v674_v49 = vld [vmem:[%s6830_s6 + $0xe0] sm:$0xff]  ;;  %s6337_s10 = sshll.u32 %s6440_s1, 4  ;;  %s6338_s10 = int_to_ptr.vmem [resolvable:$false] %s6337_s10 }
  0xff   : > { %10252 = vst [vmem:[#allocation38_spill] sm:$0xff] %v7242_v37  ;;  %vm1116_vm10 = vcmp.lt.s32.totalorder %v1007_v52, 16  ;;  %v7284_v54 = vpack.c.bf16 %v673_v51, %v672_v50  ;;  %v676_v16 = vld [vmem:[%s6830_s6 + $0xf0] sm:$0xff]  ;;  %v677_v17 = vld [vmem:[%s6830_s6 + $0xf8] sm:$0xff]  ;;  %v7345_v1 = vld [vmem:[%s9923_s4 + $0xc0] sm:$0xff]  ;;  %p6340_p13 = scmp.lt.s32.totalorder %s9866_s22, %s6338_s10 }
 0x100   : > { %1587 = vperm.xlu1 %6061, %v1534_v59   ;;  %1227 = vperm.xlu0 %6062, %v1172_v60   ;;  %v7120_v59 = vld [vmem:[%s9923_s4 + $0x88] sm:$0xff]  ;;  %v665_v60 = vld [vmem:[%s6830_s6 + $0x98] sm:$0xff] }
 0x101   : > { %vm1432_vm11 = vcmp.eq.s32.totalorder %v7120_v59, 0  ;;  %v7154_v43 = vpack.c.bf16 %v665_v60, %v664_v53  ;;  %10257 = vst [vmem:[#allocation41_spill] sm:$0xff] %v7284_v54 }
 0x102   : > { %v1543_v18 = vsel %vm1432_vm11, 1, %v6439_v0  ;;  %vm1148_vm11 = vmand %vm1076_vm14, %vm1112_vm0 }
 0x103   : > { %10249 = vst [vmem:[#allocation37_spill] sm:$0xff] %v7154_v43 }
 0x104   : > { %1230 = vperm.xlu1 %6061, %v1173_v6   ;;  %1590 = vperm.xlu0 %6062, %v1535_v7   ;;  %v7171_v7 = vsel %vm1747_vm7, 1, %v6439_v0  ;;  %vm1111_vm7 = vcmp.lt.s32.totalorder %v1002_v11, 16  ;;  %v675_v11 = vld [vmem:[%s6830_s6 + $0xe8] sm:$0xff] }
 0x105   : > { %5664 = vmatmul.mubr.bf16.gmra.mrb[4].mxu0 %v6993_v8  ;;  %vm7254_vm4 = vmand %vm1075_vm6, %vm1111_vm7  ;;  %vm1080_vm7 = vcmp.ge.s32.totalorder %v1007_v52, 0  ;;  %v1011_v6 = vld [vmem:[%s9922_s3 + $0xe8] sm:$0xff] }
 0x106   : > { %5667 = vmatprep.mubr.bf16.mxu0 %v6996_v9  ;;  %v1183_v60 = vsel %vm7254_vm4, 1, %v6439_v0 }
 0x108   : > { %1593 = vperm.xlu1 %6061, %v1536_v13   ;;  %1233 = vperm.xlu0 %6062, %v1174_v15   ;;  %v7185_v13 = vsel %vm1750_vm5, 1, %v6439_v0  ;;  %v1180_v15 = vsel %vm7133_vm3, 1, %v6439_v0  ;;  %vm1113_vm3 = vcmp.lt.s32.totalorder %v1004_v35, 16  ;;  %vm1436_vm5 = vcmp.eq.s32.totalorder %v7235_v36, 0  ;;  %v694_v35 = vld [vmem:[%s6836_s23] sm:$0xff] }
 0x109   : > { %vm1149_vm6 = vmand %vm1077_vm2, %vm1113_vm3 }
 0x10a   : > { %vm1152_vm2 = vmand %vm1080_vm7, %vm1116_vm10 }
 0x10c   : > { %1236 = vperm.xlu1 %6061, %v1175_v22   ;;  %1596 = vperm.xlu0 %6062, %v1537_v23   ;;  %v668_v22 = vld [vmem:[%s6830_s6 + $0xb0] sm:$0xff]  ;;  %v669_v23 = vld [vmem:[%s6830_s6 + $0xb8] sm:$0xff] }
 0x10d   : > { %5668 = vmatmul.mubr.bf16.gmra.mrb[8].mxu0 %v7023_v24 }
 0x10e   : > { %5671 = vmatprep.mubr.bf16.mxu0 %v7025_v26 }
 0x110   : > { %1242 = vperm.xlu1 %6061, %v1177_v28   ;;  %1239 = vperm.xlu0 %6062, %v1176_v29   ;;  %v1182_v28 = vsel %vm7158_vm12, 1, %v6439_v0  ;;  %v7216_v29 = vsel %vm1433_vm13, 1, %v6439_v0 }
 0x114   : > { %1599 = vperm.xlu1 %6061, %v1538_v14   ;;  %1245 = vperm.xlu0 %6062, %v1178_v41   ;;  %v1005_v14 = vld [vmem:[%s9922_s3 + $0xb8] sm:$0xff]  ;;  %v7245_v41 = vpack.c.bf16 %v669_v23, %v668_v22  ;;  %v1188_v23 = vsel %vm1152_vm2, 1, %v6439_v0  ;;  %vm1084_vm2 = vcmp.ge.s32.totalorder %v1011_v6, 0 }
 0x115   : > { %5672 = vmatmul.mubr.bf16.gmra.mrb[12].mxu0 %v7073_v42  ;;  %vm1078_vm8 = vcmp.ge.s32.totalorder %v1005_v14, 0  ;;  %vm1114_vm9 = vcmp.lt.s32.totalorder %v1005_v14, 16  ;;  %v1008_v14 = vld [vmem:[%s9922_s3 + $0xd0] sm:$0xff] }
 0x116   : > { %5675 = vmatprep.mubr.bf16.mxu0 %v7077_v2  ;;  %10253 = vst [vmem:[#allocation39_spill] sm:$0xff] %v7245_v41  ;;  %vm7298_vm14 = vmand %vm1078_vm8, %vm1114_vm9  ;;  %vm1081_vm3 = vcmp.ge.s32.totalorder %v1008_v14, 0  ;;  %vm1117_vm4 = vcmp.lt.s32.totalorder %v1008_v14, 16  ;;  %v6079_v14 = vld [vmem:[%s10265_s21 + $0x60] sm:$0xff]  }
 0x117   : > { %vm1153_vm10 = vmand %vm1081_vm3, %vm1117_vm4  ;;  %vm1120_vm3 = vcmp.lt.s32.totalorder %v1011_v6, 16  ;;  %vm1754_vm4 = vcmp.eq.s32.totalorder %v7030_v27, 15  ;;  %v1012_v27 = vld [vmem:[%s9922_s3 + $0xf0] sm:$0xff] }
 0x118   : > { %1605 = vperm.xlu1 %6061, %v1540_v47   ;;  %1602 = vperm.xlu0 %6062, %v1539_v48   ;;  %v671_v47 = vld [vmem:[%s6830_s6 + $0xc8] sm:$0xff]  ;;  %v1006_v48 = vld [vmem:[%s9922_s3 + $0xc0] sm:$0xff]  ;;  %v6083_v6 = vld [vmem:[%s10265_s21 + $0x70] sm:$0xff]   ;;  %s6339_s6 = scalar_lea.vmem %s6338_s10, 8192 }
 0x119   : > { %vm1079_vm12 = vcmp.ge.s32.totalorder %v1006_v48, 0  ;;  %vm1115_vm13 = vcmp.lt.s32.totalorder %v1006_v48, 16  ;;  %v7280_v53 = vpack.c.bf16 %v671_v47, %v670_v46  ;;  %v7371_v47 = vld [vmem:[%s9923_s4 + $0xd0] sm:$0xff]  ;;  %v6071_v48 = vld [vmem:[%s10265_s21 + $0x40] sm:$0xff]   ;;  %p6341_p5 = scmp.lt.s32.totalorder %s6339_s6, %s6333_s17 }
 0x11a   : > { %vm1151_vm15 = vmand %vm1079_vm12, %vm1115_vm13  ;;  %5123 = vmatprep.subr.bf16.mxu0 %v6071_v48  ;;  %5839 = vmatprep.subr.bf16.mxu1 %v6071_v48  ;;  %vm1441_vm7 = vcmp.eq.s32.totalorder %v7371_v47, 0 }
 0x11b   : > { %10256 = vst [vmem:[#allocation40_spill] sm:$0xff] %v7280_v53  ;;  %v1187_v22 = vsel %vm1151_vm15, 1, %v6439_v0  ;;  %p6342_p3 = por %p6341_p5, %p6340_p13 }
 0x11c   : > { %1248 = vperm.xlu1 %6061, %v1179_v4   ;;  %1608 = vperm.xlu0 %6062, %v1541_v5   ;;  %v1184_v4 = vsel %vm1148_vm11, 1, %v6439_v0  ;;  %v1546_v5 = vsel %vm1435_vm1, 1, %v6439_v0  ;;  %vm1752_vm11 = vcmp.eq.s32.totalorder %v6984_v63, 15  ;;  %v6073_v63 = vld [vmem:[%s10265_s21 + $0x48] sm:$0xff]  }
 0x11d   : > { %5676 = vmatmul.mubr.bf16.gmra.mrb[16].mxu0 %v7129_v62  ;;  %v1861_v51 = vsel %vm1752_vm11, 1, %v6439_v0  ;;  %vm1121_vm11 = vcmp.lt.s32.totalorder %v1012_v27, 16  ;;  %v7712_v62 = vld [vmem:[%s10310_s28] ss:$0 sm:$0xff]  ;;  %s4086_s28 = scalar_lea.sflag [#allocation4], %s6816_s25  ;;  %p6343_p6 = pnand %p6342_p3, %p6336_p0 }
 0x11e   : > { %5679 = vmatprep.mubr.bf16.mxu0 %v7154_v43  ;;  %v1487_v43 = vlaneseq }
 0x120   : > { %1888 = vperm.xlu1 %6061, %v7062_v39   ;;  %1251 = vperm.xlu0 %6062, %v1180_v15   ;;  %v7250_v39 = vld [vmem:[%s9923_s4 + $0xb0] sm:$0xff]  ;;  %v1185_v15 = vsel %vm1149_vm6, 1, %v6439_v0  ;;  %vm1753_vm6 = vcmp.eq.s32.totalorder %v7001_v10, 15  ;;  %v7717_v24 = vshrl.u32 %v1487_v43, 7 }
 0x121   : > { %vm10260_vm0 = vcmp.eq.s32.totalorder %v7250_v39, 0 }
 0x124   : > { %1611 = vperm.xlu1 %6061, %v1542_v38   ;;  %1891 = vperm.xlu0 %6062, %v7067_v40   ;;  %v7278_v40 = vld [vmem:[%s9923_s4 + $0xb8] sm:$0xff]  ;;  %v1547_v38 = vsel %vm1436_vm5, 1, %v6439_v0  ;;  %vm1439_vm5 = vcmp.eq.s32.totalorder %v7345_v1, 0 }
 0x125   : > { %5680 = vmatmul.mubr.bf16.gmra.mrb[20].mxu0 %v7242_v37  ;;  %vm1438_vm1 = vcmp.eq.s32.totalorder %v7278_v40, 0 }
 0x126   : > { %5683 = vmatprep.mubr.bf16.mxu0 %v7245_v41  ;;  %v1549_v19 = vsel %vm1438_vm1, 1, %v6439_v0 }
 0x128   : > { %1254 = vperm.xlu1 %6061, %v1181_v21   ;;  %1614 = vperm.xlu0 %6062, %v1543_v18   ;;  %v1186_v18 = vsel %vm7298_vm14, 1, %v6439_v0  ;;  %v7327_v21 = vpack.c.bf16 %v675_v11, %v674_v49  ;;  %v1552_v49 = vsel %vm1441_vm7, 1, %v6439_v0  ;;  %v1862_v11 = vsel %vm1753_vm6, 1, %v6439_v0 }
 0x12a   : > { %10261 = vst [vmem:[#allocation42_spill] sm:$0xff] %v7327_v21 }
 0x12c   : > { %1894 = vperm.xlu1 %6061, %v7070_v20   ;;  %1257 = vperm.xlu0 %6062, %v1182_v28   ;;  %v1548_v20 = vsel %vm10260_vm0, 1, %v6439_v0  ;;  %v7331_v28 = vpack.c.bf16 %v677_v17, %v676_v16 }
 0x12d   : > { %5684 = vmatmul.mubr.bf16.gmra.mrb[24].mxu0 %v7280_v53 }
 0x12e   : > { %5687 = vmatprep.mubr.bf16.mxu0 %v7284_v54  ;;  %10262 = vst [vmem:[#allocation43_spill] sm:$0xff] %v7331_v28 }
 0x130   : > { %1617 = vperm.xlu1 %6061, %v7216_v29   ;;  %1897 = vperm.xlu0 %6062, %v7083_v44   ;;  %v695_v29 = vld [vmem:[%s6836_s23 + $0x8] sm:$0xff]  ;;  %s10865_s23 = sld [smem:[#allocation141_spill]] }
 0x131   : > { %v696_v44 = vpack.c.bf16 %v695_v29, %v694_v35  ;;  %v7440_v35 = vld [vmem:[%s9923_s4 + $0xe0] sm:$0xff]  ;;  %v1863_v29 = vsel %vm1754_vm4, 1, %v6439_v0 }
 0x134   : > { %1260 = vperm.xlu1 %6061, %v1183_v60   ;;  %1620 = vperm.xlu0 %6062, %v1545_v3   ;;  %v7394_v60 = vld [vmem:[%s9923_s4 + $0xd8] sm:$0xff]  ;;  %v6074_v3 = vld [vmem:[%s10265_s21 + $0x8] sm:$0xff]  }
 0x135   : > { %5688 = vmatmul.mubr.bf16.gmra.mrb[28].mxu0 %v7327_v21  ;;  %vm1442_vm1 = vcmp.eq.s32.totalorder %v7394_v60, 0 }
 0x136   : > { %5691 = vmatprep.mubr.bf16.mxu0 %v7331_v28 }
 0x138   : > { %1900 = vperm.xlu1 %6061, %v7166_v57   ;;  %1263 = vperm.xlu0 %6062, %v1184_v4   ;;  %v1009_v57 = vld [vmem:[%s9922_s3 + $0xd8] sm:$0xff] }
 0x139   : > { %vm1082_vm8 = vcmp.ge.s32.totalorder %v1009_v57, 0  ;;  %vm1118_vm9 = vcmp.lt.s32.totalorder %v1009_v57, 16  ;;  %v6080_v57 = vld [vmem:[%s10265_s21 + $0x20] sm:$0xff]  }
 0x13a   : > { %vm7362_vm13 = vmand %vm1082_vm8, %vm1118_vm9  ;;  %vm1443_vm8 = vcmp.eq.s32.totalorder %v7440_v35, 0  ;;  %vm1755_vm9 = vcmp.eq.s32.totalorder %v7050_v34, 15  ;;  %v1013_v34 = vld [vmem:[%s9922_s3 + $0xf8] sm:$0xff] }
 0x13b   : > { %v1190_v52 = vsel %vm7362_vm13, 1, %v6439_v0  ;;  %v1864_v48 = vsel %vm1755_vm9, 1, %v6439_v0  ;;  %vm1086_vm6 = vcmp.ge.s32.totalorder %v1013_v34, 0  ;;  %vm1122_vm7 = vcmp.lt.s32.totalorder %v1013_v34, 16 }
 0x13c   : > { %1623 = vperm.xlu1 %6061, %v1546_v5   ;;  %1903 = vperm.xlu0 %6062, %v7171_v7   ;;  %v7356_v7 = vld [vmem:[%s9923_s4 + $0xc8] sm:$0xff] }
 0x13d   : > { %5692 = vmatmul.mubr.bf16.gmra.mrb[32].mxu0 %v696_v44  ;;  %vm1440_vm12 = vcmp.eq.s32.totalorder %v7356_v7, 0 }
 0x13e   : > { %v1551_v50 = vsel %vm1440_vm12, 1, %v6439_v0 }
 0x140   : > { %1266 = vperm.xlu1 %6061, %v1185_v15   ;;  %1626 = vperm.xlu0 %6062, %v1547_v38   ;;  %v6075_v15 = vld [vmem:[%s10265_s21 + $0x50] sm:$0xff]  }
 0x141   : > { %v6076_v38 = vld [vmem:[%s10265_s21 + $0x10] sm:$0xff]  }
 0x144   : > { %1906 = vperm.xlu1 %6061, %v7179_v12   ;;  %1269 = vperm.xlu0 %6062, %v1186_v18   ;;  %v1550_v12 = vsel %vm1439_vm5, 1, %v6439_v0  ;;  %v6077_v18 = vld [vmem:[%s10265_s21 + $0x58] sm:$0xff]   ;;  %vm1156_vm5 = vmand %vm1084_vm2, %vm1120_vm3  ;;  %vm1757_vm2 = vcmp.eq.s32.totalorder %v7090_v45, 15 }
 0x145   : > { %v1192_v44 = vsel %vm1156_vm5, 1, %v6439_v0  ;;  %vm1758_vm5 = vcmp.eq.s32.totalorder %v7115_v58, 15 }
 0x146   : > { %v1867_v58 = vsel %vm1758_vm5, 1, %v6439_v0 }
 0x148   : > { %1629 = vperm.xlu1 %6061, %v1548_v20   ;;  %1909 = vperm.xlu0 %6062, %v7182_v25   ;;  %v1189_v25 = vsel %vm1153_vm10, 1, %v6439_v0  ;;  %v1553_v20 = vsel %vm1442_vm1, 1, %v6439_v0  ;;  %vm1085_vm10 = vcmp.ge.s32.totalorder %v1012_v27, 0 }
 0x149   : > { %vm1157_vm12 = vmand %vm1085_vm10, %vm1121_vm11 }
 0x14c   : > { %1272 = vperm.xlu1 %6061, %v1187_v22   ;;  %1632 = vperm.xlu0 %6062, %v1549_v19   ;;  %v6078_v19 = vld [vmem:[%s10265_s21 + $0x18] sm:$0xff]  }
 0x150   : > { %1912 = vperm.xlu1 %6061, %v7185_v13   ;;  %1275 = vperm.xlu0 %6062, %v1188_v23   ;;  %v1010_v13 = vld [vmem:[%s9922_s3 + $0xe0] sm:$0xff] }
 0x151   : > { %vm1083_vm14 = vcmp.ge.s32.totalorder %v1010_v13, 0  ;;  %vm1119_vm15 = vcmp.lt.s32.totalorder %v1010_v13, 16  ;;  %v1554_v13 = vsel %vm1443_vm8, 1, %v6439_v0 }
 0x152   : > { %vm1155_vm0 = vmand %vm1083_vm14, %vm1119_vm15  ;;  %vm1756_vm14 = vcmp.eq.s32.totalorder %v7045_v33, 15 }
 0x153   : > { %v1191_v10 = vsel %vm1155_vm0, 1, %v6439_v0  ;;  %vm1158_vm15 = vmand %vm1086_vm6, %vm1122_vm7  ;;  %vm1759_vm6 = vcmp.eq.s32.totalorder %v7120_v59, 15 }
 0x154   : > { %1635 = vperm.xlu1 %6061, %v1550_v12   ;;  %1915 = vperm.xlu0 %6062, %v7188_v30   ;;  %v6072_v30 = vld [vmem:[%s10265_s21] sm:$0xff]   ;;  %v1194_v33 = vsel %vm1158_vm15, 1, %v6439_v0  ;;  %vm1762_vm15 = vcmp.eq.s32.totalorder %v7227_v32, 15 }
 0x155   : > { %5124 = vmatpush3.bf16.msra.mxu0 %v6072_v30  ;;  %5847 = vmatpush3.bf16.msra.mxu1 %v6072_v30  ;;  %v6082_v30 = vld [vmem:[%s10265_s21 + $0x28] sm:$0xff]   ;;  %v1871_v32 = vsel %vm1762_vm15, 1, %v6439_v0  ;;  %vm1765_vm15 = vcmp.eq.s32.totalorder %v7278_v40, 15 }
 0x156   : > { %5840 = vmatprep.subr.bf16.mxu1 %v6073_v63  ;;  %5125 = vmatprep.subr.bf16.mxu0 %v6073_v63  ;;  %v1193_v63 = vsel %vm1157_vm12, 1, %v6439_v0  ;;  %v1874_v40 = vsel %vm1765_vm15, 1, %v6439_v0  ;;  %vm1769_vm15 = vcmp.eq.s32.totalorder %v7394_v60, 15 }
 0x158   : > { %1278 = vperm.xlu1 %6061, %v1189_v25   ;;  %1638 = vperm.xlu0 %6062, %v1551_v50   ;;  %v7462_v25 = vld [vmem:[%s9923_s4 + $0xe8] sm:$0xff] }
 0x159   : > { %5848 = vmatpush3.bf16.msra.mxu1 %v6074_v3  ;;  %5126 = vmatpush3.bf16.msra.mxu0 %v6074_v3  ;;  %v6081_v50 = vld [vmem:[%s10265_s21 + $0x68] sm:$0xff]   ;;  %vm1444_vm13 = vcmp.eq.s32.totalorder %v7462_v25, 0 }
 0x15a   : > { %5841 = vmatprep.subr.bf16.mxu1 %v6075_v15  ;;  %5127 = vmatprep.subr.bf16.mxu0 %v6075_v15  ;;  %v1555_v3 = vsel %vm1444_vm13, 1, %v6439_v0  ;;  %vm1760_vm13 = vcmp.eq.s32.totalorder %v7127_v61, 15 }
 0x15b   : > { %v7402_v4 = vpop.permute.xlu0 %1566  ;;  %v7404_v5 = vpop.permute.xlu1 %1563 }
 0x15c   : > { %1918 = vperm.xlu1 %6061, %v1861_v51   ;;  %1281 = vperm.xlu0 %6062, %v1190_v52  }
 0x15d   : > { %5849 = vmatpush3.bf16.msra.mxu1 %v6076_v38  ;;  %5128 = vmatpush3.bf16.msra.mxu0 %v6076_v38  ;;  %v7494_v38 = vld [vmem:[%s9923_s4 + $0xf0] sm:$0xff] }
 0x15e   : > { %5842 = vmatprep.subr.bf16.mxu1 %v6077_v18  ;;  %5129 = vmatprep.subr.bf16.mxu0 %v6077_v18  ;;  %vm1445_vm1 = vcmp.eq.s32.totalorder %v7494_v38, 0  ;;  %v6086_v18 = vld [vmem:[%s10265_s21 + $0x38] sm:$0xff]  }
 0x15f   : > { %v7420_v16 = vpop.permute.xlu1 %1305  ;;  %v7422_v17 = vpop.permute.xlu0 %1200  ;;  %v1556_v45 = vsel %vm1445_vm1, 1, %v6439_v0 }
 0x160   : > { %1641 = vperm.xlu1 %6061, %v1552_v49   ;;  %1921 = vperm.xlu0 %6062, %v1862_v11   ;;  %v6084_v49 = vld [vmem:[%s10265_s21 + $0x30] sm:$0xff]  }
 0x161   : > { %5850 = vmatpush3.bf16.msra.mxu1 %v6078_v19  ;;  %5130 = vmatpush3.bf16.msra.mxu0 %v6078_v19 }
 0x162   : > { %5843 = vmatprep.subr.bf16.mxu1 %v6079_v14  ;;  %5131 = vmatprep.subr.bf16.mxu0 %v6079_v14  ;;  %v1866_v14 = vsel %vm1757_vm2, 1, %v6439_v0 }
 0x163   : > { %v7433_v22 = vpop.permute.xlu1 %1206  ;;  %v7435_v23 = vpop.permute.xlu0 %1203 }
 0x164   : > { %10266 = vst [vmem:[#allocation44_spill] sm:$0xff] %v7433_v22  ;;  %1284 = vperm.xlu1 %6061, %v1191_v10   ;;  %1644 = vperm.xlu0 %6062, %v1553_v20   ;;  %v1865_v10 = vsel %vm1756_vm14, 1, %v6439_v0  ;;  %v6085_v20 = vld [vmem:[%s10265_s21 + $0x78] sm:$0xff]  }
 0x165   : > { %5851 = vmatpush3.bf16.msra.mxu1 %v6080_v57  ;;  %5132 = vmatpush3.bf16.msra.mxu0 %v6080_v57 }
 0x166   : > { %5844 = vmatprep.subr.bf16.mxu1 %v6081_v50  ;;  %5133 = vmatprep.subr.bf16.mxu0 %v6081_v50 }
 0x167   : > { %v7455_v12 = vpop.permute.xlu1 %1569  ;;  %v7457_v46 = vpop.permute.xlu0 %1209 }
 0x168   : > { %10267 = vst [vmem:[#allocation45_spill] sm:$0xff] %v7455_v12  ;;  %10268 = vst [vmem:[#allocation46_spill] sm:$0xff] %v7457_v46  ;;  %1924 = vperm.xlu1 %6061, %v1863_v29   ;;  %1287 = vperm.xlu0 %6062, %v1192_v44   ;;  %v7511_v29 = vld [vmem:[%s9923_s4 + $0xf8] sm:$0xff]  ;;  %v10272_v44 = vmov 0 }
 0x169   : > { %5852 = vmatpush3.bf16.msra.mxu1 %v6082_v30  ;;  %5134 = vmatpush3.bf16.msra.mxu0 %v6082_v30  ;;  %vm1446_vm8 = vcmp.eq.s32.totalorder %v7511_v29, 0 }
 0x16a   : > { %5845 = vmatprep.subr.bf16.mxu1 %v6083_v6  ;;  %5135 = vmatprep.subr.bf16.mxu0 %v6083_v6  ;;  %v1868_v6 = vsel %vm1759_vm6, 1, %v6439_v0 }
 0x16b   : > { %v7476_v51 = vpop.permute.xlu1 %1212  ;;  %v7478_v52 = vpop.permute.xlu0 %1572 }
 0x16c   : > { %10269 = vst [vmem:[#allocation47_spill] sm:$0xff] %v7476_v51  ;;  %10270 = vst [vmem:[#allocation48_spill] sm:$0xff] %v7478_v52  ;;  %1647 = vperm.xlu1 %6061, %v1554_v13   ;;  %1927 = vperm.xlu0 %6062, %v1864_v48   ;;  %v10275_v13 = vmov 0  ;;  %v1557_v48 = vsel %vm1446_vm8, 1, %v6439_v0  ;;  %vm1764_vm8 = vcmp.eq.s32.totalorder %v7250_v39, 15 }
 0x16d   : > { %5853 = vmatpush3.bf16.msra.mxu1 %v6084_v49  ;;  %5136 = vmatpush3.bf16.msra.mxu0 %v6084_v49  ;;  %v10281_v49 = vmov 0 }
 0x16e   : > { %5846 = vmatprep.subr.bf16.mxu1 %v6085_v20  ;;  %5137 = vmatprep.subr.bf16.mxu0 %v6085_v20  ;;  %v1873_v20 = vsel %vm1764_vm8, 1, %v6439_v0 }
 0x16f   : > { %v1576_v11 = vpop.permute.xlu1 %1575  ;;  %v7489_v15 = vpop.permute.xlu0 %1215 }
 0x170   : > { %10271 = vst [vmem:[#allocation49_spill] sm:$0xff] %v7489_v15  ;;  %1290 = vperm.xlu1 %6061, %v1193_v63   ;;  %1650 = vperm.xlu0 %6062, %v1555_v3   ;;  %vm5036_vm0 = vcmp.ne.s32.totalorder %v1576_v11, 1  ;;  %v10278_v63 = vmov 0  ;;  %v1869_v3 = vsel %vm1760_vm13, 1, %v6439_v0 }
 0x171   : > { %5854 = vmatpush3.bf16.msra.mxu1 %v6086_v18  ;;  %5138 = vmatpush3.bf16.msra.mxu0 %v6086_v18 }
 0x173   : > { %v7506_v19 = vpop.permute.xlu1 %1218  ;;  %v1579_v27 = vpop.permute.xlu0 %1578 }
 0x174   : > { %vm5035_vm3 = vcmp.ne.s32.totalorder %v1579_v27, 1  ;;  %1930 = vperm.xlu1 %6061, %v1865_v10   ;;  %1293 = vperm.xlu0 %6062, %v1194_v33   ;;  %vm9969_vm9 = vcmp.eq.s32.totalorder %v7506_v19, 1  ;;  %v10284_v33 = vmov 0  ;;  %v10287_v27 = vmov 0 }
 0x175   : > { %vm7513_vm4 = vmpackc.low %vm5035_vm3, %vm5036_vm0  ;;  %vm1761_vm0 = vcmp.eq.s32.totalorder %v7221_v31, 15 }
 0x176   : > { %v10273_v44 = vsel %vm7513_vm4, 4294967295, %v10272_v44  ;;  %v1870_v31 = vsel %vm1761_vm0, 1, %v6439_v0 }
 0x177   : > { %10274 = vst [vmem:[#allocation50_spill] sm:$0xff] %v10273_v44  ;;  %v1582_v57 = vpop.permute.xlu1 %1581  ;;  %v7521_v34 = vpop.permute.xlu0 %1221 }
 0x178   : > { %vm9968_vm10 = vcmp.eq.s32.totalorder %v7521_v34, 1  ;;  %1653 = vperm.xlu1 %6061, %v1556_v45   ;;  %1933 = vperm.xlu0 %6062, %v1866_v14   ;;  %vm5038_vm12 = vcmp.ne.s32.totalorder %v1582_v57, 1  ;;  %v1014_v57 = vld [vmem:[%s9922_s3 + $0x100] sm:$0xff] }
 0x179   : > { %vm7529_vm11 = vmpackc.low %vm9968_vm10, %vm9969_vm9  ;;  %vm1123_vm10 = vcmp.lt.s32.totalorder %v1014_v57, 16 }
 0x17a   : > { %v10276_v13 = vsel %vm7529_vm11, 4294967295, %v10275_v13 }
 0x17b   : > { %10277 = vst [vmem:[#allocation51_spill] sm:$0xff] %v10276_v13  ;;  %v7537_v50 = vpop.permute.xlu1 %1224  ;;  %v1585_v30 = vpop.permute.xlu0 %1584 }
 0x17c   : > { %vm5037_vm7 = vcmp.ne.s32.totalorder %v1585_v30, 1  ;;  %1936 = vperm.xlu1 %6061, %v1867_v58   ;;  %1656 = vperm.xlu0 %6062, %v1557_v48   ;;  %vm9965_vm1 = vcmp.eq.s32.totalorder %v7537_v50, 1  ;;  %v10291_v58 = vmov 0 }
 0x17d   : > { %vm7539_vm14 = vmpackc.low %vm5037_vm7, %vm5038_vm12  ;;  %vm1763_vm12 = vcmp.eq.s32.totalorder %v7235_v36, 15  ;;  %vm1766_vm7 = vcmp.eq.s32.totalorder %v7345_v1, 15 }
 0x17e   : > { %v10279_v63 = vsel %vm7539_vm14, 4294967295, %v10278_v63  ;;  %v1872_v18 = vsel %vm1763_vm12, 1, %v6439_v0  ;;  %v1875_v1 = vsel %vm1766_vm7, 1, %v6439_v0  ;;  %vm1768_vm12 = vcmp.eq.s32.totalorder %v7371_v47, 15 }
 0x17f   : > { %10280 = vst [vmem:[#allocation52_spill] sm:$0xff] %v10279_v63  ;;  %v1588_v61 = vpop.permute.xlu1 %1587  ;;  %v7547_v59 = vpop.permute.xlu0 %1227  ;;  %v1877_v48 = vsel %vm1768_vm12, 1, %v6439_v0  ;;  %vm1770_vm7 = vcmp.eq.s32.totalorder %v7440_v35, 15 }
 0x180   : > { %vm9964_vm2 = vcmp.eq.s32.totalorder %v7547_v59, 1  ;;  %1942 = vperm.xlu1 %6061, %v1869_v3   ;;  %1939 = vperm.xlu0 %6062, %v1868_v6   ;;  %vm5040_vm5 = vcmp.ne.s32.totalorder %v1588_v61, 1  ;;  %v1015_v3 = vld [vmem:[%s9922_s3 + $0x108] sm:$0xff]  ;;  %v1879_v6 = vsel %vm1770_vm7, 1, %v6439_v0  ;;  %v1878_v61 = vsel %vm1769_vm15, 1, %v6439_v0 }
 0x181   : > { %vm7555_vm3 = vmpackc.low %vm9964_vm2, %vm9965_vm1  ;;  %vm1088_vm12 = vcmp.ge.s32.totalorder %v1015_v3, 0 }
 0x182   : > { %v10282_v49 = vsel %vm7555_vm3, 4294967295, %v10281_v49 }
 0x183   : > { %10283 = vst [vmem:[#allocation53_spill] sm:$0xff] %v10282_v49  ;;  %v7563_v11 = vpop.permute.xlu1 %1230  ;;  %v1591_v10 = vpop.permute.xlu0 %1590 }
 0x184   : > { %vm5039_vm13 = vcmp.ne.s32.totalorder %v1591_v10, 1  ;;  %1948 = vperm.xlu1 %6061, %v1871_v32   ;;  %1945 = vperm.xlu0 %6062, %v1870_v31   ;;  %vm9967_vm0 = vcmp.eq.s32.totalorder %v7563_v11, 1  ;;  %v1411_v32 = vld [vmem:[%s9923_s4 + $0x100] sm:$0xff] }
 0x185   : > { %vm7565_vm6 = vmpackc.low %vm5039_vm13, %vm5040_vm5  ;;  %vm1767_vm13 = vcmp.eq.s32.totalorder %v7356_v7, 15  ;;  %vm1447_vm15 = vcmp.eq.s32.totalorder %v1411_v32, 0 }
 0x186   : > { %v10285_v33 = vsel %vm7565_vm6, 4294967295, %v10284_v33  ;;  %v1876_v47 = vsel %vm1767_vm13, 1, %v6439_v0  ;;  %vm1124_vm13 = vcmp.lt.s32.totalorder %v1015_v3, 16 }
 0x187   : > { %10286 = vst [vmem:[#allocation54_spill] sm:$0xff] %v10285_v33  ;;  %v1594_v39 = vpop.permute.xlu1 %1593  ;;  %v7573_v36 = vpop.permute.xlu0 %1233 }
 0x188   : > { %vm9966_vm2 = vcmp.eq.s32.totalorder %v7573_v36, 1  ;;  %1954 = vperm.xlu1 %6061, %v1873_v20   ;;  %1951 = vperm.xlu0 %6062, %v1872_v18   ;;  %vm5042_vm8 = vcmp.ne.s32.totalorder %v1594_v39, 1  ;;  %v1412_v18 = vld [vmem:[%s9923_s4 + $0x108] sm:$0xff]  ;;  %v1016_v39 = vld [vmem:[%s9922_s3 + $0x110] sm:$0xff] }
 0x189   : > { %vm7581_vm5 = vmpackc.low %vm9966_vm2, %vm9967_vm0  ;;  %vm1087_vm0 = vcmp.ge.s32.totalorder %v1014_v57, 0  ;;  %vm1125_vm9 = vcmp.lt.s32.totalorder %v1016_v39, 16 }
 0x18a   : > { %v10288_v27 = vsel %vm7581_vm5, 4294967295, %v10287_v27 }
 0x18b   : > { %10289 = vst [vmem:[#allocation55_spill] sm:$0xff] %v10288_v27  ;;  %v7589_v45 = vpop.permute.xlu1 %1236  ;;  %v1597_v14 = vpop.permute.xlu0 %1596 }
 0x18c   : > { %10290 = vst [vmem:[#allocation56_spill] sm:$0xff] %v7589_v45  ;;  %vm5041_vm1 = vcmp.ne.s32.totalorder %v1597_v14, 1  ;;  %1960 = vperm.xlu1 %6061, %v1875_v1   ;;  %1957 = vperm.xlu0 %6062, %v1874_v40   ;;  %v10295_v1 = vmov 0  ;;  %v1558_v40 = vsel %vm1447_vm15, 1, %v6439_v0  ;;  %vm1773_vm15 = vcmp.eq.s32.totalorder %v7511_v29, 15 }
 0x18d   : > { %vm7594_vm2 = vmpackc.low %vm5041_vm1, %vm5042_vm8  ;;  %vm1771_vm8 = vcmp.eq.s32.totalorder %v7462_v25, 15 }
 0x18e   : > { %v10292_v58 = vsel %vm7594_vm2, 4294967295, %v10291_v58  ;;  %vm1159_vm1 = vmand %vm1087_vm0, %vm1123_vm10  ;;  %v1880_v10 = vsel %vm1771_vm8, 1, %v6439_v0  ;;  %vm1772_vm8 = vcmp.eq.s32.totalorder %v7494_v38, 15  ;;  %v6089_v38 = vld [vmem:[%s10265_s21 + $0x140] sm:$0xff]  }
 0x18f   : > { %10293 = vst [vmem:[#allocation57_spill] sm:$0xff] %v10292_v58  ;;  %v7602_v7 = vpop.permute.xlu1 %1242  ;;  %v7604_v30 = vpop.permute.xlu0 %1239  ;;  %v1195_v31 = vsel %vm1159_vm1, 1, %v6439_v0  ;;  %vm1160_vm10 = vmand %vm1088_vm12, %vm1124_vm13  ;;  %vm1448_vm12 = vcmp.eq.s32.totalorder %v1412_v18, 0  ;;  %vm1089_vm13 = vcmp.ge.s32.totalorder %v1016_v39, 0  ;;  %5347 = vmatprep.subr.bf16.mxu1 %v6089_v38  ;;  %v1414_v39 = vld [vmem:[%s9923_s4 + $0x118] sm:$0xff] }
 0x190   : > { %10294 = vst [vmem:[#allocation58_spill] sm:$0xff] %v7604_v30  ;;  %1966 = vperm.xlu1 %6061, %v1877_v48   ;;  %1963 = vperm.xlu0 %6062, %v1876_v47   ;;  %v1196_v14 = vsel %vm1160_vm10, 1, %v6439_v0  ;;  %v1881_v47 = vsel %vm1772_vm8, 1, %v6439_v0  ;;  %v1559_v3 = vsel %vm1448_vm12, 1, %v6439_v0  ;;  %vm1775_vm10 = vcmp.eq.s32.totalorder %v1412_v18, 15 }
 0x193   : > { %v1600_v60 = vpop.permute.xlu1 %1599  ;;  %v7612_v35 = vpop.permute.xlu0 %1245 }
 0x194   : > { %1972 = vperm.xlu1 %6061, %v1879_v6   ;;  %1969 = vperm.xlu0 %6062, %v1878_v61   ;;  %vm5044_vm7 = vcmp.ne.s32.totalorder %v1600_v60, 1 }
 0x197   : > { %v7619_v20 = vpop.permute.xlu1 %1605  ;;  %v1603_v25 = vpop.permute.xlu0 %1602 }
 0x198   : > { %vm5043_vm0 = vcmp.ne.s32.totalorder %v1603_v25, 1  ;;  %1296 = vperm.xlu1 %6061, %v1195_v31   ;;  %1975 = vperm.xlu0 %6062, %v1880_v10   ;;  %v1882_v31 = vsel %vm1773_vm15, 1, %v6439_v0  ;;  %v6087_v10 = vld [vmem:[%s10265_s21 + $0xc0] sm:$0xff]   ;;  %vm1777_vm15 = vcmp.eq.s32.totalorder %v1414_v39, 15 }
 0x199   : > { %vm7627_vm1 = vmpackc.low %vm5043_vm0, %vm5044_vm7  ;;  %vm1774_vm0 = vcmp.eq.s32.totalorder %v1411_v32, 15  ;;  %5235 = vmatprep.subr.bf16.mxu0 %v6087_v10  ;;  %v1884_v32 = vsel %vm1775_vm10, 1, %v6439_v0  ;;  %v1886_v10 = vsel %vm1777_vm15, 1, %v6439_v0 }
 0x19a   : > { %v10296_v1 = vsel %vm7627_vm1, 4294967295, %v10295_v1  ;;  %vm1161_vm7 = vmand %vm1089_vm13, %vm1125_vm9  ;;  %v1883_v18 = vsel %vm1774_vm0, 1, %v6439_v0  ;;  %vm1450_vm13 = vcmp.eq.s32.totalorder %v1414_v39, 0  ;;  %vm10040_vm1 = vcmp.eq.s32.totalorder %v7476_v51, 1 }
 0x19b   : > { %10297 = vst [vmem:[#allocation59_spill] sm:$0xff] %v10296_v1  ;;  %v7634_v57 = vpop.permute.xlu1 %1248  ;;  %v7636_v48 = vpop.permute.xlu0 %1608  ;;  %v1197_v60 = vsel %vm1161_vm7, 1, %v6439_v0  ;;  %v1561_v38 = vsel %vm1450_vm13, 1, %v6439_v0 }
 0x19c   : > { %1659 = vperm.xlu1 %6061, %v1558_v40   ;;  %1299 = vperm.xlu0 %6062, %v1196_v14   ;;  %v1413_v40 = vld [vmem:[%s9923_s4 + $0x110] sm:$0xff]  ;;  %v10298_v14 = vmov 0 }
 0x19d   : > { %vm1449_vm7 = vcmp.eq.s32.totalorder %v1413_v40, 0 }
 0x19f   : > { %v1889_v6 = vpop.permute.xlu1 %1888  ;;  %v7644_v61 = vpop.permute.xlu0 %1251 }
 0x1a0   : > { %1978 = vperm.xlu1 %6061, %v1881_v47   ;;  %1662 = vperm.xlu0 %6062, %v1559_v3   ;;  %vm5028_vm9 = vcmp.ne.s32.totalorder %v1889_v6, 1  ;;  %v1560_v6 = vsel %vm1449_vm7, 1, %v6439_v0 }
 0x1a3   : > { %v7651_v29 = vpop.permute.xlu1 %1611  ;;  %v1892_v25 = vpop.permute.xlu0 %1891 }
 0x1a4   : > { %vm5027_vm8 = vcmp.ne.s32.totalorder %v1892_v25, 1  ;;  %1302 = vperm.xlu1 %6061, %v1197_v60   ;;  %1981 = vperm.xlu0 %6062, %v1882_v31  }
 0x1a5   : > { %vm7659_vm12 = vmpackc.low %vm5027_vm8, %vm5028_vm9  ;;  %vm1776_vm9 = vcmp.eq.s32.totalorder %v1413_v40, 15 }
 0x1a6   : > { %v10299_v14 = vsel %vm7659_vm12, 4294967295, %v10298_v14  ;;  %v1885_v25 = vsel %vm1776_vm9, 1, %v6439_v0  ;;  %vm10053_vm12 = vcmp.lt.s32.totalorder %v7717_v24, 7 }
 0x1a7   : > { %10300 = vst [vmem:[#allocation60_spill] sm:$0xff] %v10299_v14  ;;  %v7665_v47 = vpop.permute.xlu1 %1254  ;;  %v7667_v3 = vpop.permute.xlu0 %1614 }
 0x1a8   : > { %1987 = vperm.xlu1 %6061, %v1884_v32   ;;  %1984 = vperm.xlu0 %6062, %v1883_v18   ;;  %v10301_v18 = vmov 0 }
 0x1ab   : > { %v1895_v60 = vpop.permute.xlu1 %1894  ;;  %v7671_v31 = vpop.permute.xlu0 %1257 }
 0x1ac   : > { %1668 = vperm.xlu1 %6061, %v1561_v38   ;;  %1665 = vperm.xlu0 %6062, %v1560_v6   ;;  %vm5064_vm10 = vcmp.ne.s32.totalorder %v1895_v60, 1 }
 0x1af   : > { %v7675_v28 = vpop.permute.xlu1 %1617  ;;  %v1898_v32 = vpop.permute.xlu0 %1897 }
 0x1b0   : > { %vm5063_vm0 = vcmp.ne.s32.totalorder %v1898_v32, 1  ;;  %1993 = vperm.xlu1 %6061, %v1886_v10   ;;  %1990 = vperm.xlu0 %6062, %v1885_v25   ;;  %v10304_v32 = vmov 0 }
 0x1b1   : > { %vm7677_vm8 = vmpackc.low %vm5063_vm0, %vm5064_vm10 }
 0x1b2   : > { %v10302_v18 = vsel %vm7677_vm8, 4294967295, %v10301_v18 }
 0x1b3   : > { %10303 = vst [vmem:[#allocation61_spill] sm:$0xff] %v10302_v18  ;;  %v7681_v39 = vpop.permute.xlu1 %1260  ;;  %v7683_v40 = vpop.permute.xlu0 %1620 }
 0x1b7   : > { %v1901_v38 = vpop.permute.xlu1 %1900  ;;  %v7685_v6 = vpop.permute.xlu0 %1263 }
 0x1b8   : > { %vm5066_vm13 = vcmp.ne.s32.totalorder %v1901_v38, 1  ;;  %v10307_v38 = vmov 0 }
 0x1bb   : > { %v7687_v0 = vpop.permute.xlu1 %1623  ;;  %v1904_v60 = vpop.permute.xlu0 %1903 }
 0x1bc   : > { %vm5065_vm7 = vcmp.ne.s32.totalorder %v1904_v60, 1 }
 0x1bd   : > { %vm7689_vm15 = vmpackc.low %vm5065_vm7, %vm5066_vm13  ;;  %vm9996_vm13 = vcmp.eq.s32.totalorder %v7433_v22, 1 }
 0x1be   : > { %v10305_v32 = vsel %vm7689_vm15, 4294967295, %v10304_v32  ;;  %vm10318_vm15 = vcmp.eq.s32.totalorder %v7435_v23, 1 }
 0x1bf   : > { %10306 = vst [vmem:[#allocation62_spill] sm:$0xff] %v10305_v32  ;;  %v7693_v10 = vpop.permute.xlu1 %1266  ;;  %v7695_v25 = vpop.permute.xlu0 %1626 }
 0x1c3   : > { %v1907_v21 = vpop.permute.xlu1 %1906  ;;  %v7697_v54 = vpop.permute.xlu0 %1269 }
 0x1c4   : > { %vm5068_vm9 = vcmp.ne.s32.totalorder %v1907_v21, 1 }
 0x1c7   : > { %v7699_v53 = vpop.permute.xlu1 %1629  ;;  %v1910_v41 = vpop.permute.xlu0 %1909 }
 0x1c8   : > { %vm5067_vm10 = vcmp.ne.s32.totalorder %v1910_v41, 1 }
 0x1c9   : > { %vm7701_vm0 = vmpackc.low %vm5067_vm10, %vm5068_vm9 }
 0x1ca   : > { %v10308_v38 = vsel %vm7701_vm0, 4294967295, %v10307_v38  ;;  %vm10311_vm0 = vcmp.eq.s32.totalorder %v7422_v17, 1 }
 0x1cb   : > { %10309 = vst [vmem:[#allocation63_spill] sm:$0xff] %v10308_v38  ;;  %v7705_v60 = vpop.permute.xlu1 %1272  ;;  %v7707_v37 = vpop.permute.xlu0 %1632 }
 0x1cf   : > { %v1913_v2 = vpop.permute.xlu1 %1912  ;;  %v7714_v21 = vpop.permute.xlu0 %1275 }
 0x1d0   : > { %v5661_v42 = vpop.f32.mrb[0].mxu0  ;;  %vm10313_vm10 = vcmp.ne.s32.totalorder %v1913_v2, 1 }
 0x1d1   : > { %v811_v41 = vadd.f32 %v5661_v42, %v7712_v62  ;;  %v802_v26 = vpop.f32.mrb[1].mxu0 }
 0x1d2   : > { %v803_v9 = vadd.f32 %v7712_v62, %v802_v26  ;;  %v5662_v8 = vpop.f32.mrb[2].mxu0 }
 0x1d3   : > { %v947_v56 = vmax.f32 %v811_v41, 0.0  ;;  %v814_v55 = vadd.f32 %v5662_v8, %v7712_v62  ;;  %v805_v14 = vpop.f32.mrb[3].mxu0  ;;  %v7723_v1 = vpop.permute.xlu1 %1635 }
 0x1d4   : > { %v945_v42 = vmax.f32 %v803_v9, 0.0  ;;  %v806_v43 = vadd.f32 %v7712_v62, %v805_v14  ;;  %v1916_v38 = vpop.permute.xlu0 %1915  ;;  %v10314_v9 = vmov 0 }
 0x1d5   : > { %v1345_v26 = vsel %vm9996_vm13, %v947_v56, 0.0  ;;  %v948_v58 = vmax.f32 %v814_v55, 0.0  ;;  %vm5069_vm7 = vcmp.ne.s32.totalorder %v1916_v38, 1  ;;  %vm10317_vm13 = vmmov %vm10311_vm0 }
 0x1d6   : > { %v7734_v8 = vsel %vm10311_vm0, %v945_v42, 0.0  ;;  %v946_v41 = vmax.f32 %v806_v43, 0.0  ;;  %vm7738_vm2 = vmpackc.low %vm5069_vm7, %vm10313_vm10  ;;  %v1453_v14 = vrot.slane %v1345_v26, 7  ;;  %v1780_v38 = vrot.slane %v1345_v26, 1 }
 0x1d7   : > { %10312 = vst [vmem:[#allocation64_spill] sm:$0xff] %v7734_v8  ;;  %v10315_v9 = vsel %vm7738_vm2, 4294967295, %v10314_v9  ;;  %vm7746_vm9 = vmpackc.low %vm10318_vm15, %vm10317_vm13  ;;  %vm10321_vm0 = vcmp.eq.s32.totalorder %v7457_v46, 1  ;;  %v7754_v32 = vpack.c.bf16 %v948_v58, %v947_v56  ;;  %v7756_v2 = vpop.permute.xlu1 %1278  ;;  %v10019_v26 = vrot.slane %v7734_v8, 7 }
 0x1d8   : > { %10316 = vst [vmem:[#allocation65_spill] sm:$0xff] %v10315_v9  ;;  %v7752_v43 = vsel %vm10321_vm0, %v948_v58, 0.0  ;;  %vm10323_vm7 = vmmov %vm10318_vm15  ;;  %v4373_v33 = vpack.c.bf16 %v946_v41, %v945_v42  ;;  %v7762_v18 = vpop.permute.xlu0 %1638  ;;  %v5665_v49 = vpop.f32.mrb[4].mxu0  ;;  %v10023_v63 = vrot.slane %v7734_v8, 1  ;;  %vm10324_vm15 = vcmp.lt.s32.totalorder %v7717_v24, 1 }
 0x1d9   : > { %10322 = vst [vmem:[#allocation66_spill] sm:$0xff] %v7754_v32  ;;  %v1454_v9 = vrot.slane %v7752_v43, 7  ;;  %v10018_v17 = vrot.slane %v7752_v43, 1  ;;  %v1344_v27 = vsel %vm10323_vm7, %v946_v41, 0.0  ;;  %v818_v58 = vpop.f32.mrb[5].mxu0  ;;  %v827_v44 = vadd.f32 %v5665_v49, %v7712_v62  ;;  %vm10325_vm13 = vmmov %vm10324_vm15 }
 0x1da   : > { %v1452_v13 = vrot.slane %v1344_v27, 7  ;;  %v1779_v56 = vrot.slane %v1344_v27, 1  ;;  %v819_v32 = vadd.f32 %v7712_v62, %v818_v58  ;;  %v5666_v46 = vpop.f32.mrb[6].mxu0  ;;  %4374 = vmatprep.mubr.msk.bf16.mxu0 %vm7746_vm9, %v4373_v33  ;;  %vm10038_vm9 = vcmp.eq.s32.totalorder %v7489_v15, 1  ;;  %vm10330_vm10 = vmmov %vm10325_vm13 }
 0x1db   : > { %v1522_v23 = vsel %vm10324_vm15, %v1453_v14, %v1454_v9  ;;  %v7776_v42 = vsel %vm10053_vm12, %v1780_v38, %v10018_v17  ;;  %v830_v41 = vadd.f32 %v5666_v46, %v7712_v62  ;;  %v821_v55 = vpop.f32.mrb[7].mxu0  ;;  %v7795_v58 = vpop.permute.xlu1 %1918  ;;  %vm10331_vm0 = vcmp.eq.s32.totalorder %v7506_v19, 1  ;;  %vm10340_vm15 = vmmov %vm10330_vm10 }
 0x1dc   : > { %v7782_v49 = vsel %vm10325_vm13, %v10019_v26, %v1452_v13  ;;  %v7786_v27 = vsel %vm10053_vm12, %v1779_v56, %v1780_v38  ;;  %v7792_v33 = vsel %vm10053_vm12, %v10023_v63, %v1779_v56  ;;  %10329 = vst [vmem:[#allocation70_spill] sm:$0xff] %v7795_v58  ;;  %v951_v26 = vmax.f32 %v827_v44, 0.0  ;;  %v7800_v38 = vpop.permute.xlu0 %1281  ;;  %vm10341_vm13 = vmmov %vm10330_vm10 }
 0x1dd   : > { %10326 = vst [vmem:[#allocation67_spill] sm:$0xff] %v7782_v49  ;;  %10327 = vst [vmem:[#allocation68_spill] sm:$0xff] %v7786_v27  ;;  %v949_v22 = vmax.f32 %v819_v32, 0.0  ;;  %v822_v49 = vadd.f32 %v7712_v62, %v821_v55  ;;  %v952_v8 = vmax.f32 %v830_v41, 0.0  ;;  %v1523_v56 = vsel %vm10330_vm10, %v1452_v13, %v1453_v14 }
 0x1de   : > { %10328 = vst [vmem:[#allocation69_spill] sm:$0xff] %v7792_v33  ;;  %v7807_v46 = vsel %vm10331_vm0, %v951_v26, 0.0  ;;  %v7813_v32 = vpack.c.bf16 %v1522_v23, %v1523_v56  ;;  %vm10335_vm7 = vcmp.eq.s32.totalorder %v7521_v34, 1  ;;  %vm10344_vm0 = vmmov %vm10330_vm10 }
 0x1df   : > { %10332 = vst [vmem:[#allocation71_spill] sm:$0xff] %v7807_v46  ;;  %v7811_v63 = vsel %vm10040_vm1, %v949_v22, 0.0  ;;  %v950_v44 = vmax.f32 %v822_v49, 0.0  ;;  %v7816_v17 = vpop.permute.xlu1 %1641  ;;  %v7820_v41 = vsel %vm10335_vm7, %v952_v8, 0.0  ;;  %v7822_v13 = vpack.c.bf16 %v952_v8, %v951_v26 }
 0x1e0   : > { %10333 = vst [vmem:[#allocation72_spill] sm:$0xff] %v7813_v32  ;;  %v1455_v55 = vrot.slane %v7811_v63, 7  ;;  %10334 = vst [vmem:[#allocation73_spill] sm:$0xff] %v7816_v17  ;;  %v7830_v33 = vpop.permute.xlu0 %1921  ;;  %v5669_v23 = vpop.f32.mrb[8].mxu0  ;;  %v1457_v49 = vrot.slane %v7807_v46, 7  ;;  %v1458_v56 = vrot.slane %v7820_v41, 7 }
 0x1e1   : > { %10336 = vst [vmem:[#allocation74_spill] sm:$0xff] %v7820_v41  ;;  %10337 = vst [vmem:[#allocation75_spill] sm:$0xff] %v7822_v13  ;;  %v7826_v19 = vsel %vm10038_vm9, %v950_v44, 0.0  ;;  %v7828_v14 = vpack.c.bf16 %v950_v44, %v949_v22  ;;  %v834_v34 = vpop.f32.mrb[9].mxu0  ;;  %v843_v58 = vadd.f32 %v5669_v23, %v7712_v62  ;;  %vm10345_vm7 = vcmp.eq.s32.totalorder %v7563_v11, 1 }
 0x1e2   : > { %10339 = vst [vmem:[#allocation77_spill] sm:$0xff] %v7830_v33  ;;  %v1456_v27 = vrot.slane %v7826_v19, 7  ;;  %v835_v8 = vadd.f32 %v7712_v62, %v834_v34  ;;  %v5670_v26 = vpop.f32.mrb[10].mxu0  ;;  %v1521_v33 = vsel %vm10341_vm13, %v1454_v9, %v1455_v55  ;;  %vm10349_vm13 = vcmp.eq.s32.totalorder %v7573_v36, 1 }
 0x1e3   : > { %10338 = vst [vmem:[#allocation76_spill] sm:$0xff] %v7828_v14  ;;  %v846_v13 = vadd.f32 %v5670_v26, %v7712_v62  ;;  %v837_v32 = vpop.f32.mrb[11].mxu0  ;;  %v7838_v22 = vpop.permute.xlu1 %1284  ;;  %v1518_v14 = vsel %vm10330_vm10, %v1457_v49, %v1458_v56  ;;  %v955_v15 = vmax.f32 %v843_v58, 0.0  ;;  %vm10352_vm10 = vcmp.eq.s32.totalorder %v7547_v59, 1 }
 0x1e4   : > { %v1520_v44 = vsel %vm10340_vm15, %v1455_v55, %v1456_v27  ;;  %v953_v51 = vmax.f32 %v835_v8, 0.0  ;;  %v838_v23 = vadd.f32 %v7712_v62, %v837_v32  ;;  %v7847_v34 = vpop.permute.xlu0 %1644  ;;  %v1519_v52 = vsel %vm10344_vm0, %v1456_v27, %v1457_v49 }
 0x1e5   : > { %10342 = vst [vmem:[#allocation78_spill] sm:$0xff] %v7847_v34  ;;  %v956_v17 = vmax.f32 %v846_v13, 0.0  ;;  %v7849_v26 = vpack.c.bf16 %v1520_v44, %v1521_v33  ;;  %v7855_v12 = vsel %vm10345_vm7, %v955_v15, 0.0  ;;  %vm10346_vm15 = vcmp.eq.s32.totalorder %v7537_v50, 1  ;;  %v6096_v34 = vld [vmem:[%s10265_s21 + $0x110] sm:$0xff]  }
 0x1e6   : > { %v7859_v9 = vsel %vm10346_vm15, %v953_v51, 0.0  ;;  %v954_v58 = vmax.f32 %v838_v23, 0.0  ;;  %v7861_v55 = vpack.c.bf16 %v1518_v14, %v1519_v52  ;;  %v10039_v32 = vrot.slane %v7811_v63, 1 }
 0x1e7   : > { %10343 = vst [vmem:[#allocation79_spill] sm:$0xff] %v7849_v26  ;;  %v1459_v13 = vrot.slane %v7859_v9, 7  ;;  %v7865_v33 = vpop.permute.xlu1 %1924  ;;  %v7869_v27 = vsel %vm10349_vm13, %v956_v17, 0.0  ;;  %v7871_v11 = vpack.c.bf16 %v956_v17, %v955_v15  ;;  %vm10046_vm0 = vcmp.eq.s32.totalorder %v7589_v45, 1 }
 0x1e8   : > { %10347 = vst [vmem:[#allocation80_spill] sm:$0xff] %v7861_v55  ;;  %10348 = vst [vmem:[#allocation81_spill] sm:$0xff] %v7865_v33  ;;  %v7875_v50 = vsel %vm10352_vm10, %v954_v58, 0.0  ;;  %v7877_v49 = vpack.c.bf16 %v954_v58, %v953_v51  ;;  %v7879_v52 = vpop.permute.xlu0 %1287  ;;  %v5673_v14 = vpop.f32.mrb[12].mxu0  ;;  %vm1321_vm7 = vcmp.eq.s32.totalorder %v7602_v7, 1  ;;  %vm1322_vm15 = vcmp.eq.s32.totalorder %v7612_v35, 1 }
 0x1e9   : > { %10350 = vst [vmem:[#allocation82_spill] sm:$0xff] %v7869_v27  ;;  %10351 = vst [vmem:[#allocation83_spill] sm:$0xff] %v7871_v11  ;;  %v850_v36 = vpop.f32.mrb[13].mxu0  ;;  %v1783_v15 = vrot.slane %v7826_v19, 1  ;;  %v859_v59 = vadd.f32 %v5673_v14, %v7712_v62  ;;  %v10355_v33 = vrot.slane %v7752_v43, 1  ;;  %v10356_v11 = vrot.slane %v7875_v50, 7 }
 0x1ea   : > { %10353 = vst [vmem:[#allocation84_spill] sm:$0xff] %v7877_v49  ;;  %v851_v17 = vadd.f32 %v7712_v62, %v850_v36  ;;  %v5674_v51 = vpop.f32.mrb[14].mxu0  ;;  %vm10357_vm13 = vcmp.lt.s32.totalorder %v7717_v24, 1  ;;  %v10041_v36 = vrot.slane %v7807_v46, 1  ;;  %vm10044_vm9 = vcmp.eq.s32.totalorder %v7604_v30, 1 }
 0x1eb   : > { %v862_v44 = vadd.f32 %v5674_v51, %v7712_v62  ;;  %v853_v23 = vpop.f32.mrb[15].mxu0  ;;  %v7889_v58 = vpop.permute.xlu1 %1647  ;;  %v1846_v8 = vsel %vm10053_vm12, %v10355_v33, %v10039_v32  ;;  %v1516_v19 = vsel %vm10357_vm13, %v1459_v13, %v10356_v11  ;;  %vm10358_vm10 = vmmov %vm10357_vm13  ;;  %v959_v51 = vmax.f32 %v859_v59, 0.0 }
 0x1ec   : > { %10354 = vst [vmem:[#allocation85_spill] sm:$0xff] %v7889_v58  ;;  %v1517_v14 = vsel %vm10358_vm10, %v1458_v56, %v1459_v13  ;;  %v957_v49 = vmax.f32 %v851_v17, 0.0  ;;  %v854_v55 = vadd.f32 %v7712_v62, %v853_v23  ;;  %v7905_v26 = vpop.permute.xlu0 %1927  ;;  %v7909_v33 = vpack.c.bf16 %v1846_v8, %v7776_v42  ;;  %vm7929_vm13 = vmpackc.low %vm1322_vm15, %vm1321_vm7 }
 0x1ed   : > { %10359 = vst [vmem:[#allocation86_spill] sm:$0xff] %v7905_v26  ;;  %v960_v43 = vmax.f32 %v862_v44, 0.0  ;;  %v7911_v32 = vpack.c.bf16 %v1516_v19, %v1517_v14  ;;  %v7915_v11 = vsel %vm1321_vm7, %v959_v51, 0.0  ;;  %v1844_v59 = vsel %vm10053_vm12, %v1783_v15, %v10041_v36 }
 0x1ee   : > { %10360 = vst [vmem:[#allocation87_spill] sm:$0xff] %v7909_v33  ;;  %v7919_v56 = vsel %vm10046_vm0, %v957_v49, 0.0  ;;  %v958_v13 = vmax.f32 %v854_v55, 0.0  ;;  %v10362_v42 = vmov 0  ;;  %vm5046_vm10 = vcmp.ne.s32.totalorder %v7619_v20, 1 }
 0x1ef   : > { %10361 = vst [vmem:[#allocation88_spill] sm:$0xff] %v7911_v32  ;;  %v10363_v42 = vsel %vm7929_vm13, 4294967295, %v10362_v42  ;;  %vm1323_vm1 = vcmp.eq.s32.totalorder %v7634_v57, 1  ;;  %v7935_v8 = vpop.permute.xlu1 %1290  ;;  %v7939_v55 = vsel %vm1322_vm15, %v960_v43, 0.0  ;;  %v7941_v17 = vpack.c.bf16 %v960_v43, %v959_v51  ;;  %v6095_v57 = vld [vmem:[%s10265_s21 + $0x150] sm:$0xff]  }
 0x1f0   : > { %10364 = vst [vmem:[#allocation89_spill] sm:$0xff] %v10363_v42  ;;  %v7945_v7 = vsel %vm10044_vm9, %v958_v13, 0.0  ;;  %v7947_v44 = vpack.c.bf16 %v958_v13, %v957_v49  ;;  %v7949_v23 = vpop.permute.xlu0 %1650  ;;  %v5677_v19 = vpop.f32.mrb[16].mxu0  ;;  %vm5045_vm7 = vcmp.ne.s32.totalorder %v7636_v48, 1  ;;  %v1465_v14 = vrot.slane %v7915_v11, 7 }
 0x1f1   : > { %10365 = vst [vmem:[#allocation90_spill] sm:$0xff] %v7941_v17  ;;  %10367 = vst [vmem:[#allocation92_spill] sm:$0xff] %v7949_v23  ;;  %v866_v26 = vpop.f32.mrb[17].mxu0  ;;  %vm1324_vm15 = vcmp.eq.s32.totalorder %v7644_v61, 1  ;;  %v875_v43 = vadd.f32 %v5677_v19, %v7712_v62  ;;  %4430 = vmatprep.mubr.msk.bf16.mxu1 %vm7929_vm13, %v7941_v17  ;;  %v10369_v35 = vrot.slane %v7939_v55, 7  ;;  %vm10370_vm9 = vcmp.lt.s32.totalorder %v7717_v24, 1 }
 0x1f2   : > { %10366 = vst [vmem:[#allocation91_spill] sm:$0xff] %v7947_v44  ;;  %v867_v49 = vadd.f32 %v7712_v62, %v866_v26  ;;  %v5678_v13 = vpop.f32.mrb[18].mxu0  ;;  %v10371_v51 = vrot.slane %v7945_v7, 7  ;;  %vm10372_vm0 = vmmov %vm10370_vm9  ;;  %v10373_v19 = vrot.slane %v7811_v63, 1  ;;  %v6091_v63 = vld [vmem:[%s10265_s21 + $0x148] sm:$0xff]  }
 0x1f3   : > { %v878_v44 = vadd.f32 %v5678_v13, %v7712_v62  ;;  %v869_v30 = vpop.f32.mrb[19].mxu0  ;;  %v7963_v36 = vpop.permute.xlu1 %1930  ;;  %v1510_v45 = vsel %vm10370_vm9, %v1465_v14, %v10369_v35  ;;  %v10055_v13 = vrot.slane %v7855_v12, 7  ;;  %v963_v17 = vmax.f32 %v875_v43, 0.0  ;;  %v6090_v35 = vld [vmem:[%s10265_s21 + $0x100] sm:$0xff]  }
 0x1f4   : > { %10368 = vst [vmem:[#allocation93_spill] sm:$0xff] %v7963_v36  ;;  %v1511_v26 = vsel %vm10372_vm0, %v10371_v51, %v1465_v14  ;;  %v1845_v42 = vsel %vm10053_vm12, %v10373_v19, %v1783_v15  ;;  %v961_v32 = vmax.f32 %v867_v49, 0.0  ;;  %v870_v36 = vadd.f32 %v7712_v62, %v869_v30  ;;  %v7979_v33 = vpop.permute.xlu0 %1293  ;;  %vm7996_vm0 = vmpackc.low %vm5045_vm7, %vm5046_vm10 }
 0x1f5   : > { %10374 = vst [vmem:[#allocation94_spill] sm:$0xff] %v7979_v33  ;;  %vm10054_vm9 = vcmp.eq.s32.totalorder %v7665_v47, 1  ;;  %v964_v14 = vmax.f32 %v878_v44, 0.0  ;;  %v7985_v51 = vpack.c.bf16 %v1510_v45, %v1511_v26  ;;  %v7990_v15 = vpack.c.bf16 %v1844_v59, %v1845_v42 }
 0x1f6   : > { %v10377_v30 = vmov 0  ;;  %v8002_v43 = vsel %vm10054_vm9, %v963_v17, 0.0  ;;  %v8006_v45 = vsel %vm1323_vm1, %v961_v32, 0.0  ;;  %v962_v44 = vmax.f32 %v870_v36, 0.0 }
 0x1f7   : > { %10375 = vst [vmem:[#allocation95_spill] sm:$0xff] %v7985_v51  ;;  %10376 = vst [vmem:[#allocation96_spill] sm:$0xff] %v7990_v15  ;;  %v10378_v30 = vsel %vm7996_vm0, 4294967295, %v10377_v30  ;;  %v10381_v59 = vrot.slane %v7869_v27, 7  ;;  %vm10382_vm12 = vcmp.lt.s32.totalorder %v7717_v24, 1  ;;  %vm10058_vm9 = vcmp.eq.s32.totalorder %v7671_v31, 1  ;;  %4435 = vmatmul.mubr.msk.bf16.vlgmr.msra.gmra.mrb[0].mxu1 %vm7996_vm0, %v7985_v51  ;;  %v8023_v36 = vpop.permute.xlu1 %1653 }
 0x1f8   : > { %10379 = vst [vmem:[#allocation97_spill] sm:$0xff] %v10378_v30  ;;  %10380 = vst [vmem:[#allocation98_spill] sm:$0xff] %v8002_v43  ;;  %v1467_v48 = vrot.slane %v8006_v45, 7  ;;  %v8027_v42 = vsel %vm10058_vm9, %v964_v14, 0.0  ;;  %v8029_v49 = vpack.c.bf16 %v964_v14, %v963_v17  ;;  %v8033_v26 = vsel %vm1324_vm15, %v962_v44, 0.0  ;;  %5348 = vmatpush3.bf16.msra.mxu1 %v6090_v35  ;;  %v6093_v30 = vld [vmem:[%s10265_s21 + $0x108] sm:$0xff]  }
 0x1f9   : > { %v8014_v20 = vsel %vm10382_vm12, %v10055_v13, %v10381_v59  ;;  %10384 = vst [vmem:[#allocation100_spill] sm:$0xff] %v8023_v36  ;;  %v8035_v19 = vpack.c.bf16 %v962_v44, %v961_v32  ;;  %v8037_v59 = vpop.permute.xlu0 %1933  ;;  %v5681_v13 = vpop.f32.mrb[20].mxu0  ;;  %vm8046_vm12 = vmpackc.low %vm1324_vm15, %vm1323_vm1  ;;  %v10388_v17 = vmov 0  ;;  %v1469_v32 = vrot.slane %v8002_v43, 7  ;;  %5349 = vmatprep.subr.bf16.mxu1 %v6091_v63  ;;  %v6108_v43 = vld [vmem:[%s10265_s21 + $0x130] sm:$0xff]  }
 0x1fa   : > { %10383 = vst [vmem:[#allocation99_spill] sm:$0xff] %v8014_v20  ;;  %10385 = vst [vmem:[#allocation101_spill] sm:$0xff] %v8029_v49  ;;  %v10389_v17 = vsel %vm8046_vm12, 4294967295, %v10388_v17  ;;  %v1468_v35 = vrot.slane %v8033_v26, 7  ;;  %v882_v44 = vpop.f32.mrb[21].mxu0  ;;  %v891_v61 = vadd.f32 %v5681_v13, %v7712_v62  ;;  %vm10392_vm7 = vcmp.lt.s32.totalorder %v7717_v24, 1 }
 0x1fb   : > { %10386 = vst [vmem:[#allocation102_spill] sm:$0xff] %v8035_v19  ;;  %10387 = vst [vmem:[#allocation103_spill] sm:$0xff] %v8037_v59  ;;  %v883_v51 = vadd.f32 %v7712_v62, %v882_v44  ;;  %v5682_v59 = vpop.f32.mrb[22].mxu0  ;;  %4438 = vmatprep.mubr.msk.bf16.mxu1 %vm8046_vm12, %v8035_v19  ;;  %v8067_v15 = vpop.permute.xlu1 %1936  ;;  %v10393_v13 = vrot.slane %v7939_v55, 7  ;;  %vm10400_vm15 = vcmp.ne.s32.totalorder %v7651_v29, 1  ;;  %vm10401_vm9 = vcmp.ne.s32.totalorder %v7667_v3, 1 }
 0x1fc   : > { %10390 = vst [vmem:[#allocation104_spill] sm:$0xff] %v10389_v17  ;;  %v894_v63 = vadd.f32 %v5682_v59, %v7712_v62  ;;  %v885_v14 = vpop.f32.mrb[23].mxu0  ;;  %10391 = vst [vmem:[#allocation105_spill] sm:$0xff] %v8067_v15  ;;  %v1508_v36 = vsel %vm10392_vm7, %v1467_v48, %v1468_v35  ;;  %v10395_v17 = vrot.slane %v8027_v42, 7  ;;  %v967_v23 = vmax.f32 %v891_v61, 0.0  ;;  %5350 = vmatpush3.bf16.msra.mxu1 %v6093_v30  ;;  %v6102_v20 = vld [vmem:[%s10265_s21 + $0x120] sm:$0xff]  }
 0x1fd   : > { %vm10394_vm1 = vmmov %vm10392_vm7  ;;  %v965_v59 = vmax.f32 %v883_v51, 0.0  ;;  %v886_v58 = vadd.f32 %v7712_v62, %v885_v14  ;;  %v8081_v15 = vpop.permute.xlu0 %1656  ;;  %5351 = vmatprep.subr.bf16.mxu1 %v6095_v57  ;;  %v6098_v51 = vld [vmem:[%s10265_s21 + $0x158] sm:$0xff]   ;;  %v10402_v30 = vmov 0  ;;  %vm10405_vm7 = vcmp.eq.s32.totalorder %v7693_v10, 1 }
 0x1fe   : > { %v1509_v44 = vsel %vm10394_vm1, %v10393_v13, %v1467_v48  ;;  %vm10396_vm10 = vmmov %vm10394_vm1  ;;  %10397 = vst [vmem:[#allocation106_spill] sm:$0xff] %v8081_v15  ;;  %v968_v48 = vmax.f32 %v894_v63, 0.0  ;;  %vm10409_vm12 = vcmp.eq.s32.totalorder %v7671_v31, 1  ;;  %v10410_v29 = vmov 0  ;;  %v6100_v57 = vld [vmem:[%s10265_s21 + $0x118] sm:$0xff]   ;;  %v6107_v15 = vld [vmem:[%s10265_s21 + $0x170] sm:$0xff]  }
 0x1ff   : > { %v1506_v19 = vsel %vm10396_vm10, %v1469_v32, %v10395_v17  ;;  %v8088_v13 = vpack.c.bf16 %v1508_v36, %v1509_v44  ;;  %vm10399_vm10 = vmmov %vm10394_vm1  ;;  %v8105_v36 = vsel %vm10405_vm7, %v967_v23, 0.0  ;;  %vm10406_vm1 = vcmp.eq.s32.totalorder %v7681_v39, 1 }
 0x200   : > { %v1507_v17 = vsel %vm10399_vm10, %v1468_v35, %v1469_v32  ;;  %vm8099_vm0 = vmpackc.low %vm10401_vm9, %vm10400_vm15  ;;  %v8109_v32 = vsel %vm10406_vm1, %v965_v59, 0.0  ;;  %v966_v14 = vmax.f32 %v886_v58, 0.0  ;;  %vm10408_vm10 = vcmp.eq.s32.totalorder %v7665_v47, 1  ;;  %v8129_v47 = vpop.permute.xlu1 %1942  ;;  %5352 = vmatpush3.bf16.msra.mxu1 %v6096_v34 }
 0x201   : > { %10398 = vst [vmem:[#allocation107_spill] sm:$0xff] %v8088_v13  ;;  %v10403_v30 = vsel %vm8099_vm0, 4294967295, %v10402_v30  ;;  %v8111_v35 = vpack.c.bf16 %v1506_v19, %v1507_v17  ;;  %vm8117_vm13 = vmpackc.low %vm10409_vm12, %vm10408_vm10  ;;  %v1471_v58 = vrot.slane %v8109_v32, 7  ;;  %4443 = vmatmul.mubr.msk.bf16.gmra.mrb[4].mxu1 %vm8099_vm0, %v8088_v13  ;;  %vm10414_vm12 = vcmp.eq.s32.totalorder %v7697_v54, 1  ;;  %v8146_v44 = vpop.permute.xlu0 %1939  ;;  %v5685_v17 = vpop.f32.mrb[24].mxu0  ;;  %5353 = vmatprep.subr.bf16.mxu1 %v6098_v51 }
 0x202   : > { %10404 = vst [vmem:[#allocation108_spill] sm:$0xff] %v10403_v30  ;;  %v10411_v29 = vsel %vm8117_vm13, 4294967295, %v10410_v29  ;;  %10413 = vst [vmem:[#allocation111_spill] sm:$0xff] %v8129_v47  ;;  %v8133_v31 = vsel %vm10414_vm12, %v968_v48, 0.0  ;;  %v8135_v19 = vpack.c.bf16 %v968_v48, %v967_v23  ;;  %vm10416_vm7 = vcmp.eq.s32.totalorder %v7685_v6, 1  ;;  %4446 = vmatprep.mubr.msk.bf16.mxu1 %vm8117_vm13, %v8029_v49  ;;  %v6101_v30 = vld [vmem:[%s10265_s21 + $0x160] sm:$0xff]  }
 0x203   : > { %10407 = vst [vmem:[#allocation109_spill] sm:$0xff] %v8111_v35  ;;  %10412 = vst [vmem:[#allocation110_spill] sm:$0xff] %v10411_v29  ;;  %v8139_v61 = vsel %vm10416_vm7, %v966_v14, 0.0  ;;  %v8141_v63 = vpack.c.bf16 %v966_v14, %v965_v59  ;;  %v1473_v48 = vrot.slane %v8105_v36, 7  ;;  %v898_v14 = vpop.f32.mrb[25].mxu0  ;;  %v907_v29 = vadd.f32 %v5685_v17, %v7712_v62 }
 0x204   : > { %10415 = vst [vmem:[#allocation112_spill] sm:$0xff] %v8135_v19  ;;  %10418 = vst [vmem:[#allocation114_spill] sm:$0xff] %v8146_v44  ;;  %v1472_v59 = vrot.slane %v8139_v61, 7  ;;  %v899_v23 = vadd.f32 %v7712_v62, %v898_v14  ;;  %v5686_v49 = vpop.f32.mrb[26].mxu0  ;;  %v8165_v47 = vpop.permute.xlu1 %1948  ;;  %vm10420_vm12 = vcmp.lt.s32.totalorder %v7717_v24, 1  ;;  %v10421_v34 = vrot.slane %v8027_v42, 7  ;;  %5354 = vmatpush3.bf16.msra.mxu1 %v6100_v57 }
 0x205   : > { %10417 = vst [vmem:[#allocation113_spill] sm:$0xff] %v8141_v63  ;;  %v910_v3 = vadd.f32 %v5686_v49, %v7712_v62  ;;  %v901_v51 = vpop.f32.mrb[27].mxu0  ;;  %10419 = vst [vmem:[#allocation115_spill] sm:$0xff] %v8165_v47  ;;  %v10423_v14 = vrot.slane %v8133_v31, 7  ;;  %v971_v27 = vmax.f32 %v907_v29, 0.0  ;;  %v8179_v47 = vpop.permute.xlu0 %1945  ;;  %5355 = vmatprep.subr.bf16.mxu1 %v6101_v30  ;;  %vm10429_vm10 = vcmp.ne.s32.totalorder %v7683_v40, 1 }
 0x206   : > { %v1504_v44 = vsel %vm10420_vm12, %v1471_v58, %v1472_v59  ;;  %vm10422_vm7 = vmmov %vm10420_vm12  ;;  %v969_v49 = vmax.f32 %v899_v23, 0.0  ;;  %v902_v46 = vadd.f32 %v7712_v62, %v901_v51  ;;  %10425 = vst [vmem:[#allocation116_spill] sm:$0xff] %v8179_v47  ;;  %v6105_v23 = vld [vmem:[%s10265_s21 + $0x168] sm:$0xff]   ;;  %v10430_v57 = vmov 0 }
 0x207   : > { %v1505_v17 = vsel %vm10422_vm7, %v10421_v34, %v1471_v58  ;;  %vm10424_vm9 = vmmov %vm10422_vm7  ;;  %v972_v34 = vmax.f32 %v910_v3, 0.0  ;;  %vm10433_vm12 = vcmp.eq.s32.totalorder %v7756_v2, 1  ;;  %vm10434_vm15 = vcmp.eq.s32.totalorder %v7705_v60, 1  ;;  %v6106_v51 = vld [vmem:[%s10265_s21 + $0x128] sm:$0xff]  }
 0x208   : > { %v1502_v13 = vsel %vm10424_vm9, %v1473_v48, %v10423_v14  ;;  %v8186_v41 = vpack.c.bf16 %v1504_v44, %v1505_v17  ;;  %vm10427_vm9 = vmmov %vm10422_vm7  ;;  %vm10428_vm7 = vcmp.ne.s32.totalorder %v7675_v28, 1  ;;  %v8203_v3 = vsel %vm10433_vm12, %v971_v27, 0.0  ;;  %5356 = vmatpush3.bf16.msra.mxu1 %v6102_v20 }
 0x209   : > { %v1503_v29 = vsel %vm10427_vm9, %v1472_v59, %v1473_v48  ;;  %vm8197_vm1 = vmpackc.low %vm10429_vm10, %vm10428_vm7  ;;  %v8207_v44 = vsel %vm10434_vm15, %v969_v49, 0.0  ;;  %v970_v30 = vmax.f32 %v902_v46, 0.0  ;;  %vm10436_vm9 = vcmp.eq.s32.totalorder %v7681_v39, 1  ;;  %v8227_v39 = vpop.permute.xlu1 %1954  ;;  %v5689_v59 = vpop.f32.mrb[28].mxu0  ;;  %5357 = vmatprep.subr.bf16.mxu1 %v6105_v23 }
 0x20a   : > { %10426 = vst [vmem:[#allocation117_spill] sm:$0xff] %v8186_v41  ;;  %v10431_v57 = vsel %vm8197_vm1, 4294967295, %v10430_v57  ;;  %v8209_v48 = vpack.c.bf16 %v1502_v13, %v1503_v29  ;;  %vm10437_vm0 = vcmp.eq.s32.totalorder %v7685_v6, 1  ;;  %v10438_v28 = vmov 0  ;;  %4451 = vmatmul.mubr.msk.bf16.gmra.mrb[8].mxu1 %vm8197_vm1, %v8111_v35  ;;  %10441 = vst [vmem:[#allocation121_spill] sm:$0xff] %v8227_v39  ;;  %v8244_v29 = vpop.permute.xlu0 %1951 }
 0x20b   : > { %10432 = vst [vmem:[#allocation118_spill] sm:$0xff] %v10431_v57  ;;  %vm8215_vm13 = vmpackc.low %vm10437_vm0, %vm10436_vm9  ;;  %v1475_v46 = vrot.slane %v8207_v44, 7  ;;  %vm10442_vm0 = vcmp.eq.s32.totalorder %v7800_v38, 1  ;;  %v8233_v13 = vpack.c.bf16 %v972_v34, %v971_v27  ;;  %vm10444_vm15 = vcmp.eq.s32.totalorder %v7714_v21, 1 }
 0x20c   : > { %10435 = vst [vmem:[#allocation119_spill] sm:$0xff] %v8209_v48  ;;  %v10439_v28 = vsel %vm8215_vm13, 4294967295, %v10438_v28  ;;  %v8231_v6 = vsel %vm10442_vm0, %v972_v34, 0.0  ;;  %v8237_v17 = vsel %vm10444_vm15, %v970_v30, 0.0  ;;  %v8239_v14 = vpack.c.bf16 %v970_v30, %v969_v49  ;;  %4454 = vmatprep.mubr.msk.bf16.mxu1 %vm8215_vm13, %v8141_v63  ;;  %10446 = vst [vmem:[#allocation124_spill] sm:$0xff] %v8244_v29  ;;  %v914_v30 = vpop.f32.mrb[29].mxu0  ;;  %5358 = vmatpush3.bf16.msra.mxu1 %v6106_v51 }
 0x20d   : > { %10440 = vst [vmem:[#allocation120_spill] sm:$0xff] %v10439_v28  ;;  %10443 = vst [vmem:[#allocation122_spill] sm:$0xff] %v8233_v13  ;;  %vm10111_vm12 = vcmp.eq.s32.totalorder %v7935_v8, 1  ;;  %v1477_v27 = vrot.slane %v8203_v3, 7  ;;  %v1476_v49 = vrot.slane %v8237_v17, 7  ;;  %v923_v40 = vadd.f32 %v5689_v59, %v7712_v62  ;;  %v5690_v57 = vpop.f32.mrb[30].mxu0  ;;  %v8263_v35 = vpop.permute.xlu1 %1960  ;;  %5359 = vmatprep.subr.bf16.mxu1 %v6107_v15 }
 0x20e   : > { %10445 = vst [vmem:[#allocation123_spill] sm:$0xff] %v8239_v14  ;;  %v915_v58 = vadd.f32 %v7712_v62, %v914_v30  ;;  %v926_v34 = vadd.f32 %v5690_v57, %v7712_v62  ;;  %v917_v23 = vpop.f32.mrb[31].mxu0  ;;  %10447 = vst [vmem:[#allocation125_spill] sm:$0xff] %v8263_v35  ;;  %vm10448_vm15 = vcmp.lt.s32.totalorder %v7717_v24, 1  ;;  %v10449_v20 = vrot.slane %v8133_v31, 7  ;;  %v8277_v35 = vpop.permute.xlu0 %1957 }
 0x20f   : > { %v1500_v28 = vsel %vm10448_vm15, %v1475_v46, %v1476_v49  ;;  %vm10450_vm10 = vmmov %vm10448_vm15  ;;  %v10451_v30 = vrot.slane %v8231_v6, 7  ;;  %v975_v29 = vmax.f32 %v923_v40, 0.0  ;;  %v918_v47 = vadd.f32 %v7712_v62, %v917_v23  ;;  %10453 = vst [vmem:[#allocation126_spill] sm:$0xff] %v8277_v35 }
 0x210   : > { %v1501_v59 = vsel %vm10450_vm10, %v10449_v20, %v1475_v46  ;;  %vm10452_vm7 = vmmov %vm10450_vm10  ;;  %v973_v57 = vmax.f32 %v915_v58, 0.0  ;;  %v976_v20 = vmax.f32 %v926_v34, 0.0  ;;  %v6111_v58 = vld [vmem:[%s10265_s21 + $0x178] sm:$0xff]   ;;  %vm10455_vm15 = vcmp.ne.s32.totalorder %v7687_v0, 1  ;;  %v5693_v34 = vpop.f32.mrb[32].mxu0  ;;  %5360 = vmatpush3.bf16.msra.mxu1 %v6108_v43 }
 0x211   : > { %v1498_v63 = vsel %vm10452_vm7, %v1477_v27, %v10451_v30  ;;  %v8283_v13 = vpack.c.bf16 %v1500_v28, %v1501_v59  ;;  %vm10454_vm10 = vmmov %vm10452_vm7  ;;  %vm10456_vm0 = vcmp.ne.s32.totalorder %v7695_v25, 1  ;;  %v10457_v40 = vmov 0  ;;  %v6112_v46 = vld [vmem:[%s10265_s21 + $0x138] sm:$0xff]   ;;  %5361 = vmatprep.subr.bf16.mxu1 %v6111_v58 }
 0x212   : > { %v1499_v30 = vsel %vm10454_vm10, %v1476_v49, %v1477_v27  ;;  %vm8295_vm9 = vmpackc.low %vm10456_vm0, %vm10455_vm15  ;;  %v8301_v28 = vsel %vm10111_vm12, %v975_v29, 0.0  ;;  %vm10460_vm10 = vcmp.eq.s32.totalorder %v7838_v22, 1  ;;  %v974_v51 = vmax.f32 %v918_v47, 0.0  ;;  %v8324_v47 = vpop.permute.xlu1 %1966  ;;  %v930_v49 = vpop.f32.mrb[33].mxu0 }
 0x213   : > { %v10458_v40 = vsel %vm8295_vm9, 4294967295, %v10457_v40  ;;  %v8305_v15 = vsel %vm10460_vm10, %v973_v57, 0.0  ;;  %v8307_v27 = vpack.c.bf16 %v1498_v63, %v1499_v30  ;;  %vm10461_vm7 = vcmp.eq.s32.totalorder %v7693_v10, 1  ;;  %4459 = vmatmul.mubr.msk.bf16.gmra.mrb[12].mxu1 %vm8295_vm9, %v8186_v41  ;;  %10466 = vst [vmem:[#allocation129_spill] sm:$0xff] %v8324_v47  ;;  %v8341_v30 = vpop.permute.xlu0 %1963  ;;  %v5694_v41 = vpop.f32.mrb[34].mxu0 }
 0x214   : > { %10459 = vst [vmem:[#allocation127_spill] sm:$0xff] %v10458_v40  ;;  %vm10462_vm1 = vcmp.eq.s32.totalorder %v7697_v54, 1  ;;  %v10463_v0 = vmov 0  ;;  %v1479_v23 = vrot.slane %v8305_v15, 7  ;;  %vm10467_vm0 = vcmp.eq.s32.totalorder %v7979_v33, 1  ;;  %10470 = vst [vmem:[#allocation131_spill] sm:$0xff] %v8341_v30  ;;  %5362 = vmatpush3.bf16.msra.mxu1 %v6112_v46 }
 0x215   : > { %vm8313_vm13 = vmpackc.low %vm10462_vm1, %vm10461_vm7  ;;  %v8328_v54 = vsel %vm10467_vm0, %v976_v20, 0.0  ;;  %v8330_v10 = vpack.c.bf16 %v976_v20, %v975_v29  ;;  %vm10469_vm1 = vcmp.eq.s32.totalorder %v7879_v52, 1  ;;  %v8336_v59 = vpack.c.bf16 %v974_v51, %v973_v57  ;;  %v933_v20 = vpop.f32.mrb[35].mxu0 }
 0x216   : > { %v10464_v0 = vsel %vm8313_vm13, 4294967295, %v10463_v0  ;;  %v8334_v63 = vsel %vm10469_vm1, %v974_v51, 0.0  ;;  %4462 = vmatprep.mubr.msk.bf16.mxu1 %vm8313_vm13, %v8135_v19  ;;  %v1481_v57 = vrot.slane %v8301_v28, 7  ;;  %v8355_v39 = vadd.f32 %v5693_v34, %v7712_v62  ;;  %v8361_v47 = vpop.permute.xlu1 %1972 }
 0x217   : > { %10465 = vst [vmem:[#allocation128_spill] sm:$0xff] %v10464_v0  ;;  %10468 = vst [vmem:[#allocation130_spill] sm:$0xff] %v8330_v10  ;;  %v1480_v51 = vrot.slane %v8334_v63, 7  ;;  %v931_v40 = vadd.f32 %v7712_v62, %v930_v49  ;;  %v942_v29 = vadd.f32 %v5694_v41, %v7712_v62  ;;  %vm10472_vm1 = vcmp.lt.s32.totalorder %v7717_v24, 1  ;;  %v8377_v30 = vpop.permute.xlu0 %1969  ;;  %v10513_v41 = vld [vmem:[#allocation64_spill] sm:$0xff] }
 0x218   : > { %10471 = vst [vmem:[#allocation132_spill] sm:$0xff] %v8361_v47  ;;  %v10473_v25 = vrot.slane %v8231_v6, 7  ;;  %vm10474_vm12 = vmmov %vm10472_vm1  ;;  %v10475_v49 = vrot.slane %v8328_v54, 7  ;;  %v10120_v19 = vmax.f32 %v8355_v39, 0.0  ;;  %v934_v47 = vadd.f32 %v7712_v62, %v933_v20  ;;  %v10488_v20 = vld [vmem:[#allocation74_spill] sm:$0xff] }
 0x219   : > { %v1496_v58 = vsel %vm10472_vm1, %v1479_v23, %v1480_v51  ;;  %vm10476_vm7 = vmmov %vm10472_vm1  ;;  %10477 = vst [vmem:[#allocation133_spill] sm:$0xff] %v8377_v30  ;;  %v977_v35 = vmax.f32 %v931_v40, 0.0  ;;  %v980_v10 = vmax.f32 %v942_v29, 0.0  ;;  %v10484_v46 = vrot.slane %v7855_v12, 7 }
 0x21a   : > { %v1497_v34 = vsel %vm10474_vm12, %v10473_v25, %v1479_v23  ;;  %v1494_v43 = vsel %vm10476_vm7, %v1481_v57, %v10475_v49  ;;  %vm10478_vm12 = vmmov %vm10472_vm1  ;;  %vm10479_vm7 = vcmp.ne.s32.totalorder %v7699_v53, 1  ;;  %vm10480_vm1 = vcmp.ne.s32.totalorder %v7707_v37, 1 }
 0x21b   : > { %v8379_v33 = vpack.c.bf16 %v1496_v58, %v1497_v34  ;;  %v1495_v25 = vsel %vm10478_vm12, %v1480_v51, %v1481_v57  ;;  %vm8387_vm0 = vmpackc.low %vm10480_vm1, %vm10479_vm7  ;;  %v10481_v23 = vmov 0  ;;  %v978_v49 = vmax.f32 %v934_v47, 0.0  ;;  %v8424_v58 = vpop.permute.xlu1 %1296 }
 0x21c   : > { %v10482_v23 = vsel %vm8387_vm0, 4294967295, %v10481_v23  ;;  %v8391_v62 = vpack.c.bf16 %v1494_v43, %v1495_v25  ;;  %v10485_v40 = vrot.slane %v7875_v50, 7  ;;  %vm10486_vm10 = vmmov %vm10478_vm12  ;;  %v10487_v57 = vrot.slane %v7859_v9, 1  ;;  %4467 = vmatmul.mubr.msk.bf16.gmra.mrb[16].mxu1 %vm8387_vm0, %v8209_v48  ;;  %10498 = vst [vmem:[#allocation136_spill] sm:$0xff] %v8424_v58  ;;  %v10502_v25 = vld [vmem:[#allocation71_spill] sm:$0xff] }
 0x21d   : > { %10483 = vst [vmem:[#allocation134_spill] sm:$0xff] %v10482_v23  ;;  %v10489_v53 = vrot.slane %v10488_v20, 1  ;;  %vm10490_vm12 = vcmp.lt.s32.totalorder %v7717_v24, 7  ;;  %vm10491_vm7 = vcmp.eq.s32.totalorder %v7705_v60, 1  ;;  %vm10492_vm1 = vcmp.eq.s32.totalorder %v7714_v21, 1  ;;  %v10499_v60 = vld [vmem:[#allocation99_spill] sm:$0xff] }
 0x21e   : > { %v1515_v29 = vsel %vm10486_vm10, %v10485_v40, %v10484_v46  ;;  %vm8409_vm15 = vmpackc.low %vm10492_vm1, %vm10491_vm7  ;;  %v10493_v47 = vmov 0  ;;  %vm10496_vm9 = vcmp.eq.s32.totalorder %v7420_v16, 1  ;;  %v8419_v43 = vpack.c.bf16 %v980_v10, %v10120_v19  ;;  %v8450_v20 = vld [vmem:[%s10265_s21 + $0x200] sm:$0xff]  }
 0x21f   : > { %v1842_v37 = vsel %vm10490_vm12, %v10489_v53, %v10487_v57  ;;  %v10494_v47 = vsel %vm8409_vm15, 4294967295, %v10493_v47  ;;  %v8415_v51 = vsel %vm10496_vm9, %v980_v10, 0.0  ;;  %v8427_v21 = vpack.c.bf16 %v10499_v60, %v1515_v29  ;;  %vm10504_vm9 = vmmov %vm10490_vm12  ;;  %v10505_v57 = vld [vmem:[#allocation45_spill] sm:$0xff]  ;;  %v10506_v10 = vld [vmem:[#allocation48_spill] sm:$0xff]  ;;  %4470 = vmatprep.mubr.msk.bf16.mxu1 %vm8409_vm15, %v8239_v14  ;;  %v8445_v29 = vpop.permute.xlu0 %1975  ;;  %5695 = vmatprep.subr.bf16.mxu1 %v8450_v20 }
 0x220   : > { %10495 = vst [vmem:[#allocation74_spill] sm:$0xff] %v10494_v47  ;;  %10497 = vst [vmem:[#allocation135_spill] sm:$0xff] %v8419_v43  ;;  %v10501_v34 = vmov %v10489_v53  ;;  %v10503_v46 = vrot.slane %v10502_v25, 1  ;;  %v8439_v19 = vpack.c.bf16 %v978_v49, %v977_v35  ;;  %vm10127_vm7 = vcmp.eq.s32.totalorder %v8424_v58, 1  ;;  %v6092_v47 = vld [vmem:[%s10265_s21 + $0xc8] sm:$0xff]  }
 0x221   : > { %10500 = vst [vmem:[#allocation99_spill] sm:$0xff] %v8427_v21  ;;  %10508 = vst [vmem:[#allocation45_spill] sm:$0xff] %v8445_v29  ;;  %v10511_v53 = vrot.slane %v7919_v56, 7  ;;  %v10514_v43 = vrot.slane %v10513_v41, 7  ;;  %v10522_v29 = vld [vmem:[#allocation78_spill] sm:$0xff]  ;;  %v10526_v30 = vrot.slane %v7855_v12, 1 }
 0x222   : > { %v1843_v40 = vsel %vm10504_vm9, %v10503_v46, %v10501_v34  ;;  %10507 = vst [vmem:[#allocation71_spill] sm:$0xff] %v8439_v19  ;;  %v1375_v34 = vsel %vm10127_vm7, %v977_v35, 0.0  ;;  %v10510_v46 = vrot.slane %v7945_v7, 7  ;;  %vm10512_vm1 = vmmov %vm10486_vm10  ;;  %v10515_v19 = vrot.slane %v8415_v51, 7  ;;  %v6088_v35 = vld [vmem:[%s10265_s21 + $0x80] sm:$0xff]  }
 0x223   : > { %v8455_v25 = vpack.c.bf16 %v1842_v37, %v1843_v40  ;;  %vm10516_vm9 = vmmov %vm10512_vm1  ;;  %v1483_v60 = vrot.slane %v1375_v34, 7  ;;  %v1810_v48 = vrot.slane %v1375_v34, 1  ;;  %v10517_v37 = vmov %v10511_v53  ;;  %v10518_v40 = vld [vmem:[#allocation82_spill] sm:$0xff]  ;;  %v8482_v34 = vpop.permute.xlu1 %1659 }
 0x224   : > { %v1512_v0 = vsel %vm10512_vm1, %v10511_v53, %v10510_v46  ;;  %v1525_v23 = vsel %vm10516_vm9, %v10515_v19, %v10514_v43  ;;  %v10519_v58 = vrot.slane %v10518_v40, 7  ;;  %vm10520_vm7 = vmmov %vm10512_vm1  ;;  %v10521_v46 = vld [vmem:[#allocation73_spill] sm:$0xff]  ;;  %v10523_v19 = vld [vmem:[#allocation67_spill] sm:$0xff]  ;;  %10524 = vst [vmem:[#allocation64_spill] sm:$0xff] %v8482_v34  ;;  %v10530_v21 = vrot.slane %v7859_v9, 1 }
 0x225   : > { %10509 = vst [vmem:[#allocation48_spill] sm:$0xff] %v8455_v25  ;;  %v4378_v43 = vpack.c.bf16 %v10523_v19, %v1525_v23  ;;  %vm10533_vm1 = vcmp.ne.s32.totalorder %v7402_v4, 1  ;;  %vm10535_vm0 = vcmp.lt.s32.totalorder %v7717_v24, 1  ;;  %v10538_v4 = vld [vmem:[#allocation44_spill] sm:$0xff]  ;;  %v10572_v34 = vld [vmem:[#allocation98_spill] sm:$0xff]  ;;  %vm10623_vm2 = vcmp.ne.s32.totalorder %v10522_v29, 1 }
 0x226   : > { %v1513_v53 = vsel %vm10520_vm7, %v10519_v58, %v10517_v37  ;;  %v10527_v58 = vrot.slane %v7875_v50, 1  ;;  %vm10528_vm7 = vmmov %vm10490_vm12  ;;  %vm10532_vm12 = vcmp.ne.s32.totalorder %v7404_v5, 1  ;;  %v10536_v50 = vrot.slane %v8328_v54, 1 }
 0x227   : > { %v8487_v14 = vpack.c.bf16 %v1512_v0, %v1513_v53  ;;  %vm10531_vm9 = vmmov %vm10528_vm7  ;;  %v10534_v53 = vrot.slane %v8328_v54, 7  ;;  %v10550_v0 = vrot.slane %v7945_v7, 1 }
 0x228   : > { %v1840_v37 = vsel %vm10528_vm7, %v10527_v58, %v10526_v30  ;;  %v10529_v25 = vmov %v10527_v58  ;;  %vm4377_vm10 = vmpackc.low %vm10533_vm1, %vm10532_vm12  ;;  %v8516_v9 = vsel %vm10528_vm7, %v10536_v50, %v1810_v48  ;;  %v8518_v30 = vpop.permute.xlu0 %1299  ;;  %vm10539_vm12 = vcmp.eq.s32.totalorder %v10538_v4, 1 }
 0x229   : > { %10525 = vst [vmem:[#allocation82_spill] sm:$0xff] %v8487_v14  ;;  %v1841_v23 = vsel %vm10531_vm9, %v10530_v21, %v10529_v25  ;;  %v8510_v19 = vsel %vm10535_vm0, %v10534_v53, %v1483_v60  ;;  %10537 = vst [vmem:[#allocation73_spill] sm:$0xff] %v8518_v30  ;;  %v10540_v21 = vld [vmem:[#allocation46_spill] sm:$0xff]  ;;  %v10542_v25 = vmov 0  ;;  %4379 = vmatmul.mubr.msk.bf16.vlgmr.msra.gmra.mrb[36].mxu0 %vm4377_vm10, %v4378_v43  ;;  %v10544_v58 = vrot.slane %v7919_v56, 1 }
 0x22a   : > { %v8520_v5 = vpack.c.bf16 %v1840_v37, %v1841_v23  ;;  %vm10541_vm1 = vcmp.eq.s32.totalorder %v10540_v21, 1  ;;  %v10545_v53 = vrot.slane %v10518_v40, 1  ;;  %v10547_v23 = vrot.slane %v7855_v12, 1  ;;  %vm10548_vm15 = vmmov %vm10528_vm7  ;;  %5236 = vmatpush3.bf16.msra.mxu0 %v6088_v35  ;;  %v10557_v40 = vld [vmem:[#allocation66_spill] sm:$0xff] }
 0x22b   : > { %vm8526_vm9 = vmpackc.low %vm10541_vm1, %vm10539_vm12  ;;  %v10549_v21 = vrot.slane %v7915_v11, 1  ;;  %vm10552_vm12 = vcmp.ne.s32.totalorder %v7723_v1, 1  ;;  %vm10553_vm1 = vcmp.ne.s32.totalorder %v7762_v18, 1  ;;  %v10558_v18 = vrot.slane %v7945_v7, 1  ;;  %5237 = vmatprep.subr.bf16.mxu0 %v6092_v47 }
 0x22c   : > { %v10543_v25 = vsel %vm8526_vm9, 4294967295, %v10542_v25  ;;  %v1838_v50 = vsel %vm10528_vm7, %v10545_v53, %v10544_v58  ;;  %v10546_v37 = vmov %v10545_v53  ;;  %vm10551_vm10 = vmmov %vm10528_vm7  ;;  %v10554_v58 = vmov 0  ;;  %4382 = vmatprep.mubr.msk.bf16.mxu0 %vm8526_vm9, %v10557_v40  ;;  %v8611_v47 = vpop.permute.xlu0 %1662 }
 0x22d   : > { %v1839_v4 = vsel %vm10548_vm15, %v10547_v23, %v10546_v37  ;;  %v1836_v43 = vsel %vm10551_vm10, %v10550_v0, %v10549_v21  ;;  %vm8553_vm0 = vmpackc.low %vm10553_vm1, %vm10552_vm12  ;;  %vm10556_vm7 = vcmp.eq.s32.totalorder %v8518_v30, 1  ;;  %v6094_v0 = vld [vmem:[%s10265_s21 + $0x88] sm:$0xff]   ;;  %v10559_v53 = vrot.slane %v7919_v56, 1  ;;  %10571 = vst [vmem:[#allocation78_spill] sm:$0xff] %v8611_v47 }
 0x22e   : > { %v10555_v58 = vsel %vm8553_vm0, 4294967295, %v10554_v58  ;;  %v8559_v12 = vsel %vm10556_vm7, %v978_v49, 0.0  ;;  %v8567_v1 = vpack.c.bf16 %v1838_v50, %v1839_v4  ;;  %vm10560_vm15 = vmmov %vm10551_vm10  ;;  %v10561_v49 = vrot.slane %v8006_v45, 1  ;;  %4475 = vmatmul.mubr.msk.bf16.gmra.mrb[20].mxu1 %vm8553_vm0, %v8283_v13  ;;  %v8594_v4 = vpop.permute.xlu1 %1978  ;;  %5238 = vmatpush3.bf16.msra.mxu0 %v6094_v0 }
 0x22f   : > { %v1837_v37 = vsel %vm10560_vm15, %v10559_v53, %v10558_v18  ;;  %v10562_v35 = vrot.slane %v7939_v55, 1  ;;  %vm10563_vm12 = vcmp.eq.s32.totalorder %v7756_v2, 1  ;;  %vm10564_vm1 = vcmp.eq.s32.totalorder %v7800_v38, 1  ;;  %v6097_v2 = vld [vmem:[%s10265_s21 + $0xd0] sm:$0xff]   ;;  %vm10569_vm15 = vmmov %vm10551_vm10 }
 0x230   : > { %vm8585_vm7 = vmpackc.low %vm10564_vm1, %vm10563_vm12  ;;  %v10565_v50 = vmov 0  ;;  %v1484_v56 = vrot.slane %v8559_v12, 7  ;;  %v8599_v38 = vpack.c.bf16 %v1836_v43, %v1837_v37  ;;  %v10568_v18 = vrot.slane %v7915_v11, 1  ;;  %5239 = vmatprep.subr.bf16.mxu0 %v6097_v2 }
 0x231   : > { %v1834_v23 = vsel %vm10551_vm10, %v10562_v35, %v10561_v49  ;;  %v10566_v50 = vsel %vm8585_vm7, 4294967295, %v10565_v50  ;;  %v10567_v21 = vmov %v10562_v35  ;;  %v1806_v49 = vrot.slane %v8305_v15, 1  ;;  %v10570_v35 = vld [vmem:[#allocation122_spill] sm:$0xff]  ;;  %vm10577_vm12 = vmmov %vm10551_vm10 }
 0x232   : > { %v1835_v53 = vsel %vm10569_vm15, %v10568_v18, %v10567_v21  ;;  %4478 = vmatprep.mubr.msk.bf16.mxu1 %vm8585_vm7, %v10570_v35  ;;  %v10573_v43 = vrot.slane %v10572_v34, 1  ;;  %v10574_v37 = vrot.slane %v8033_v26, 1  ;;  %v10576_v21 = vrot.slane %v8006_v45, 1  ;;  %vm10580_vm15 = vmmov %vm10551_vm10  ;;  %v6099_v45 = vld [vmem:[%s10265_s21 + $0x90] sm:$0xff]  }
 0x233   : > { %v8613_v7 = vpack.c.bf16 %v1834_v23, %v1835_v53  ;;  %v1807_v18 = vrot.slane %v8334_v63, 1  ;;  %vm10578_vm1 = vcmp.lt.s32.totalorder %v7717_v24, 1  ;;  %v10579_v53 = vrot.slane %v8559_v12, 1  ;;  %5240 = vmatpush3.bf16.msra.mxu0 %v6099_v45 }
 0x234   : > { %v1832_v11 = vsel %vm10551_vm10, %v10574_v37, %v10573_v43  ;;  %v10575_v55 = vmov %v10574_v37  ;;  %v1492_v23 = vsel %vm10578_vm1, %v1483_v60, %v1484_v56  ;;  %v10581_v26 = vrot.slane %v8109_v32, 1  ;;  %vm10588_vm1 = vmmov %vm10551_vm10 }
 0x235   : > { %v1833_v15 = vsel %vm10577_vm12, %v10576_v21, %v10575_v55  ;;  %v1817_v47 = vsel %vm10580_vm15, %v1810_v48, %v10579_v53  ;;  %v10582_v43 = vrot.slane %v8027_v42, 1  ;;  %v10584_v37 = vrot.slane %v10572_v34, 1  ;;  %vm10585_vm12 = vmmov %vm10551_vm10  ;;  %v1303_v34 = vpop.permute.xlu1 %1302  ;;  %v6121_v42 = vld [vmem:[%s10265_s21 + $0x1c8] sm:$0xff]  }
 0x236   : > { %v8634_v30 = vpack.c.bf16 %v1832_v11, %v1833_v15  ;;  %v10586_v0 = vrot.slane %v8105_v36, 1  ;;  %v10587_v11 = vrot.slane %v8139_v61, 1  ;;  %v10590_v15 = vmov %v10581_v26  ;;  %vm10591_vm15 = vmmov %vm10588_vm1 }
 0x237   : > { %v1830_v63 = vsel %vm10551_vm10, %v10582_v43, %v10581_v26  ;;  %v10583_v60 = vmov %v10582_v43  ;;  %vm10592_vm10 = vcmp.ne.s32.totalorder %v10505_v57, 1  ;;  %vm10593_vm0 = vcmp.ne.s32.totalorder %v10506_v10, 1  ;;  %v6103_v26 = vld [vmem:[%s10265_s21 + $0xd8] sm:$0xff]  }
 0x238   : > { %v1831_v48 = vsel %vm10585_vm12, %v10584_v37, %v10583_v60  ;;  %v1828_v55 = vsel %vm10588_vm1, %v10587_v11, %v10586_v0  ;;  %v10589_v21 = vmov %v10587_v11  ;;  %vm8667_vm7 = vmpackc.low %vm10593_vm0, %vm10592_vm10  ;;  %v10596_v43 = vrot.slane %v8207_v44, 1  ;;  %v8698_v11 = vpop.permute.xlu0 %1981  ;;  %5241 = vmatprep.subr.bf16.mxu0 %v6103_v26 }
 0x239   : > { %v1829_v53 = vsel %vm10591_vm15, %v10590_v15, %v10589_v21  ;;  %v8674_v61 = vpack.c.bf16 %v1830_v63, %v1831_v48  ;;  %v10597_v57 = vrot.slane %v8133_v31, 1  ;;  %vm10598_vm12 = vmmov %vm10588_vm1  ;;  %v10600_v37 = vmov %v10586_v0  ;;  %v10602_v0 = vld [vmem:[#allocation47_spill] sm:$0xff]  ;;  %v10604_v63 = vld [vmem:[#allocation49_spill] sm:$0xff] }
 0x23a   : > { %v8676_v32 = vpack.c.bf16 %v1828_v55, %v1829_v53  ;;  %vm10601_vm0 = vmmov %vm10588_vm1  ;;  %vm10603_vm1 = vcmp.eq.s32.totalorder %v10602_v0, 1  ;;  %vm10605_vm15 = vcmp.eq.s32.totalorder %v10604_v63, 1  ;;  %v10606_v48 = vmov 0  ;;  %v10626_v63 = vld [vmem:[#allocation76_spill] sm:$0xff] }
 0x23b   : > { %v1826_v10 = vsel %vm10598_vm12, %v10597_v57, %v10596_v43  ;;  %v10599_v60 = vmov %v10597_v57  ;;  %vm8694_vm10 = vmpackc.low %vm10605_vm15, %vm10603_vm1  ;;  %vm1341_vm13 = vcmp.eq.s32.totalorder %v1303_v34, 1  ;;  %v10609_v31 = vrot.slane %v8203_v3, 1 }
 0x23c   : > { %v1827_v2 = vsel %vm10601_vm0, %v10600_v37, %v10599_v60  ;;  %v10607_v48 = vsel %vm8694_vm10, 4294967295, %v10606_v48  ;;  %v10610_v36 = vrot.slane %v8237_v17, 1  ;;  %vm10611_vm12 = vmmov %vm10601_vm0  ;;  %v10613_v53 = vmov %v10596_v43  ;;  %v10619_v37 = vld [vmem:[#allocation72_spill] sm:$0xff] }
 0x23d   : > { %10608 = vst [vmem:[#allocation67_spill] sm:$0xff] %v10607_v48  ;;  %v8700_v55 = vpack.c.bf16 %v1826_v10, %v1827_v2  ;;  %v1813_v34 = vrot.slane %v8415_v51, 1  ;;  %v10614_v57 = vmax.f32 %v8355_v39, 0.0  ;;  %vm10615_vm1 = vcmp.eq.s32.totalorder %v7420_v16, 1  ;;  %4387 = vmatmul.mubr.msk.bf16.gmra.mrb[40].mxu0 %vm8667_vm7, %v10619_v37  ;;  %v6120_v48 = vld [vmem:[%s10265_s21 + $0x180] sm:$0xff]  }
 0x23e   : > { %v1824_v21 = vsel %vm10611_vm12, %v10610_v36, %v10609_v31  ;;  %v10612_v15 = vmov %v10610_v36  ;;  %vm8719_vm15 = vmpackc.low %vm10615_vm1, %vm1341_vm13  ;;  %v10616_v60 = vmov 0  ;;  %v10620_v44 = vrot.slane %v8231_v6, 1  ;;  %4390 = vmatprep.mubr.msk.bf16.mxu0 %vm8694_vm10, %v10626_v63  ;;  %v6104_v31 = vld [vmem:[%s10265_s21 + $0x98] sm:$0xff]   ;;  %v6109_v6 = vld [vmem:[%s10265_s21 + $0xe0] sm:$0xff]  }
 0x23f   : > { %v1825_v43 = vsel %vm10601_vm0, %v10613_v53, %v10612_v15  ;;  %v1377_v10 = vsel %vm1341_vm13, %v10614_v57, 0.0  ;;  %v10617_v60 = vsel %vm8719_vm15, 4294967295, %v10616_v60  ;;  %vm10621_vm12 = vmmov %vm10601_vm0  ;;  %vm10622_vm0 = vcmp.ne.s32.totalorder %v10521_v46, 1  ;;  %5242 = vmatpush3.bf16.msra.mxu0 %v6104_v31  ;;  %v6113_v31 = vld [vmem:[%s10265_s21 + $0xe8] sm:$0xff]  }
 0x240   : > { %10618 = vst [vmem:[#allocation44_spill] sm:$0xff] %v10617_v60  ;;  %v8726_v17 = vpack.c.bf16 %v1824_v21, %v1825_v43  ;;  %v1822_v2 = vsel %vm10621_vm12, %v10620_v44, %v1806_v49  ;;  %vm8736_vm9 = vmpackc.low %vm10623_vm2, %vm10622_vm0  ;;  %v10624_v16 = vmov 0  ;;  %v1485_v39 = vrot.slane %v1377_v10, 7  ;;  %5243 = vmatprep.subr.bf16.mxu0 %v6109_v6  ;;  %v10697_v60 = vld [vmem:[#allocation91_spill] sm:$0xff]  ;;  %v10706_v6 = vld [vmem:[#allocation77_spill] sm:$0xff] }
 0x241   : > { %v10625_v16 = vsel %vm8736_vm9, 4294967295, %v10624_v16  ;;  %v1812_v0 = vrot.slane %v1377_v10, 1  ;;  %v10627_v36 = vmov %v10620_v44  ;;  %v10628_v46 = vrot.slane %v8203_v3, 1  ;;  %vm10629_vm2 = vmmov %vm10621_vm12  ;;  %4483 = vmatmul.mubr.msk.bf16.gmra.mrb[24].mxu1 %vm8736_vm9, %v8307_v27  ;;  %v8767_v3 = vpop.permute.xlu1 %1987 }
 0x242   : > { %v10630_v21 = vrot.slane %v8301_v28, 1  ;;  %vm10631_vm13 = vmmov %vm10629_vm2  ;;  %vm10632_vm1 = vcmp.eq.s32.totalorder %v7838_v22, 1  ;;  %vm10633_vm12 = vcmp.eq.s32.totalorder %v7879_v52, 1  ;;  %v10634_v45 = vmov 0 }
 0x243   : > { %v1823_v29 = vsel %vm10629_vm2, %v10628_v46, %v10627_v36  ;;  %vm8760_vm0 = vmpackc.low %vm10633_vm12, %vm10632_vm1  ;;  %v1821_v22 = vsel %vm10629_vm2, %v1806_v49, %v1807_v18  ;;  %v10636_v52 = vrot.slane %v8328_v54, 1  ;;  %v10639_v10 = vrot.slane %v8415_v51, 7  ;;  %v8803_v51 = vpop.permute.xlu0 %1984 }
 0x244   : > { %v1820_v15 = vsel %vm10631_vm13, %v1807_v18, %v10630_v21  ;;  %v10635_v45 = vsel %vm8760_vm0, 4294967295, %v10634_v45  ;;  %v8772_v53 = vpack.c.bf16 %v1822_v2, %v1823_v29  ;;  %v10637_v43 = vmov %v10630_v21  ;;  %vm10638_vm13 = vmmov %vm10629_vm2  ;;  %4486 = vmatprep.mubr.msk.bf16.mxu1 %vm8760_vm0, %v8336_v59  ;;  %v10647_v18 = vld [vmem:[#allocation85_spill] sm:$0xff]  ;;  %v10648_v2 = vld [vmem:[#allocation92_spill] sm:$0xff] }
 0x245   : > { %v1819_v57 = vsel %vm10638_vm13, %v10637_v43, %v10636_v52  ;;  %vm10640_vm1 = vcmp.lt.s32.totalorder %v7717_v24, 1  ;;  %vm10644_vm15 = vmmov %vm10629_vm2  ;;  %v10646_v54 = vrot.slane %v8559_v12, 1  ;;  %vm5060_vm13 = vcmp.ne.s32.totalorder %v10647_v18, 1  ;;  %v6110_v12 = vld [vmem:[%s10265_s21 + $0xa0] sm:$0xff]   ;;  %v1669_v21 = vpop.permute.xlu1 %1668  ;;  %v10663_v52 = vld [vmem:[#allocation94_spill] sm:$0xff] }
 0x246   : > { %v8786_v26 = vsel %vm10640_vm1, %v1485_v39, %v10639_v10  ;;  %vm10642_vm12 = vmmov %vm10640_vm1  ;;  %v8794_v49 = vsel %vm10644_vm15, %v1812_v0, %v1813_v34  ;;  %vm5059_vm1 = vcmp.ne.s32.totalorder %v10648_v2, 1  ;;  %v8818_v36 = vpack.c.bf16 %v1492_v23, %v8510_v19  ;;  %v10656_v23 = vld [vmem:[#allocation50_spill] sm:$0xff]  ;;  %5244 = vmatpush3.bf16.msra.mxu0 %v6110_v12  ;;  %v10669_v18 = vld [vmem:[#allocation100_spill] sm:$0xff] }
 0x247   : > { %10641 = vst [vmem:[#allocation46_spill] sm:$0xff] %v8786_v26  ;;  %v8790_v44 = vsel %vm10642_vm12, %v1484_v56, %v1485_v39  ;;  %10645 = vst [vmem:[#allocation122_spill] sm:$0xff] %v8794_v49  ;;  %v1816_v28 = vsel %vm10629_vm2, %v10646_v54, %v1812_v0  ;;  %v8807_v56 = vpack.c.bf16 %v1820_v15, %v1821_v22  ;;  %v10650_v46 = vrot.slane %v10513_v41, 1  ;;  %v1666_v19 = vpop.permute.xlu0 %1665  ;;  %v10655_v41 = vld [vmem:[#allocation79_spill] sm:$0xff]  ;;  %v6114_v22 = vld [vmem:[%s10265_s21 + $0xa8] sm:$0xff]  }
 0x248   : > { %10643 = vst [vmem:[#allocation66_spill] sm:$0xff] %v8790_v44  ;;  %v8810_v39 = vpack.c.bf16 %v8516_v9, %v1819_v57  ;;  %v8815_v0 = vpack.c.bf16 %v1816_v28, %v1817_v47  ;;  %10649 = vst [vmem:[#allocation98_spill] sm:$0xff] %v8818_v36  ;;  %vm5029_vm12 = vcmp.ne.s32.totalorder %v1669_v21, 1  ;;  %v10653_v24 = vmov 0  ;;  %4395 = vmatmul.mubr.msk.bf16.gmra.mrb[44].mxu0 %vm7513_vm4, %v10655_v41  ;;  %v10660_v15 = vld [vmem:[#allocation75_spill] sm:$0xff]  ;;  %5245 = vmatprep.subr.bf16.mxu0 %v6113_v31  ;;  %v6115_v57 = vld [vmem:[%s10265_s21 + $0xf0] sm:$0xff]  }
 0x249   : > { %vm10651_vm15 = vmmov %vm10629_vm2  ;;  %4398 = vmatprep.mubr.msk.bf16.mxu0 %vm7529_vm11, %v10660_v15  ;;  %v10665_v43 = vmov 0  ;;  %v10667_v10 = vld [vmem:[#allocation130_spill] sm:$0xff]  ;;  %v6117_v28 = vld [vmem:[%s10265_s21 + $0xf8] sm:$0xff]   ;;  %v10691_v26 = vmov 0 }
 0x24a   : > { %v8824_v29 = vsel %vm10651_vm15, %v1813_v34, %v10650_v46  ;;  %vm8837_vm2 = vmpackc.low %vm5059_vm1, %vm5060_vm13  ;;  %vm5030_vm15 = vcmp.ne.s32.totalorder %v1666_v19, 1  ;;  %v10657_v34 = vmov 0  ;;  %vm10662_vm13 = vcmp.eq.s32.totalorder %v7935_v8, 1  ;;  %5246 = vmatpush3.bf16.msra.mxu0 %v6114_v22  ;;  %v6116_v8 = vld [vmem:[%s10265_s21 + $0xb0] sm:$0xff]   ;;  %v10670_v2 = vld [vmem:[#allocation80_spill] sm:$0xff] }
 0x24b   : > { %10652 = vst [vmem:[#allocation47_spill] sm:$0xff] %v8824_v29  ;;  %v10654_v24 = vsel %vm8837_vm2, 4294967295, %v10653_v24  ;;  %vm8844_vm9 = vmpackc.low %vm5029_vm12, %vm5030_vm15  ;;  %vm10664_vm1 = vcmp.eq.s32.totalorder %v10663_v52, 1  ;;  %4491 = vmatmul.mubr.msk.bf16.gmra.mrb[28].mxu1 %vm8837_vm2, %v8379_v33  ;;  %v10668_v54 = vld [vmem:[#allocation106_spill] sm:$0xff]  ;;  %5247 = vmatprep.subr.bf16.mxu0 %v6115_v57  ;;  %vm5062_vm15 = vcmp.ne.s32.totalorder %v10669_v18, 1  ;;  %v10671_v12 = vld [vmem:[#allocation52_spill] sm:$0xff] }
 0x24c   : > { %v10658_v34 = vsel %vm8844_vm9, 4294967295, %v10657_v34  ;;  %vm8858_vm0 = vmpackc.low %vm10664_vm1, %vm10662_vm13  ;;  %vm5061_vm12 = vcmp.ne.s32.totalorder %v10668_v54, 1  ;;  %v10672_v46 = vmov 0  ;;  %v10675_v21 = vld [vmem:[#allocation84_spill] sm:$0xff]  ;;  %v10676_v31 = vld [vmem:[#allocation53_spill] sm:$0xff]  ;;  %vm10683_vm1 = vnez %v10543_v25 }
 0x24d   : > { %10659 = vst [vmem:[#allocation49_spill] sm:$0xff] %v10658_v34  ;;  %v10666_v43 = vsel %vm8858_vm0, 4294967295, %v10665_v43  ;;  %4494 = vmatprep.mubr.msk.bf16.mxu1 %vm8858_vm0, %v10667_v10  ;;  %vm8882_vm13 = vmpackc.low %vm5061_vm12, %vm5062_vm15  ;;  %v6118_v19 = vld [vmem:[%s10265_s21 + $0xb8] sm:$0xff]   ;;  %v6119_v22 = vld [vmem:[%s10265_s21 + $0x1c0] sm:$0xff]  }
 0x24e   : > { %v10673_v46 = vsel %vm8882_vm13, 4294967295, %v10672_v46  ;;  %5248 = vmatpush3.bf16.msra.mxu0 %v6116_v8  ;;  %v10677_v52 = vld [vmem:[#allocation87_spill] sm:$0xff]  ;;  %v10679_v8 = vld [vmem:[#allocation88_spill] sm:$0xff]  ;;  %v10680_v54 = vld [vmem:[#allocation54_spill] sm:$0xff] }
 0x24f   : > { %10674 = vst [vmem:[#allocation72_spill] sm:$0xff] %v10673_v46  ;;  %5249 = vmatprep.subr.bf16.mxu0 %v6117_v28  ;;  %v6130_v18 = vld [vmem:[%s10265_s21 + $0x208] sm:$0xff]   ;;  %v10681_v9 = vld [vmem:[#allocation83_spill] sm:$0xff]  ;;  %v10684_v47 = vld [vmem:[#allocation96_spill] sm:$0xff] }
 0x250   : > { %4403 = vmatmul.mubr.msk.bf16.gmra.mrb[48].mxu0 %vm7539_vm14, %v10670_v2  ;;  %v10682_v28 = vld [vmem:[#allocation55_spill] sm:$0xff]  ;;  %v10685_v34 = vld [vmem:[#allocation62_spill] sm:$0xff]  ;;  %v6136_v29 = vld [vmem:[%s10265_s21 + $0x228] sm:$0xff]  }
 0x251   : > { %4406 = vmatprep.mubr.msk.bf16.mxu0 %vm7555_vm3, %v10675_v21  ;;  %vm10686_vm12 = vnez %v10685_v34  ;;  %v10689_v44 = vld [vmem:[#allocation58_spill] sm:$0xff]  ;;  %v10694_v25 = vld [vmem:[#allocation99_spill] sm:$0xff]  ;;  %v10710_v36 = vld [vmem:[#allocation60_spill] sm:$0xff] }
 0x252   : > { %5250 = vmatpush3.bf16.msra.mxu0 %v6118_v19  ;;  %v6133_v19 = vld [vmem:[%s10265_s21 + $0x210] sm:$0xff]   ;;  %vm10690_vm9 = vcmp.eq.s32.totalorder %v10689_v44, 1  ;;  %v10698_v44 = vld [vmem:[#allocation48_spill] sm:$0xff]  ;;  %v10701_v49 = vld [vmem:[#allocation59_spill] sm:$0xff]  ;;  %vm10711_vm2 = vnez %v10710_v36 }
 0x253   : > { %4499 = vmatmul.mubr.msk.bf16.gmra.mrb[32].mxu1 %vm8882_vm13, %v8391_v62  ;;  %5459 = vmatprep.subr.bf16.mxu0 %v6119_v22  ;;  %v10687_v22 = vld [vmem:[#allocation56_spill] sm:$0xff]  ;;  %v6140_v46 = vld [vmem:[%s10265_s21 + $0x238] sm:$0xff]   ;;  %v6131_v57 = vld [vmem:[%s10265_s21 + $0x1e8] sm:$0xff]  }
 0x254   : > { %4664 = vmatprep.mubr.msk.bf16.mxu1 %vm7677_vm8, %v10677_v52  ;;  %vm10688_vm15 = vcmp.eq.s32.totalorder %v10687_v22, 1  ;;  %v6135_v22 = vld [vmem:[%s10265_s21 + $0x220] sm:$0xff]   ;;  %v6125_v36 = vld [vmem:[%s10265_s21 + $0x1d8] sm:$0xff]  }
 0x255   : > { %vm8924_vm13 = vmpackc.low %vm10690_vm9, %vm10688_vm15  ;;  %vm10702_vm15 = vnez %v10701_v49  ;;  %v10804_v34 = vld [vmem:[#allocation64_spill] sm:$0xff] }
 0x256   : > { %v10692_v26 = vsel %vm8924_vm13, 4294967295, %v10691_v26 }
 0x257   : > { %10693 = vst [vmem:[#allocation85_spill] sm:$0xff] %v10692_v26 }
 0x258   : > { %4411 = vmatmul.mubr.msk.bf16.gmra.mrb[52].mxu0 %vm7565_vm6, %v10679_v8 }
 0x259   : > { %4414 = vmatprep.mubr.msk.bf16.mxu0 %vm7581_vm5, %v10681_v9 }
 0x25b   : > { %4667 = vmatmul.mubr.msk.bf16.vlgmr.msra.gmra.mrb[36].mxu1 %vm10683_vm1, %v10557_v40  ;;  %v10695_v40 = vld [vmem:[#allocation57_spill] sm:$0xff] }
 0x25c   : > { %4672 = vmatprep.mubr.msk.bf16.mxu1 %vm10686_vm12, %v10684_v47  ;;  %5696 = vmatpush3.bf16.msra.mxu1 %v8450_v20  ;;  %vm10696_vm1 = vnez %v10695_v40  ;;  %v6134_v20 = vld [vmem:[%s10265_s21 + $0x218] sm:$0xff]  }
 0x25d   : > { %5697 = vmatprep.subr.bf16.mxu1 %v6130_v18 }
 0x260   : > { %5698 = vmatpush3.bf16.msra.mxu1 %v6130_v18  ;;  %4419 = vmatmul.mubr.msk.bf16.gmra.mrb[56].mxu0 %vm10696_vm1, %v10694_v25  ;;  %v10699_v18 = vld [vmem:[#allocation63_spill] sm:$0xff] }
 0x261   : > { %5699 = vmatprep.subr.bf16.mxu1 %v6133_v19  ;;  %4422 = vmatprep.mubr.msk.bf16.mxu0 %vm8924_vm13, %v10697_v60  ;;  %vm10700_vm9 = vnez %v10699_v18 }
 0x263   : > { %4675 = vmatmul.mubr.msk.bf16.gmra.mrb[40].mxu1 %vm8694_vm10, %v10626_v63 }
 0x264   : > { %4680 = vmatprep.mubr.msk.bf16.mxu1 %vm10700_vm9, %v10698_v44  ;;  %5700 = vmatpush3.bf16.msra.mxu1 %v6133_v19  ;;  %v10703_v19 = vld [vmem:[#allocation65_spill] sm:$0xff] }
 0x265   : > { %5701 = vmatprep.subr.bf16.mxu1 %v6134_v20  ;;  %vm10704_vm10 = vnez %v10703_v19 }
 0x268   : > { %5702 = vmatpush3.bf16.msra.mxu1 %v6134_v20  ;;  %4427 = vmatmul.mubr.msk.bf16.gmra.mrb[60].mxu0 %vm10702_vm15, %v8487_v14  ;;  %v6139_v20 = vld [vmem:[%s10265_s21 + $0x230] sm:$0xff]  }
 0x269   : > { %5703 = vmatprep.subr.bf16.mxu1 %v6135_v22  ;;  %4504 = vmatprep.mubr.msk.bf16.mxu0 %vm8667_vm7, %v10619_v37  ;;  %v10705_v37 = vld [vmem:[#allocation70_spill] sm:$0xff] }
 0x26a   : > { %vm5072_vm7 = vcmp.ne.s32.totalorder %v10705_v37, 1 }
 0x26b   : > { %4683 = vmatmul.mubr.msk.bf16.gmra.mrb[44].mxu1 %vm7529_vm11, %v10660_v15  ;;  %vm5071_vm11 = vcmp.ne.s32.totalorder %v10706_v6, 1  ;;  %v10707_v15 = vld [vmem:[#allocation68_spill] sm:$0xff] }
 0x26c   : > { %4688 = vmatprep.mubr.msk.bf16.mxu1 %vm10704_vm10, %v8520_v5  ;;  %5704 = vmatpush3.bf16.msra.mxu1 %v6135_v22  ;;  %v10708_v22 = vld [vmem:[#allocation69_spill] sm:$0xff]  ;;  %vm8986_vm0 = vmpackc.low %vm5071_vm11, %vm5072_vm7 }
 0x26d   : > { %5705 = vmatprep.subr.bf16.mxu1 %v6136_v29  ;;  %v10709_v63 = vpack.c.bf16 %v10707_v15, %v10708_v22  ;;  %v10714_v15 = vld [vmem:[#allocation81_spill] sm:$0xff]  ;;  %v10718_v22 = vld [vmem:[#allocation103_spill] sm:$0xff] }
 0x26e   : > { %vm5074_vm11 = vcmp.ne.s32.totalorder %v10714_v15, 1  ;;  %v6138_v15 = vld [vmem:[%s10265_s21 + $0x1b0] sm:$0xff]  }
 0x270   : > { %5706 = vmatpush3.bf16.msra.mxu1 %v6136_v29  ;;  %4509 = vmatmul.mubr.msk.bf16.vlgmr.msra.gmra.mrb[64].mxu0 %vm10711_vm2, %v10709_v63  ;;  %v6122_v29 = vld [vmem:[%s10265_s21 + $0x188] sm:$0xff]   ;;  %v6124_v63 = vld [vmem:[%s10265_s21 + $0x190] sm:$0xff]  }
 0x271   : > { %5707 = vmatprep.subr.bf16.mxu1 %v6139_v20  ;;  %5460 = vmatpush3.bf16.msra.mxu0 %v6120_v48  ;;  %v6123_v48 = vld [vmem:[%s10265_s21 + $0x1d0] sm:$0xff]  }
 0x272   : > { %4514 = vmatprep.mubr.msk.bf16.mxu0 %vm7513_vm4, %v10655_v41  ;;  %5461 = vmatprep.subr.bf16.mxu0 %v6121_v42  ;;  %v10715_v42 = vld [vmem:[#allocation86_spill] sm:$0xff] }
 0x273   : > { %4691 = vmatmul.mubr.msk.bf16.gmra.mrb[48].mxu1 %vm7555_vm3, %v10675_v21  ;;  %vm5073_vm2 = vcmp.ne.s32.totalorder %v10715_v42, 1  ;;  %v6141_v42 = vld [vmem:[%s10265_s21 + $0x1f8] sm:$0xff]  }
 0x274   : > { %4696 = vmatprep.mubr.msk.bf16.mxu1 %vm8986_vm0, %v8567_v1  ;;  %5708 = vmatpush3.bf16.msra.mxu1 %v6139_v20  ;;  %v6126_v20 = vld [vmem:[%s10265_s21 + $0x198] sm:$0xff]   ;;  %vm9016_vm7 = vmpackc.low %vm5073_vm2, %vm5074_vm11 }
 0x275   : > { %5709 = vmatprep.subr.bf16.mxu1 %v6140_v46  ;;  %5462 = vmatpush3.bf16.msra.mxu0 %v6122_v29  ;;  %v10719_v29 = vld [vmem:[#allocation93_spill] sm:$0xff] }
 0x276   : > { %5463 = vmatprep.subr.bf16.mxu0 %v6123_v48  ;;  %vm5076_vm11 = vcmp.ne.s32.totalorder %v10719_v29, 1  ;;  %v6132_v48 = vld [vmem:[%s10265_s21 + $0x1a8] sm:$0xff]  }
 0x277   : > { %v10727_v29 = vld [vmem:[#allocation89_spill] sm:$0xff] }
 0x278   : > { %5710 = vmatpush3.bf16.msra.mxu1 %v6140_v46  ;;  %4519 = vmatmul.mubr.msk.bf16.gmra.mrb[68].mxu0 %vm7677_vm8, %v10677_v52  ;;  %v6127_v46 = vld [vmem:[%s10265_s21 + $0x1e0] sm:$0xff]   ;;  %vm5075_vm8 = vcmp.ne.s32.totalorder %v10718_v22, 1  ;;  %v10726_v22 = vld [vmem:[#allocation90_spill] sm:$0xff] }
 0x279   : > { %4524 = vmatprep.mubr.msk.bf16.mxu0 %vm7539_vm14, %v10670_v2  ;;  %5464 = vmatpush3.bf16.msra.mxu0 %v6124_v63  ;;  %v6128_v52 = vld [vmem:[%s10265_s21 + $0x1a0] sm:$0xff]   ;;  %vm9046_vm2 = vmpackc.low %vm5075_vm8, %vm5076_vm11  ;;  %v10720_v63 = vmov 0 }
 0x27a   : > { %5465 = vmatprep.subr.bf16.mxu0 %v6125_v36  ;;  %v10721_v63 = vsel %vm9046_vm2, 4294967295, %v10720_v63  ;;  %v6137_v36 = vld [vmem:[%s10265_s21 + $0x1f0] sm:$0xff]  }
 0x27b   : > { %4699 = vmatmul.mubr.msk.bf16.gmra.mrb[52].mxu1 %vm7581_vm5, %v10681_v9  ;;  %vm10728_vm5 = vnez %v10727_v29  ;;  %v10741_v29 = vmov 0 }
 0x27c   : > { %4704 = vmatprep.mubr.msk.bf16.mxu1 %vm9016_vm7, %v8599_v38 }
 0x27d   : > { %5466 = vmatpush3.bf16.msra.mxu0 %v6126_v20  ;;  %v10722_v20 = vld [vmem:[#allocation114_spill] sm:$0xff] }
 0x27e   : > { %5467 = vmatprep.subr.bf16.mxu0 %v6127_v46  ;;  %vm5077_vm8 = vcmp.ne.s32.totalorder %v10722_v20, 1  ;;  %v10723_v46 = vld [vmem:[#allocation105_spill] sm:$0xff]  ;;  %v10734_v20 = vld [vmem:[#allocation104_spill] sm:$0xff] }
 0x27f   : > { %vm5078_vm11 = vcmp.ne.s32.totalorder %v10723_v46, 1  ;;  %v10736_v46 = vld [vmem:[#allocation124_spill] sm:$0xff] }
 0x280   : > { %4529 = vmatmul.mubr.msk.bf16.gmra.mrb[72].mxu0 %vm10686_vm12, %v10684_v47 }
 0x281   : > { %4534 = vmatprep.mubr.msk.bf16.mxu0 %vm7565_vm6, %v10679_v8  ;;  %5468 = vmatpush3.bf16.msra.mxu0 %v6128_v52  ;;  %v6142_v52 = vld [vmem:[%s10265_s21 + $0x1b8] sm:$0xff]   ;;  %vm5081_vm6 = vcmp.ne.s32.totalorder %v10736_v46, 1  ;;  %v10746_v46 = vld [vmem:[#allocation126_spill] sm:$0xff] }
 0x282   : > { %5469 = vmatprep.subr.bf16.mxu0 %v6131_v57  ;;  %v10724_v57 = vmov 0  ;;  %vm5083_vm3 = vcmp.ne.s32.totalorder %v10746_v46, 1  ;;  %v10756_v46 = vld [vmem:[#allocation131_spill] sm:$0xff] }
 0x283   : > { %4707 = vmatmul.mubr.msk.bf16.gmra.mrb[56].mxu1 %vm8924_vm13, %v10697_v60  ;;  %vm9076_vm13 = vmpackc.low %vm5077_vm8, %vm5078_vm11  ;;  %vm5085_vm14 = vcmp.ne.s32.totalorder %v10756_v46, 1  ;;  %v10766_v46 = vld [vmem:[#allocation133_spill] sm:$0xff] }
 0x284   : > { %4712 = vmatprep.mubr.msk.bf16.mxu1 %vm9046_vm2, %v8613_v7  ;;  %v10725_v57 = vsel %vm9076_vm13, 4294967295, %v10724_v57  ;;  %vm5087_vm4 = vcmp.ne.s32.totalorder %v10766_v46, 1  ;;  %v10776_v46 = vld [vmem:[#allocation45_spill] sm:$0xff] }
 0x285   : > { %5470 = vmatpush3.bf16.msra.mxu0 %v6132_v48  ;;  %v10729_v48 = vld [vmem:[#allocation116_spill] sm:$0xff] }
 0x286   : > { %5471 = vmatprep.subr.bf16.mxu0 %v6137_v36  ;;  %v10730_v36 = vld [vmem:[#allocation111_spill] sm:$0xff] }
 0x287   : > { %vm5080_vm8 = vcmp.ne.s32.totalorder %v10730_v36, 1  ;;  %v10739_v36 = vld [vmem:[#allocation97_spill] sm:$0xff] }
 0x288   : > { %4539 = vmatmul.mubr.msk.bf16.gmra.mrb[76].mxu0 %vm10700_vm9, %v10698_v44 }
 0x289   : > { %4544 = vmatprep.mubr.msk.bf16.mxu0 %vm10696_vm1, %v10694_v25  ;;  %5472 = vmatpush3.bf16.msra.mxu0 %v6138_v15  ;;  %vm5079_vm1 = vcmp.ne.s32.totalorder %v10729_v48, 1  ;;  %v10731_v15 = vmov 0  ;;  %v10738_v48 = vld [vmem:[#allocation95_spill] sm:$0xff] }
 0x28a   : > { %5473 = vmatprep.subr.bf16.mxu0 %v6141_v42  ;;  %vm9094_vm11 = vmpackc.low %vm5079_vm1, %vm5080_vm8  ;;  %v10733_v42 = vld [vmem:[#allocation102_spill] sm:$0xff]  ;;  %vm10740_vm1 = vnez %v10739_v36  ;;  %v10748_v36 = vld [vmem:[#allocation107_spill] sm:$0xff] }
 0x28b   : > { %4715 = vmatmul.mubr.msk.bf16.gmra.mrb[60].mxu1 %vm10728_vm5, %v10726_v22  ;;  %v10732_v15 = vsel %vm9094_vm11, 4294967295, %v10731_v15  ;;  %vm10735_vm5 = vnez %v10734_v20  ;;  %v10743_v20 = vld [vmem:[#allocation101_spill] sm:$0xff] }
 0x28c   : > { %4720 = vmatprep.mubr.msk.bf16.mxu1 %vm9076_vm13, %v8634_v30 }
 0x28d   : > { %5474 = vmatpush3.bf16.msra.mxu0 %v6142_v52  ;;  %v10737_v52 = vld [vmem:[#allocation115_spill] sm:$0xff] }
 0x290   : > { %4549 = vmatmul.mubr.msk.bf16.gmra.mrb[80].mxu0 %vm10704_vm10, %v8520_v5 }
 0x291   : > { %4554 = vmatprep.mubr.msk.bf16.mxu0 %vm10702_vm15, %v8487_v14  ;;  %vm5082_vm15 = vcmp.ne.s32.totalorder %v10737_v52, 1  ;;  %v10747_v52 = vld [vmem:[#allocation121_spill] sm:$0xff]  ;;  %v1994_v14 = vpop.permute.xlu1 %1993 }
 0x292   : > { %vm9112_vm8 = vmpackc.low %vm5081_vm6, %vm5082_vm15 }
 0x293   : > { %4723 = vmatmul.mubr.msk.bf16.gmra.mrb[64].mxu1 %vm10735_vm5, %v10733_v42  ;;  %v10742_v29 = vsel %vm9112_vm8, 4294967295, %v10741_v29  ;;  %v10744_v42 = vld [vmem:[#allocation110_spill] sm:$0xff] }
 0x294   : > { %4728 = vmatprep.mubr.msk.bf16.mxu1 %vm9094_vm11, %v8674_v61  ;;  %vm10745_vm5 = vnez %v10744_v42  ;;  %v10753_v42 = vld [vmem:[#allocation113_spill] sm:$0xff] }
 0x298   : > { %4559 = vmatmul.mubr.msk.bf16.gmra.mrb[84].mxu0 %vm8986_vm0, %v8567_v1 }
 0x299   : > { %4564 = vmatprep.mubr.msk.bf16.mxu0 %vm10740_vm1, %v10738_v48  ;;  %vm5084_vm1 = vcmp.ne.s32.totalorder %v10747_v52, 1  ;;  %v10749_v48 = vld [vmem:[#allocation108_spill] sm:$0xff]  ;;  %v10757_v52 = vld [vmem:[#allocation125_spill] sm:$0xff] }
 0x29a   : > { %vm10750_vm6 = vnez %v10749_v48  ;;  %vm9130_vm15 = vmpackc.low %vm5083_vm3, %vm5084_vm1  ;;  %v10758_v48 = vld [vmem:[#allocation109_spill] sm:$0xff] }
 0x29b   : > { %4731 = vmatmul.mubr.msk.bf16.gmra.mrb[68].mxu1 %vm10745_vm5, %v10743_v20  ;;  %v10754_v20 = vld [vmem:[#allocation120_spill] sm:$0xff] }
 0x29c   : > { %4736 = vmatprep.mubr.msk.bf16.mxu1 %vm9112_vm8, %v8676_v32  ;;  %vm10755_vm5 = vnez %v10754_v20  ;;  %v10763_v20 = vld [vmem:[#allocation112_spill] sm:$0xff] }
 0x2a0   : > { %4569 = vmatmul.mubr.msk.bf16.gmra.mrb[88].mxu0 %vm9016_vm7, %v8599_v38 }
 0x2a1   : > { %4574 = vmatprep.mubr.msk.bf16.mxu0 %vm10750_vm6, %v10748_v36  ;;  %vm5086_vm6 = vcmp.ne.s32.totalorder %v10757_v52, 1  ;;  %v10759_v36 = vld [vmem:[#allocation118_spill] sm:$0xff]  ;;  %v10767_v52 = vld [vmem:[#allocation129_spill] sm:$0xff] }
 0x2a2   : > { %vm10760_vm3 = vnez %v10759_v36  ;;  %vm9148_vm1 = vmpackc.low %vm5085_vm14, %vm5086_vm6  ;;  %v10768_v36 = vld [vmem:[#allocation117_spill] sm:$0xff] }
 0x2a3   : > { %4739 = vmatmul.mubr.msk.bf16.gmra.mrb[72].mxu1 %vm10755_vm5, %v10753_v42  ;;  %v10764_v42 = vld [vmem:[#allocation128_spill] sm:$0xff] }
 0x2a4   : > { %4744 = vmatprep.mubr.msk.bf16.mxu1 %vm9130_vm15, %v8700_v55  ;;  %vm10765_vm5 = vnez %v10764_v42  ;;  %v10773_v42 = vld [vmem:[#allocation123_spill] sm:$0xff] }
 0x2a8   : > { %4579 = vmatmul.mubr.msk.bf16.gmra.mrb[92].mxu0 %vm9046_vm2, %v8613_v7  ;;  %vm5096_vm2 = vcmp.ne.s32.totalorder %v8803_v51, 1  ;;  %v10796_v51 = vmov 0 }
 0x2a9   : > { %4584 = vmatprep.mubr.msk.bf16.mxu0 %vm10760_vm3, %v10758_v48  ;;  %vm5088_vm3 = vcmp.ne.s32.totalorder %v10767_v52, 1  ;;  %v10769_v48 = vld [vmem:[#allocation127_spill] sm:$0xff]  ;;  %v10777_v52 = vld [vmem:[#allocation132_spill] sm:$0xff] }
 0x2aa   : > { %vm10770_vm14 = vnez %v10769_v48  ;;  %vm9166_vm6 = vmpackc.low %vm5087_vm4, %vm5088_vm3  ;;  %v10778_v48 = vld [vmem:[#allocation119_spill] sm:$0xff] }
 0x2ab   : > { %4747 = vmatmul.mubr.msk.bf16.gmra.mrb[76].mxu1 %vm10765_vm5, %v10763_v20  ;;  %v10774_v20 = vld [vmem:[#allocation74_spill] sm:$0xff] }
 0x2ac   : > { %4752 = vmatprep.mubr.msk.bf16.mxu1 %vm9148_vm1, %v8726_v17  ;;  %vm10775_vm5 = vnez %v10774_v20 }
 0x2b0   : > { %4589 = vmatmul.mubr.msk.bf16.gmra.mrb[96].mxu0 %vm9076_vm13, %v8634_v30  ;;  %vm5089_vm13 = vcmp.ne.s32.totalorder %v10776_v46, 1 }
 0x2b1   : > { %4594 = vmatprep.mubr.msk.bf16.mxu0 %vm10770_vm14, %v10768_v36  ;;  %vm5090_vm14 = vcmp.ne.s32.totalorder %v10777_v52, 1  ;;  %v10779_v36 = vld [vmem:[#allocation134_spill] sm:$0xff]  ;;  %v10800_v52 = vld [vmem:[#allocation71_spill] sm:$0xff] }
 0x2b2   : > { %vm10780_vm4 = vnez %v10779_v36  ;;  %vm9184_vm3 = vmpackc.low %vm5089_vm13, %vm5090_vm14  ;;  %vm10784_vm13 = vnez %v10555_v58 }
 0x2b3   : > { %4755 = vmatmul.mubr.msk.bf16.gmra.mrb[80].mxu1 %vm10775_vm5, %v10773_v42  ;;  %vm10783_vm5 = vnez %v10566_v50 }
 0x2b4   : > { %4760 = vmatprep.mubr.msk.bf16.mxu1 %vm9166_vm6, %v8772_v53 }
 0x2b8   : > { %4599 = vmatmul.mubr.msk.bf16.gmra.mrb[100].mxu0 %vm9094_vm11, %v8674_v61  ;;  %vm5093_vm11 = vcmp.ne.s32.totalorder %v8698_v11, 1  ;;  %v10792_v11 = vld [vmem:[#allocation136_spill] sm:$0xff] }
 0x2b9   : > { %4604 = vmatprep.mubr.msk.bf16.mxu0 %vm10780_vm4, %v10778_v48  ;;  %vm5094_vm4 = vcmp.ne.s32.totalorder %v8594_v4, 1  ;;  %v10830_v4 = vld [vmem:[#allocation90_spill] sm:$0xff] }
 0x2ba   : > { %vm9202_vm14 = vmpackc.low %vm5093_vm11, %vm5094_vm4  ;;  %vm10788_vm11 = vnez %v10625_v16 }
 0x2bb   : > { %4763 = vmatmul.mubr.msk.bf16.gmra.mrb[84].mxu1 %vm10783_vm5, %v10570_v35  ;;  %vm10787_vm5 = vnez %v10635_v45 }
 0x2bc   : > { %4768 = vmatprep.mubr.msk.bf16.mxu1 %vm9184_vm3, %v8807_v56 }
 0x2c0   : > { %4609 = vmatmul.mubr.msk.bf16.gmra.mrb[104].mxu0 %vm9112_vm8, %v8676_v32  ;;  %vm5095_vm8 = vcmp.ne.s32.totalorder %v8767_v3, 1  ;;  %v10794_v3 = vld [vmem:[#allocation73_spill] sm:$0xff] }
 0x2c1   : > { %4614 = vmatprep.mubr.msk.bf16.mxu0 %vm10784_vm13, %v8283_v13  ;;  %vm9220_vm4 = vmpackc.low %vm5095_vm8, %vm5096_vm2  ;;  %vm10793_vm13 = vcmp.eq.s32.totalorder %v10792_v11, 1  ;;  %vm10799_vm8 = vnez %v10654_v24  ;;  %v10801_v11 = vld [vmem:[#allocation72_spill] sm:$0xff] }
 0x2c3   : > { %4771 = vmatmul.mubr.msk.bf16.gmra.mrb[88].mxu1 %vm10787_vm5, %v8336_v59  ;;  %vm10791_vm5 = vnez %v10666_v43 }
 0x2c4   : > { %4776 = vmatprep.mubr.msk.bf16.mxu1 %vm9202_vm14, %v8810_v39 }
 0x2c8   : > { %4619 = vmatmul.mubr.msk.bf16.gmra.mrb[108].mxu0 %vm9130_vm15, %v8700_v55 }
 0x2c9   : > { %4624 = vmatprep.mubr.msk.bf16.mxu0 %vm10788_vm11, %v8307_v27  ;;  %vm10795_vm11 = vcmp.eq.s32.totalorder %v10794_v3, 1  ;;  %v10803_v3 = vld [vmem:[#allocation78_spill] sm:$0xff] }
 0x2ca   : > { %vm9237_vm2 = vmpackc.low %vm10795_vm11, %vm10793_vm13  ;;  %vm10802_vm13 = vnez %v10801_v11  ;;  %vm5091_vm11 = vcmp.ne.s32.totalorder %v10803_v3, 1 }
 0x2cb   : > { %4779 = vmatmul.mubr.msk.bf16.gmra.mrb[92].mxu1 %vm10791_vm5, %v10667_v10  ;;  %v10797_v51 = vsel %vm9237_vm2, 4294967295, %v10796_v51 }
 0x2cc   : > { %4784 = vmatprep.mubr.msk.bf16.mxu1 %vm9220_vm4, %v8815_v0  ;;  %10798 = vst [vmem:[#allocation92_spill] sm:$0xff] %v10797_v51  ;;  %v10808_v51 = vld [vmem:[#allocation98_spill] sm:$0xff] }
 0x2d0   : > { %4629 = vmatmul.mubr.msk.bf16.gmra.mrb[112].mxu0 %vm9148_vm1, %v8726_v17 }
 0x2d1   : > { %4634 = vmatprep.mubr.msk.bf16.mxu0 %vm10799_vm8, %v8379_v33 }
 0x2d3   : > { %4787 = vmatmul.mubr.msk.bf16.gmra.mrb[96].mxu1 %vm9237_vm2, %v10800_v52 }
 0x2d4   : > { %5711 = vmatprep.mubr.msk.bf16.mxu1 %vm10686_vm12, %v10684_v47  ;;  %vm5092_vm12 = vcmp.ne.s32.totalorder %v10804_v34, 1  ;;  %v10805_v47 = vmov 0 }
 0x2d5   : > { %vm9264_vm2 = vmpackc.low %vm5091_vm11, %vm5092_vm12  ;;  %vm10818_vm12 = vnez %v10732_v15 }
 0x2d6   : > { %v10806_v47 = vsel %vm9264_vm2, 4294967295, %v10805_v47 }
 0x2d7   : > { %10807 = vst [vmem:[#allocation79_spill] sm:$0xff] %v10806_v47  ;;  %v10809_v47 = vld [vmem:[#allocation76_spill] sm:$0xff] }
 0x2d8   : > { %4639 = vmatmul.mubr.msk.bf16.gmra.mrb[116].mxu0 %vm9166_vm6, %v8772_v53 }
 0x2d9   : > { %4644 = vmatprep.mubr.msk.bf16.mxu0 %vm10802_vm13, %v8391_v62 }
 0x2db   : > { %5712 = vmatmul.mubr.msk.bf16.vlgmr.msra.gmra.mrb[100].mxu1 %vm10700_vm9, %v10698_v44  ;;  %vm10813_vm9 = vnez %v10725_v57 }
 0x2dc   : > { %5715 = vmatprep.mubr.msk.bf16.mxu1 %vm10704_vm10, %v8520_v5  ;;  %v5181_v5 = vpop.f32.mrb[0].mxu1 }
 0x2dd   : > { %v5182_v44 = vpop.f32.mrb[1].mxu1 }
 0x2de   : > { %v9280_v18 = vadd.f32 %v5182_v44, %v5181_v5  ;;  %v5184_v19 = vpop.f32.mrb[2].mxu1  ;;  %v10816_v44 = vld [vmem:[#allocation51_spill] sm:$0xff] }
 0x2df   : > { %v5185_v3 = vpop.f32.mrb[3].mxu1  ;;  %vm10817_vm11 = vnez %v10816_v44 }
 0x2e0   : > { %4649 = vmatmul.mubr.msk.bf16.gmra.mrb[120].mxu0 %vm9184_vm3, %v8807_v56  ;;  %v9285_v34 = vadd.f32 %v5185_v3, %v5184_v19  ;;  %v10827_v3 = vld [vmem:[#allocation82_spill] sm:$0xff] }
 0x2e1   : > { %4654 = vmatprep.mubr.msk.bf16.mxu0 %vm9264_vm2, %v10808_v51  ;;  %v10810_v51 = vld [vmem:[#allocation67_spill] sm:$0xff] }
 0x2e2   : > { %vm10811_vm10 = vnez %v10810_v51 }
 0x2e3   : > { %5716 = vmatmul.mubr.msk.bf16.gmra.mrb[104].mxu1 %vm8986_vm0, %v8567_v1  ;;  %vm10812_vm0 = vnez %v10721_v63  ;;  %v5187_v1 = vpop.f32.mrb[4].mxu1 }
 0x2e4   : > { %5719 = vmatprep.mubr.msk.bf16.mxu1 %vm9016_vm7, %v8599_v38  ;;  %v5188_v38 = vpop.f32.mrb[5].mxu1  ;;  %vm10814_vm7 = vnez %v10656_v23 }
 0x2e5   : > { %v9296_v6 = vadd.f32 %v5188_v38, %v5187_v1  ;;  %v5190_v37 = vpop.f32.mrb[6].mxu1  ;;  %v10828_v1 = vld [vmem:[#allocation59_spill] sm:$0xff]  ;;  %v10831_v38 = vld [vmem:[#allocation89_spill] sm:$0xff] }
 0x2e6   : > { %v5191_v5 = vpop.f32.mrb[7].mxu1 }
 0x2e7   : > { %v9301_v51 = vadd.f32 %v5191_v5, %v5190_v37  ;;  %v10833_v37 = vld [vmem:[#allocation47_spill] sm:$0xff]  ;;  %v10834_v5 = vld [vmem:[#allocation122_spill] sm:$0xff] }
 0x2e8   : > { %4659 = vmatmul.mubr.msk.bf16.gmra.mrb[124].mxu0 %vm9202_vm14, %v8810_v39 }
 0x2e9   : > { %4790 = vmatprep.mubr.msk.bf16.mxu0 %vm10811_vm10, %v10809_v47  ;;  %v10815_v47 = vld [vmem:[#allocation75_spill] sm:$0xff]  ;;  %vm10819_vm10 = vnez %v10742_v29 }
 0x2eb   : > { %5720 = vmatmul.mubr.msk.bf16.gmra.mrb[108].mxu1 %vm10812_vm0, %v8613_v7  ;;  %vm10820_vm0 = vnez %v10671_v12 }
 0x2ec   : > { %5723 = vmatprep.mubr.msk.bf16.mxu1 %vm10813_vm9, %v8634_v30  ;;  %v5193_v30 = vpop.f32.mrb[8].mxu1  ;;  %vm10821_vm9 = vnez %v10676_v31 }
 0x2ed   : > { %v5194_v7 = vpop.f32.mrb[9].mxu1 }
 0x2ee   : > { %v9312_v63 = vadd.f32 %v5194_v7, %v5193_v30  ;;  %v5196_v23 = vpop.f32.mrb[10].mxu1 }
 0x2f0   : > { %4795 = vmatmul.mubr.msk.bf16.vlgmr.msra.gmra.mrb[128].mxu0 %vm10814_vm7, %v10655_v41  ;;  %v5197_v41 = vpop.f32.mrb[11].mxu1  ;;  %vm10822_vm7 = vnez %v10680_v54 }
 0x2f1   : > { %4798 = vmatprep.mubr.msk.bf16.mxu0 %vm10817_vm11, %v10815_v47  ;;  %v9317_v57 = vadd.f32 %v5197_v41, %v5196_v23  ;;  %vm10823_vm11 = vnez %v10682_v28  ;;  %v10835_v47 = vpack.c.bf16 %v10833_v37, %v10834_v5  ;;  %v10843_v37 = vld [vmem:[#allocation108_spill] sm:$0xff] }
 0x2f3   : > { %5724 = vmatmul.mubr.msk.bf16.gmra.mrb[112].mxu1 %vm10818_vm12, %v8674_v61  ;;  %v5199_v61 = vpop.f32.mrb[12].mxu1  ;;  %vm10832_vm12 = vnez %v10831_v38  ;;  %v10842_v38 = vld [vmem:[#allocation107_spill] sm:$0xff] }
 0x2f4   : > { %5727 = vmatprep.mubr.msk.bf16.mxu1 %vm10819_vm10, %v8676_v32  ;;  %v5200_v32 = vpop.f32.mrb[13].mxu1 }
 0x2f5   : > { %v9328_v29 = vadd.f32 %v5200_v32, %v5199_v61  ;;  %v5202_v12 = vpop.f32.mrb[14].mxu1 }
 0x2f8   : > { %4803 = vmatmul.mubr.msk.bf16.gmra.mrb[132].mxu0 %vm10820_vm0, %v10670_v2  ;;  %v5203_v2 = vpop.f32.mrb[15].mxu1 }
 0x2f9   : > { %4806 = vmatprep.mubr.msk.bf16.mxu0 %vm10821_vm9, %v10675_v21  ;;  %v9333_v31 = vadd.f32 %v5203_v2, %v5202_v12  ;;  %vm10844_vm9 = vnez %v10843_v37 }
 0x2fb   : > { %5728 = vmatmul.mubr.msk.bf16.gmra.mrb[116].mxu1 %vm9130_vm15, %v8700_v55  ;;  %v5205_v55 = vpop.f32.mrb[16].mxu1  ;;  %vm10824_vm15 = vnez %v10695_v40 }
 0x2fc   : > { %5731 = vmatprep.mubr.msk.bf16.mxu1 %vm9148_vm1, %v8726_v17  ;;  %v5206_v17 = vpop.f32.mrb[17].mxu1  ;;  %v5139_v26 = vpop.f32.mrb[36].mxu0 }
 0x2fd   : > { %v9344_v49 = vadd.f32 %v5206_v17, %v5205_v55  ;;  %v5208_v21 = vpop.f32.mrb[18].mxu1 }
 0x300   : > { %4811 = vmatmul.mubr.msk.bf16.gmra.mrb[136].mxu0 %vm10822_vm7, %v10679_v8  ;;  %v5209_v8 = vpop.f32.mrb[19].mxu1 }
 0x301   : > { %4814 = vmatprep.mubr.msk.bf16.mxu0 %vm10823_vm11, %v10681_v9  ;;  %v9349_v54 = vadd.f32 %v5209_v8, %v5208_v21  ;;  %v10825_v9 = vld [vmem:[#allocation85_spill] sm:$0xff]  ;;  %v10836_v21 = vld [vmem:[#allocation95_spill] sm:$0xff] }
 0x302   : > { %vm10826_vm1 = vnez %v10825_v9  ;;  %v10837_v8 = vld [vmem:[#allocation97_spill] sm:$0xff] }
 0x303   : > { %5732 = vmatmul.mubr.msk.bf16.gmra.mrb[120].mxu1 %vm9166_vm6, %v8772_v53  ;;  %v1991_v53 = vpop.permute.xlu0 %1990  ;;  %vm5031_vm6 = vcmp.ne.s32.totalorder %v1994_v14, 1  ;;  %vm10838_vm10 = vnez %v10837_v8  ;;  %v10839_v14 = vld [vmem:[#allocation102_spill] sm:$0xff] }
 0x304   : > { %5735 = vmatprep.mubr.msk.bf16.mxu1 %vm9184_vm3, %v8807_v56  ;;  %v5140_v56 = vpop.f32.mrb[37].mxu0  ;;  %vm5032_vm3 = vcmp.ne.s32.totalorder %v1991_v53, 1  ;;  %v10840_v53 = vld [vmem:[#allocation104_spill] sm:$0xff] }
 0x305   : > { %v9360_v28 = vadd.f32 %v5140_v56, %v5139_v26  ;;  %v5142_v40 = vpop.f32.mrb[38].mxu0  ;;  %vm10841_vm0 = vnez %v10840_v53 }
 0x308   : > { %4819 = vmatmul.mubr.msk.bf16.gmra.mrb[140].mxu0 %vm10824_vm15, %v10694_v25  ;;  %v5211_v25 = vpop.f32.mrb[20].mxu1 }
 0x309   : > { %4822 = vmatprep.mubr.msk.bf16.mxu0 %vm10826_vm1, %v10697_v60  ;;  %v5212_v22 = vpop.f32.mrb[21].mxu1  ;;  %v5143_v60 = vpop.f32.mrb[39].mxu0 }
 0x30a   : > { %v9362_v15 = vadd.f32 %v5212_v22, %v5211_v25  ;;  %v9364_v19 = vadd.f32 %v5143_v60, %v5142_v40 }
 0x30b   : > { %5736 = vmatmul.mubr.msk.bf16.gmra.mrb[124].mxu1 %vm9202_vm14, %v8810_v39  ;;  %v5214_v39 = vpop.f32.mrb[22].mxu1  ;;  %vm10829_vm14 = vnez %v10828_v1 }
 0x30c   : > { %5739 = vmatprep.mubr.msk.bf16.mxu1 %vm9220_vm4, %v8815_v0  ;;  %v5215_v46 = vpop.f32.mrb[23].mxu1  ;;  %vm4993_vm4 = vmpackc.low %vm5031_vm6, %vm5032_vm3  ;;  %vm10861_vm3 = vnez %v10779_v36 }
 0x30d   : > { %v9369_v0 = vadd.f32 %v5215_v46, %v5214_v39 }
 0x310   : > { %4827 = vmatmul.mubr.msk.bf16.gmra.mrb[144].mxu0 %vm10829_vm14, %v10827_v3  ;;  %v5145_v44 = vpop.f32.mrb[40].mxu0  ;;  %vm10862_vm14 = vnez %v10774_v20  ;;  %v6145_v20 = vld [vmem:[#allocation10 + $0x10] sm:$0xff]  }
 0x311   : > { %4830 = vmatprep.mubr.msk.bf16.mxu0 %vm10832_vm12, %v10830_v4  ;;  %v5146_v30 = vpop.f32.mrb[41].mxu0  ;;  %vm10864_vm12 = vnez %v10566_v50 }
 0x312   : > { %v9377_v7 = vadd.f32 %v5146_v30, %v5145_v44  ;;  %v5148_v41 = vpop.f32.mrb[42].mxu0  ;;  %v10846_v44 = vld [vmem:[#allocation110_spill] sm:$0xff] }
 0x313   : > { %5740 = vmatmul.mubr.msk.bf16.gmra.mrb[128].mxu1 %vm4993_vm4, %v10835_v47  ;;  %v5149_v32 = vpop.f32.mrb[43].mxu0  ;;  %v10845_v47 = vld [vmem:[#allocation101_spill] sm:$0xff]  ;;  %vm10847_vm7 = vnez %v10846_v44  ;;  %vm10863_vm4 = vnez %v10555_v58 }
 0x314   : > { %v5217_v23 = vpop.f32.mrb[24].mxu1  ;;  %v9381_v2 = vadd.f32 %v5149_v32, %v5148_v41 }
 0x315   : > { %v5218_v61 = vpop.f32.mrb[25].mxu1 }
 0x316   : > { %v9379_v12 = vadd.f32 %v5218_v61, %v5217_v23  ;;  %v5220_v55 = vpop.f32.mrb[26].mxu1 }
 0x317   : > { %v5221_v17 = vpop.f32.mrb[27].mxu1 }
 0x318   : > { %4835 = vmatmul.mubr.msk.bf16.gmra.mrb[148].mxu0 %vm10838_vm10, %v10836_v21  ;;  %v9386_v9 = vadd.f32 %v5221_v17, %v5220_v55  ;;  %vm10866_vm10 = vnez %v10625_v16 }
 0x319   : > { %4838 = vmatprep.mubr.msk.bf16.mxu0 %vm10841_vm0, %v10839_v14  ;;  %vm10867_vm0 = vnez %v10635_v45 }
 0x31b   : > { %v5151_v26 = vpop.f32.mrb[44].mxu0 }
 0x31c   : > { %v5152_v56 = vpop.f32.mrb[45].mxu0 }
 0x31d   : > { %v9391_v25 = vadd.f32 %v5152_v56, %v5151_v26  ;;  %v5154_v22 = vpop.f32.mrb[46].mxu0  ;;  %v10848_v26 = vld [vmem:[#allocation109_spill] sm:$0xff]  ;;  %v10849_v56 = vld [vmem:[#allocation118_spill] sm:$0xff] }
 0x31e   : > { %v5223_v40 = vpop.f32.mrb[28].mxu1  ;;  %v5155_v39 = vpop.f32.mrb[47].mxu0  ;;  %vm10850_vm11 = vnez %v10849_v56 }
 0x31f   : > { %v5224_v60 = vpop.f32.mrb[29].mxu1  ;;  %v9395_v3 = vadd.f32 %v5155_v39, %v5154_v22  ;;  %v10852_v22 = vld [vmem:[#allocation113_spill] sm:$0xff] }
 0x320   : > { %v9393_v46 = vadd.f32 %v5224_v60, %v5223_v40  ;;  %v5226_v1 = vpop.f32.mrb[30].mxu1  ;;  %4843 = vmatmul.mubr.msk.bf16.gmra.mrb[152].mxu0 %vm10844_vm9, %v10842_v38  ;;  %v10853_v60 = vld [vmem:[#allocation120_spill] sm:$0xff] }
 0x321   : > { %v5227_v4 = vpop.f32.mrb[31].mxu1  ;;  %4846 = vmatprep.mubr.msk.bf16.mxu0 %vm10847_vm7, %v10845_v47  ;;  %vm10854_vm15 = vnez %v10853_v60 }
 0x322   : > { %v9400_v5 = vadd.f32 %v5227_v4, %v5226_v1 }
 0x323   : > { %v5157_v30 = vpop.f32.mrb[48].mxu0 }
 0x324   : > { %v5158_v23 = vpop.f32.mrb[49].mxu0 }
 0x325   : > { %v9405_v41 = vadd.f32 %v5158_v23, %v5157_v30  ;;  %v5160_v32 = vpop.f32.mrb[50].mxu0 }
 0x326   : > { %v5229_v61 = vpop.f32.mrb[32].mxu1  ;;  %v5161_v17 = vpop.f32.mrb[51].mxu0 }
 0x327   : > { %v5230_v55 = vpop.f32.mrb[33].mxu1  ;;  %v9409_v8 = vadd.f32 %v5161_v17, %v5160_v32  ;;  %v10856_v17 = vld [vmem:[#allocation127_spill] sm:$0xff] }
 0x328   : > { %v9407_v21 = vadd.f32 %v5230_v55, %v5229_v61  ;;  %v5232_v14 = vpop.f32.mrb[34].mxu1  ;;  %4851 = vmatmul.mubr.msk.bf16.gmra.mrb[156].mxu0 %vm10850_vm11, %v10848_v26  ;;  %v10855_v55 = vld [vmem:[#allocation117_spill] sm:$0xff]  ;;  %vm10857_vm1 = vnez %v10856_v17  ;;  %v10859_v26 = vld [vmem:[#allocation128_spill] sm:$0xff] }
 0x329   : > { %v5233_v53 = vpop.f32.mrb[35].mxu1  ;;  %4854 = vmatprep.mubr.msk.bf16.mxu0 %vm10854_vm15, %v10852_v22  ;;  %vm10860_vm6 = vnez %v10859_v26 }
 0x32a   : > { %v9414_v40 = vadd.f32 %v5233_v53, %v5232_v14  ;;  %v10858_v53 = vld [vmem:[#allocation112_spill] sm:$0xff] }
 0x32b   : > { %v5163_v39 = vpop.f32.mrb[52].mxu0 }
 0x32c   : > { %10851 = vst [vmem:[#allocation50_spill] sm:$0xff] %v9414_v40  ;;  %v5164_v1 = vpop.f32.mrb[53].mxu0 }
 0x32d   : > { %v9419_v4 = vadd.f32 %v5164_v1, %v5163_v39  ;;  %v5166_v37 = vpop.f32.mrb[54].mxu0 }
 0x32e   : > { %v5363_v38 = vpop.f32.mrb[36].mxu1  ;;  %v5167_v44 = vpop.f32.mrb[55].mxu0 }
 0x32f   : > { %v5364_v47 = vpop.f32.mrb[37].mxu1  ;;  %v9423_v23 = vadd.f32 %v5167_v44, %v5166_v37 }
 0x330   : > { %v9421_v30 = vadd.f32 %v5364_v47, %v5363_v38  ;;  %v5366_v61 = vpop.f32.mrb[38].mxu1  ;;  %4859 = vmatmul.mubr.msk.bf16.gmra.mrb[160].mxu0 %vm10857_vm1, %v10855_v55 }
 0x331   : > { %v5367_v32 = vpop.f32.mrb[39].mxu1  ;;  %4862 = vmatprep.mubr.msk.bf16.mxu0 %vm10860_vm6, %v10858_v53 }
 0x332   : > { %v5368_v14 = vadd.f32 %v5367_v32, %v5366_v61  ;;  %v6143_v32 = vld [vmem:[#allocation10] sm:$0xff]  }
 0x333   : > { %v5169_v56 = vpop.f32.mrb[56].mxu0  ;;  %5743 = vmatprep.subr.bf16.mxu1 %v6143_v32 }
 0x334   : > { %v5170_v22 = vpop.f32.mrb[57].mxu0  ;;  %5744 = vmatpush3.bf16.msra.mxu1 %v6143_v32  ;;  %v9462_v32 = vld [vmem:[%s10865_s23] ss:$0 sm:$0xff] }
 0x335   : > { %v9431_v60 = vadd.f32 %v5170_v22, %v5169_v56  ;;  %v5172_v1 = vpop.f32.mrb[58].mxu0 }
 0x336   : > { %v5369_v39 = vpop.f32.mrb[40].mxu1  ;;  %v5173_v37 = vpop.f32.mrb[59].mxu0 }
 0x337   : > { %v5370_v38 = vpop.f32.mrb[41].mxu1  ;;  %v9435_v44 = vadd.f32 %v5173_v37, %v5172_v1 }
 0x338   : > { %v9433_v47 = vadd.f32 %v5370_v38, %v5369_v39  ;;  %v5372_v40 = vpop.f32.mrb[42].mxu1  ;;  %4867 = vmatmul.mubr.msk.bf16.gmra.mrb[164].mxu0 %vm10861_vm3, %v10778_v48 }
 0x339   : > { %v5373_v17 = vpop.f32.mrb[43].mxu1  ;;  %4870 = vmatprep.mubr.msk.bf16.mxu0 %vm10862_vm14, %v10773_v42 }
 0x33a   : > { %v9440_v61 = vadd.f32 %v5373_v17, %v5372_v40  ;;  %v6144_v40 = vld [vmem:[#allocation10 + $0x8] sm:$0xff]  }
 0x33b   : > { %v5175_v55 = vpop.f32.mrb[60].mxu0  ;;  %5745 = vmatprep.subr.bf16.mxu1 %v6144_v40 }
 0x33c   : > { %v5176_v53 = vpop.f32.mrb[61].mxu0  ;;  %5746 = vmatpush3.bf16.msra.mxu1 %v6144_v40 }
 0x33d   : > { %v9445_v26 = vadd.f32 %v5176_v53, %v5175_v55  ;;  %v5178_v22 = vpop.f32.mrb[62].mxu0  ;;  %5747 = vmatprep.subr.bf16.mxu1 %v6145_v20 }
 0x33e   : > { %v5375_v56 = vpop.f32.mrb[44].mxu1  ;;  %v5179_v1 = vpop.f32.mrb[63].mxu0 }
 0x33f   : > { %v5376_v39 = vpop.f32.mrb[45].mxu1  ;;  %v9449_v48 = vadd.f32 %v5179_v1, %v5178_v22 }
 0x340   : > { %v9447_v38 = vadd.f32 %v5376_v39, %v5375_v56  ;;  %v5378_v36 = vpop.f32.mrb[46].mxu1  ;;  %4875 = vmatmul.mubr.msk.bf16.gmra.mrb[168].mxu0 %vm10863_vm4, %v8283_v13  ;;  %v2739_v13 = vadd.f32 %v9360_v28, %v9462_v32  ;;  %5748 = vmatpush3.bf16.msra.mxu1 %v6145_v20 }
 0x341   : > { %v5379_v37 = vpop.f32.mrb[47].mxu1  ;;  %4878 = vmatprep.mubr.msk.bf16.mxu0 %vm10864_vm12, %v10570_v35  ;;  %v2742_v35 = vadd.f32 %v9364_v19, %v9462_v32 }
 0x342   : > { %v9454_v42 = vadd.f32 %v5379_v37, %v5378_v36 }
 0x343   : > { %v5251_v17 = vpop.f32.mrb[64].mxu0 }
 0x344   : > { %v5252_v55 = vpop.f32.mrb[65].mxu0 }
 0x345   : > { %v5253_v58 = vadd.f32 %v5252_v55, %v5251_v17  ;;  %v5254_v56 = vpop.f32.mrb[66].mxu0  ;;  %v6146_v55 = vld [vmem:[#allocation10 + $0x18] sm:$0xff]  }
 0x346   : > { %v5381_v53 = vpop.f32.mrb[48].mxu1  ;;  %v5255_v50 = vpop.f32.mrb[67].mxu0  ;;  %5749 = vmatprep.subr.bf16.mxu1 %v6146_v55 }
 0x347   : > { %v5382_v22 = vpop.f32.mrb[49].mxu1  ;;  %v2900_v39 = vadd.f32 %v5253_v58, %v2739_v13  ;;  %v5256_v36 = vadd.f32 %v5255_v50, %v5254_v56  ;;  %5750 = vmatpush3.bf16.msra.mxu1 %v6146_v55 }
 0x348   : > { %v9468_v1 = vadd.f32 %v5382_v22, %v5381_v53  ;;  %v5384_v40 = vpop.f32.mrb[50].mxu1  ;;  %4883 = vmatmul.mubr.msk.bf16.gmra.mrb[172].mxu0 %vm10866_vm10, %v8307_v27  ;;  %v2747_v53 = vadd.f32 %v9377_v7, %v9462_v32  ;;  %v6147_v22 = vld [vmem:[#allocation10 + $0x20] sm:$0xff]  }
 0x349   : > { %v5385_v37 = vpop.f32.mrb[51].mxu1  ;;  %v2903_v28 = vadd.f32 %v5256_v36, %v2742_v35  ;;  %4886 = vmatprep.mubr.msk.bf16.mxu0 %vm10867_vm0, %v8336_v59  ;;  %v9479_v20 = vadd.f32 %v9421_v30, %v2900_v39  ;;  %v2750_v59 = vadd.f32 %v9381_v2, %v9462_v32  ;;  %5751 = vmatprep.subr.bf16.mxu1 %v6147_v22 }
 0x34a   : > { %v9473_v17 = vadd.f32 %v5385_v37, %v5384_v40 }
 0x34b   : > { %v5257_v19 = vpop.f32.mrb[68].mxu0  ;;  %v9481_v13 = vadd.f32 %v5368_v14, %v2903_v28  ;;  %5752 = vmatpush3.bf16.msra.mxu1 %v6147_v22  ;;  %v6148_v28 = vld [vmem:[#allocation10 + $0x28] sm:$0xff]   ;;  %v6149_v22 = vld [vmem:[#allocation10 + $0x30] sm:$0xff]  }
 0x34c   : > { %v5258_v58 = vpop.f32.mrb[69].mxu0  ;;  %5753 = vmatprep.subr.bf16.mxu1 %v6148_v28 }
 0x34d   : > { %v5259_v16 = vadd.f32 %v5258_v58, %v5257_v19  ;;  %v5260_v56 = vpop.f32.mrb[70].mxu0 }
 0x34e   : > { %v5387_v27 = vpop.f32.mrb[52].mxu1  ;;  %v5261_v35 = vpop.f32.mrb[71].mxu0 }
 0x34f   : > { %v5388_v50 = vpop.f32.mrb[53].mxu1  ;;  %v2908_v45 = vadd.f32 %v5259_v16, %v2747_v53  ;;  %v5262_v14 = vadd.f32 %v5261_v35, %v5260_v56  ;;  %5754 = vmatpush3.bf16.msra.mxu1 %v6148_v28 }
 0x350   : > { %v9487_v30 = vadd.f32 %v5388_v50, %v5387_v27  ;;  %v5390_v39 = vpop.f32.mrb[54].mxu1  ;;  %4891 = vmatmul.mubr.msk.bf16.gmra.mrb[176].mxu0 %vm10799_vm8, %v8379_v33  ;;  %v2755_v33 = vadd.f32 %v9391_v25, %v9462_v32  ;;  %5755 = vmatprep.subr.bf16.mxu1 %v6149_v22 }
 0x351   : > { %v5391_v36 = vpop.f32.mrb[55].mxu1  ;;  %v2911_v7 = vadd.f32 %v5262_v14, %v2750_v59  ;;  %4894 = vmatprep.mubr.msk.bf16.mxu0 %vm10791_vm5, %v10667_v10  ;;  %v9498_v2 = vadd.f32 %v9433_v47, %v2908_v45  ;;  %v2758_v10 = vadd.f32 %v9395_v3, %v9462_v32  ;;  %v10868_v59 = vld [vmem:[#allocation92_spill] sm:$0xff]  ;;  %v6150_v14 = vld [vmem:[#allocation10 + $0x38] sm:$0xff]  }
 0x352   : > { %v9492_v40 = vadd.f32 %v5391_v36, %v5390_v39  ;;  %vm10869_vm5 = vnez %v10868_v59 }
 0x353   : > { %v5263_v37 = vpop.f32.mrb[72].mxu0  ;;  %v9501_v19 = vadd.f32 %v9440_v61, %v2911_v7  ;;  %5756 = vmatpush3.bf16.msra.mxu1 %v6149_v22 }
 0x354   : > { %v5264_v55 = vpop.f32.mrb[73].mxu0  ;;  %5757 = vmatprep.subr.bf16.mxu1 %v6150_v14 }
 0x355   : > { %v5265_v24 = vadd.f32 %v5264_v55, %v5263_v37  ;;  %v5266_v53 = vpop.f32.mrb[74].mxu0 }
 0x356   : > { %v5393_v58 = vpop.f32.mrb[56].mxu1  ;;  %v5267_v43 = vpop.f32.mrb[75].mxu0 }
 0x357   : > { %v5394_v16 = vpop.f32.mrb[57].mxu1  ;;  %v2916_v47 = vadd.f32 %v5265_v24, %v2755_v33  ;;  %v5268_v56 = vadd.f32 %v5267_v43, %v5266_v53  ;;  %5758 = vmatpush3.bf16.msra.mxu1 %v6150_v14  ;;  %v10870_v53 = vld [vmem:[#allocation98_spill] sm:$0xff] }
 0x358   : > { %v9507_v27 = vadd.f32 %v5394_v16, %v5393_v58  ;;  %v5396_v61 = vpop.f32.mrb[58].mxu1  ;;  %4899 = vmatmul.mubr.msk.bf16.gmra.mrb[180].mxu0 %vm10802_vm13, %v8391_v62  ;;  %v2763_v62 = vadd.f32 %v9405_v41, %v9462_v32  ;;  %v2779_v16 = vadd.f32 %v9431_v60, %v9462_v32 }
 0x359   : > { %v5397_v50 = vpop.f32.mrb[59].mxu1  ;;  %v2919_v25 = vadd.f32 %v5268_v56, %v2758_v10  ;;  %4902 = vmatprep.mubr.msk.bf16.mxu0 %vm10869_vm5, %v10800_v52  ;;  %v9518_v3 = vadd.f32 %v9447_v38, %v2916_v47  ;;  %v2766_v38 = vadd.f32 %v9409_v8, %v9462_v32  ;;  %v10872_v10 = vld [vmem:[#allocation135_spill] sm:$0xff]  ;;  %v10873_v47 = vld [vmem:[#allocation44_spill] sm:$0xff] }
 0x35a   : > { %v9512_v35 = vadd.f32 %v5397_v50, %v5396_v61  ;;  %vm10874_vm8 = vnez %v10873_v47  ;;  %v2771_v50 = vadd.f32 %v9419_v4, %v9462_v32 }
 0x35b   : > { %v5269_v45 = vpop.f32.mrb[76].mxu0  ;;  %v9521_v39 = vadd.f32 %v9454_v42, %v2919_v25 }
 0x35c   : > { %v5270_v36 = vpop.f32.mrb[77].mxu0 }
 0x35d   : > { %v5271_v11 = vadd.f32 %v5270_v36, %v5269_v45  ;;  %v5272_v37 = vpop.f32.mrb[78].mxu0 }
 0x35e   : > { %v5399_v7 = vpop.f32.mrb[60].mxu1  ;;  %v5273_v52 = vpop.f32.mrb[79].mxu0 }
 0x35f   : > { %v5400_v28 = vpop.f32.mrb[61].mxu1  ;;  %v2924_v55 = vadd.f32 %v5271_v11, %v2763_v62  ;;  %v5274_v24 = vadd.f32 %v5273_v52, %v5272_v37  ;;  %v2774_v62 = vadd.f32 %v9423_v23, %v9462_v32  ;;  %v10875_v52 = vld [vmem:[#allocation46_spill] sm:$0xff] }
 0x360   : > { %v9527_v33 = vadd.f32 %v5400_v28, %v5399_v7  ;;  %v5402_v42 = vpop.f32.mrb[62].mxu1  ;;  %4907 = vmatmul.mubr.msk.bf16.gmra.mrb[184].mxu0 %vm9264_vm2, %v10870_v53 }
 0x361   : > { %v5403_v58 = vpop.f32.mrb[63].mxu1  ;;  %v2927_v41 = vadd.f32 %v5274_v24, %v2766_v38  ;;  %4910 = vmatprep.mubr.msk.bf16.mxu0 %vm10874_vm8, %v10872_v10  ;;  %v9536_v56 = vadd.f32 %v9468_v1, %v2924_v55  ;;  %v10878_v55 = vld [vmem:[#allocation49_spill] sm:$0xff] }
 0x362   : > { %v5404_v43 = vadd.f32 %v5403_v58, %v5402_v42  ;;  %vm10879_vm2 = vnez %v10878_v55  ;;  %v2790_v55 = vadd.f32 %v9449_v48, %v9462_v32 }
 0x363   : > { %v5275_v8 = vpop.f32.mrb[80].mxu0  ;;  %v9539_v61 = vadd.f32 %v9473_v17, %v2927_v41  ;;  %v10876_v17 = vld [vmem:[#allocation66_spill] sm:$0xff] }
 0x364   : > { %v5276_v22 = vpop.f32.mrb[81].mxu0  ;;  %v10877_v38 = vpack.c.bf16 %v10875_v52, %v10876_v17 }
 0x365   : > { %v5277_v25 = vadd.f32 %v5276_v22, %v5275_v8  ;;  %v5278_v45 = vpop.f32.mrb[82].mxu0 }
 0x366   : > { %v5405_v59 = vpop.f32.mrb[64].mxu1  ;;  %v5279_v36 = vpop.f32.mrb[83].mxu0 }
 0x367   : > { %v5406_v14 = vpop.f32.mrb[65].mxu1  ;;  %v2932_v11 = vadd.f32 %v5277_v25, %v2771_v50  ;;  %v5280_v1 = vadd.f32 %v5279_v36, %v5278_v45  ;;  %v2782_v50 = vadd.f32 %v9435_v44, %v9462_v32 }
 0x368   : > { %v5407_v7 = vadd.f32 %v5406_v14, %v5405_v59  ;;  %v5408_v37 = vpop.f32.mrb[66].mxu1  ;;  %4915 = vmatmul.mubr.msk.bf16.gmra.mrb[188].mxu0 %vm10879_vm2, %v10877_v38 }
 0x369   : > { %v5409_v28 = vpop.f32.mrb[67].mxu1  ;;  %v2935_v4 = vadd.f32 %v5280_v1, %v2774_v62  ;;  %v9551_v42 = vadd.f32 %v9487_v30, %v2932_v11 }
 0x36a   : > { %v5410_v24 = vadd.f32 %v5409_v28, %v5408_v37  ;;  %v2787_v37 = vadd.f32 %v9445_v26, %v9462_v32 }
 0x36b   : > { %v5281_v58 = vpop.f32.mrb[84].mxu0  ;;  %v9554_v53 = vadd.f32 %v9492_v40, %v2935_v4 }
 0x36c   : > { %v5282_v23 = vpop.f32.mrb[85].mxu0 }
 0x36d   : > { %v5283_v41 = vadd.f32 %v5282_v23, %v5281_v58  ;;  %v5284_v47 = vpop.f32.mrb[86].mxu0 }
 0x36e   : > { %v5411_v10 = vpop.f32.mrb[68].mxu1  ;;  %v5285_v22 = vpop.f32.mrb[87].mxu0 }
 0x36f   : > { %v5412_v8 = vpop.f32.mrb[69].mxu1  ;;  %v2940_v25 = vadd.f32 %v5283_v41, %v2779_v16  ;;  %v5286_v30 = vadd.f32 %v5285_v22, %v5284_v47  ;;  %v2795_v22 = vadd.f32 %v9280_v18, %v9462_v32 }
 0x370   : > { %v5413_v59 = vadd.f32 %v5412_v8, %v5411_v10  ;;  %v5414_v45 = vpop.f32.mrb[70].mxu1 }
 0x371   : > { %v5415_v14 = vpop.f32.mrb[71].mxu1  ;;  %v2943_v36 = vadd.f32 %v5286_v30, %v2782_v50  ;;  %v9561_v62 = vadd.f32 %v9507_v27, %v2940_v25 }
 0x372   : > { %v5416_v40 = vadd.f32 %v5415_v14, %v5414_v45  ;;  %v2798_v14 = vadd.f32 %v9285_v34, %v9462_v32 }
 0x373   : > { %v5287_v11 = vpop.f32.mrb[88].mxu0  ;;  %v9564_v60 = vadd.f32 %v9512_v35, %v2943_v36 }
 0x374   : > { %v5288_v1 = vpop.f32.mrb[89].mxu0 }
 0x375   : > { %v5289_v28 = vadd.f32 %v5288_v1, %v5287_v11  ;;  %v5290_v52 = vpop.f32.mrb[90].mxu0 }
 0x376   : > { %v5417_v44 = vpop.f32.mrb[72].mxu1  ;;  %v5291_v38 = vpop.f32.mrb[91].mxu0 }
 0x377   : > { %v5418_v17 = vpop.f32.mrb[73].mxu1  ;;  %v2948_v4 = vadd.f32 %v5289_v28, %v2787_v37  ;;  %v5292_v27 = vadd.f32 %v5291_v38, %v5290_v52  ;;  %v2803_v38 = vadd.f32 %v9296_v6, %v9462_v32 }
 0x378   : > { %v5419_v58 = vadd.f32 %v5418_v17, %v5417_v44  ;;  %v5420_v23 = vpop.f32.mrb[74].mxu1 }
 0x379   : > { %v5421_v16 = vpop.f32.mrb[75].mxu1  ;;  %v2951_v41 = vadd.f32 %v5292_v27, %v2790_v55  ;;  %v9571_v10 = vadd.f32 %v9527_v33, %v2948_v4 }
 0x37a   : > { %v5422_v35 = vadd.f32 %v5421_v16, %v5420_v23  ;;  %v2806_v16 = vadd.f32 %v9301_v51, %v9462_v32 }
 0x37b   : > { %v5293_v47 = vpop.f32.mrb[92].mxu0  ;;  %v9573_v26 = vadd.f32 %v5404_v43, %v2951_v41 }
 0x37c   : > { %v5294_v8 = vpop.f32.mrb[93].mxu0 }
 0x37d   : > { %v5295_v50 = vadd.f32 %v5294_v8, %v5293_v47  ;;  %v5296_v48 = vpop.f32.mrb[94].mxu0 }
 0x37e   : > { %v5423_v25 = vpop.f32.mrb[76].mxu1  ;;  %v5297_v45 = vpop.f32.mrb[95].mxu0 }
 0x37f   : > { %v5424_v30 = vpop.f32.mrb[77].mxu1  ;;  %v2956_v36 = vadd.f32 %v5295_v50, %v2795_v22  ;;  %v5298_v1 = vadd.f32 %v5297_v45, %v5296_v48  ;;  %v2811_v45 = vadd.f32 %v9312_v63, %v9462_v32 }
 0x380   : > { %v5425_v11 = vadd.f32 %v5424_v30, %v5423_v25  ;;  %v5426_v33 = vpop.f32.mrb[78].mxu1 }
 0x381   : > { %v5427_v37 = vpop.f32.mrb[79].mxu1  ;;  %v2959_v28 = vadd.f32 %v5298_v1, %v2798_v14  ;;  %v9579_v44 = vadd.f32 %v5407_v7, %v2956_v36 }
 0x382   : > { %v5428_v43 = vadd.f32 %v5427_v37, %v5426_v33  ;;  %v2814_v37 = vadd.f32 %v9317_v57, %v9462_v32  ;;  %v9601_v57 = vld [vmem:[#allocation11] sm:$0xff]  }
 0x383   : > { %v5299_v52 = vpop.f32.mrb[96].mxu0  ;;  %v9581_v17 = vadd.f32 %v5410_v24, %v2959_v28  ;;  %5791 = vmatprep.subr.bf16.mxu1 %v9601_v57 }
 0x384   : > { %v5300_v18 = vpop.f32.mrb[97].mxu0 }
 0x385   : > { %v5301_v55 = vadd.f32 %v5300_v18, %v5299_v52  ;;  %v5302_v27 = vpop.f32.mrb[98].mxu0 }
 0x386   : > { %v5429_v4 = vpop.f32.mrb[80].mxu1  ;;  %v5303_v23 = vpop.f32.mrb[99].mxu0 }
 0x387   : > { %v5430_v34 = vpop.f32.mrb[81].mxu1  ;;  %v2964_v41 = vadd.f32 %v5301_v55, %v2803_v38  ;;  %v5304_v8 = vadd.f32 %v5303_v23, %v5302_v27  ;;  %v2819_v23 = vadd.f32 %v9328_v29, %v9462_v32 }
 0x388   : > { %v5431_v47 = vadd.f32 %v5430_v34, %v5429_v4  ;;  %v5432_v7 = vpop.f32.mrb[82].mxu1 }
 0x389   : > { %v5433_v22 = vpop.f32.mrb[83].mxu1  ;;  %v2967_v50 = vadd.f32 %v5304_v8, %v2806_v16  ;;  %v9587_v25 = vadd.f32 %v5413_v59, %v2964_v41 }
 0x38a   : > { %v5434_v24 = vadd.f32 %v5433_v22, %v5432_v7 }
 0x38b   : > { %v5305_v48 = vpop.f32.mrb[100].mxu0  ;;  %v9589_v30 = vadd.f32 %v5416_v40, %v2967_v50  ;;  %v2822_v50 = vadd.f32 %v9333_v31, %v9462_v32 }
 0x38c   : > { %v5306_v6 = vpop.f32.mrb[101].mxu0 }
 0x38d   : > { %v5307_v14 = vadd.f32 %v5306_v6, %v5305_v48  ;;  %v5308_v1 = vpop.f32.mrb[102].mxu0 }
 0x38e   : > { %v5435_v36 = vpop.f32.mrb[84].mxu1  ;;  %v5309_v33 = vpop.f32.mrb[103].mxu0 }
 0x38f   : > { %v5436_v51 = vpop.f32.mrb[85].mxu1  ;;  %v2972_v28 = vadd.f32 %v5307_v14, %v2811_v45  ;;  %v5310_v18 = vadd.f32 %v5309_v33, %v5308_v1 }
 0x390   : > { %v5437_v52 = vadd.f32 %v5436_v51, %v5435_v36  ;;  %v5438_v59 = vpop.f32.mrb[86].mxu1 }
 0x391   : > { %v5439_v38 = vpop.f32.mrb[87].mxu1  ;;  %v2975_v55 = vadd.f32 %v5310_v18, %v2814_v37  ;;  %v9595_v4 = vadd.f32 %v5419_v58, %v2972_v28  ;;  %v2827_v37 = vadd.f32 %v9344_v49, %v9462_v32 }
 0x392   : > { %v5440_v40 = vadd.f32 %v5439_v38, %v5438_v59 }
 0x393   : > { %v5311_v27 = vpop.f32.mrb[104].mxu0  ;;  %v9597_v34 = vadd.f32 %v5422_v35, %v2975_v55  ;;  %v2830_v55 = vadd.f32 %v9349_v54, %v9462_v32 }
 0x394   : > { %v5312_v63 = vpop.f32.mrb[105].mxu0 }
 0x395   : > { %v5313_v16 = vadd.f32 %v5312_v63, %v5311_v27  ;;  %v5314_v8 = vpop.f32.mrb[106].mxu0 }
 0x396   : > { %v5441_v41 = vpop.f32.mrb[88].mxu1  ;;  %v5315_v22 = vpop.f32.mrb[107].mxu0 }
 0x397   : > { %v5442_v7 = vpop.f32.mrb[89].mxu1  ;;  %v2980_v48 = vadd.f32 %v5313_v16, %v2819_v23  ;;  %v5316_v6 = vadd.f32 %v5315_v22, %v5314_v8 }
 0x398   : > { %v5443_v58 = vadd.f32 %v5442_v7, %v5441_v41  ;;  %v5444_v45 = vpop.f32.mrb[90].mxu1 }
 0x399   : > { %v5445_v35 = vpop.f32.mrb[91].mxu1  ;;  %v2983_v14 = vadd.f32 %v5316_v6, %v2822_v50  ;;  %v9606_v29 = vadd.f32 %v5425_v11, %v2980_v48  ;;  %v2835_v50 = vadd.f32 %v9362_v15, %v9462_v32 }
 0x39a   : > { %v5446_v36 = vadd.f32 %v5445_v35, %v5444_v45 }
 0x39b   : > { %v5317_v1 = vpop.f32.mrb[108].mxu0  ;;  %v9608_v51 = vadd.f32 %v5428_v43, %v2983_v14  ;;  %v2838_v14 = vadd.f32 %v9369_v0, %v9462_v32 }
 0x39c   : > { %v5318_v33 = vpop.f32.mrb[109].mxu0 }
 0x39d   : > { %v5319_v28 = vadd.f32 %v5318_v33, %v5317_v1  ;;  %v5320_v18 = vpop.f32.mrb[110].mxu0 }
 0x39e   : > { %v5447_v31 = vpop.f32.mrb[92].mxu1  ;;  %v5321_v38 = vpop.f32.mrb[111].mxu0 }
 0x39f   : > { %v5448_v59 = vpop.f32.mrb[93].mxu1  ;;  %v2988_v27 = vadd.f32 %v5319_v28, %v2827_v37  ;;  %v5322_v23 = vadd.f32 %v5321_v38, %v5320_v18 }
 0x3a0   : > { %v5449_v63 = vadd.f32 %v5448_v59, %v5447_v31  ;;  %v5450_v11 = vpop.f32.mrb[94].mxu1 }
 0x3a1   : > { %v5451_v16 = vpop.f32.mrb[95].mxu1  ;;  %v2991_v41 = vadd.f32 %v5322_v23, %v2830_v55  ;;  %v9614_v8 = vadd.f32 %v5431_v47, %v2988_v27  ;;  %v2843_v55 = vadd.f32 %v9379_v12, %v9462_v32 }
 0x3a2   : > { %v5452_v43 = vadd.f32 %v5451_v16, %v5450_v11 }
 0x3a3   : > { %v5323_v7 = vpop.f32.mrb[112].mxu0  ;;  %v9616_v22 = vadd.f32 %v5434_v24, %v2991_v41  ;;  %v2846_v41 = vadd.f32 %v9386_v9, %v9462_v32 }
 0x3a4   : > { %v5324_v49 = vpop.f32.mrb[113].mxu0 }
 0x3a5   : > { %v5325_v48 = vadd.f32 %v5324_v49, %v5323_v7  ;;  %v5326_v45 = vpop.f32.mrb[114].mxu0 }
 0x3a6   : > { %v5453_v6 = vpop.f32.mrb[96].mxu1  ;;  %v5327_v35 = vpop.f32.mrb[115].mxu0 }
 0x3a7   : > { %v5454_v54 = vpop.f32.mrb[97].mxu1  ;;  %v2996_v1 = vadd.f32 %v5325_v48, %v2835_v50  ;;  %v5328_v37 = vadd.f32 %v5327_v35, %v5326_v45 }
 0x3a8   : > { %v5455_v33 = vadd.f32 %v5454_v54, %v5453_v6  ;;  %v5456_v47 = vpop.f32.mrb[98].mxu1  ;;  %v2851_v54 = vadd.f32 %v9393_v46, %v9462_v32 }
 0x3a9   : > { %v5457_v28 = vpop.f32.mrb[99].mxu1  ;;  %v2999_v31 = vadd.f32 %v5328_v37, %v2838_v14  ;;  %v9622_v18 = vadd.f32 %v5437_v52, %v2996_v1 }
 0x3aa   : > { %v5458_v24 = vadd.f32 %v5457_v28, %v5456_v47  ;;  %v2854_v47 = vadd.f32 %v9400_v5, %v9462_v32 }
 0x3ab   : > { %v5329_v59 = vpop.f32.mrb[116].mxu0  ;;  %v9624_v38 = vadd.f32 %v5440_v40, %v2999_v31 }
 0x3ac   : > { %v5330_v15 = vpop.f32.mrb[117].mxu0 }
 0x3ad   : > { %v5331_v27 = vadd.f32 %v5330_v15, %v5329_v59  ;;  %v5332_v0 = vpop.f32.mrb[118].mxu0 }
 0x3ae   : > { %v9628_v23 = vpop.f32.mrb[100].mxu1  ;;  %v5333_v16 = vpop.f32.mrb[119].mxu0 }
 0x3af   : > { %v3382_v11 = vpop.f32.mrb[101].mxu1  ;;  %v3004_v7 = vadd.f32 %v5331_v27, %v2843_v55  ;;  %v5334_v49 = vadd.f32 %v5333_v16, %v5332_v0  ;;  %v2859_v0 = vadd.f32 %v9407_v21, %v9462_v32 }
 0x3b0   : > { %v9632_v52 = vpop.f32.mrb[102].mxu1 }
 0x3b1   : > { %v3385_v50 = vpop.f32.mrb[103].mxu1  ;;  %v3007_v40 = vadd.f32 %v5334_v49, %v2846_v41  ;;  %v9634_v48 = vadd.f32 %v5443_v58, %v3004_v7 }
 0x3b3   : > { %v5335_v6 = vpop.f32.mrb[120].mxu0  ;;  %v9636_v45 = vadd.f32 %v5446_v36, %v3007_v40  ;;  %v10880_v40 = vld [vmem:[#allocation50_spill] sm:$0xff] }
 0x3b4   : > { %v5336_v12 = vpop.f32.mrb[121].mxu0 }
 0x3b5   : > { %v5337_v35 = vadd.f32 %v5336_v12, %v5335_v6  ;;  %v5338_v1 = vpop.f32.mrb[122].mxu0  ;;  %v2862_v6 = vadd.f32 %v10880_v40, %v9462_v32 }
 0x3b6   : > { %v9640_v14 = vpop.f32.mrb[104].mxu1  ;;  %v5339_v37 = vpop.f32.mrb[123].mxu0 }
 0x3b7   : > { %v9642_v9 = vpop.f32.mrb[105].mxu1  ;;  %v3012_v28 = vadd.f32 %v5337_v35, %v2851_v54  ;;  %v5340_v58 = vadd.f32 %v5339_v37, %v5338_v1 }
 0x3b8   : > { %v9646_v31 = vpop.f32.mrb[106].mxu1 }
 0x3b9   : > { %v9648_v36 = vpop.f32.mrb[107].mxu1  ;;  %v3015_v59 = vadd.f32 %v5340_v58, %v2854_v47  ;;  %v9650_v15 = vadd.f32 %v5449_v63, %v3012_v28 }
 0x3bb   : > { %v5341_v46 = vpop.f32.mrb[124].mxu0  ;;  %v9652_v55 = vadd.f32 %v5452_v43, %v3015_v59 }
 0x3bc   : > { %v5342_v27 = vpop.f32.mrb[125].mxu0 }
 0x3bd   : > { %v5343_v16 = vadd.f32 %v5342_v27, %v5341_v46  ;;  %v5344_v5 = vpop.f32.mrb[126].mxu0 }
 0x3be   : > { %v9656_v41 = vpop.f32.mrb[108].mxu1  ;;  %v5345_v49 = vpop.f32.mrb[127].mxu0 }
 0x3bf   : > { %v9658_v7 = vpop.f32.mrb[109].mxu1  ;;  %v3020_v12 = vadd.f32 %v5343_v16, %v2859_v0  ;;  %v5346_v63 = vadd.f32 %v5345_v49, %v5344_v5 }
 0x3c0   : > { %v9662_v54 = vpop.f32.mrb[110].mxu1 }
 0x3c1   : > { %v9664_v43 = vpop.f32.mrb[111].mxu1  ;;  %v3023_v35 = vadd.f32 %v5346_v63, %v2862_v6  ;;  %v9666_v1 = vadd.f32 %v5455_v33, %v3020_v12 }
 0x3c3   : > { %10881 = vst [vmem:[#allocation94_spill] sm:$0xff] %v9666_v1  ;;  %v5475_v21 = vpop.f32.mrb[128].mxu0  ;;  %v9668_v37 = vadd.f32 %v5458_v24, %v3023_v35 }
 0x3c4   : > { %v5476_v47 = vpop.f32.mrb[129].mxu0 }
 0x3c5   : > { %10882 = vst [vmem:[#allocation130_spill] sm:$0xff] %v9668_v37  ;;  %v5477_v28 = vadd.f32 %v5476_v47, %v5475_v21  ;;  %v5478_v59 = vpop.f32.mrb[130].mxu0 }
 0x3c6   : > { %v9670_v58 = vpop.f32.mrb[112].mxu1  ;;  %v5479_v32 = vpop.f32.mrb[131].mxu0 }
 0x3c7   : > { %v9672_v46 = vpop.f32.mrb[113].mxu1  ;;  %v3222_v27 = vadd.f32 %v5477_v28, %v9479_v20  ;;  %v5480_v0 = vadd.f32 %v5479_v32, %v5478_v59 }
 0x3c8   : > { %v9675_v16 = vpop.f32.mrb[114].mxu1 }
 0x3c9   : > { %v9677_v5 = vpop.f32.mrb[115].mxu1  ;;  %v3383_v33 = vadd.f32 %v3382_v11, %v3222_v27  ;;  %v3225_v49 = vadd.f32 %v5480_v0, %v9481_v13 }
 0x3cb   : > { %v3386_v24 = vadd.f32 %v3385_v50, %v3225_v49  ;;  %v5481_v40 = vpop.f32.mrb[132].mxu0  ;;  %v3509_v12 = vmax.f32 %v3383_v33, 0.0 }
 0x3cc   : > { %v5482_v6 = vpop.f32.mrb[133].mxu0 }
 0x3cd   : > { %v3510_v63 = vmax.f32 %v3386_v24, 0.0  ;;  %v5483_v35 = vadd.f32 %v5482_v6, %v5481_v40  ;;  %v5484_v47 = vpop.f32.mrb[134].mxu0 }
 0x3ce   : > { %v9680_v21 = vpop.f32.mrb[116].mxu1  ;;  %v5485_v20 = vpop.f32.mrb[135].mxu0 }
 0x3cf   : > { %v9682_v37 = vpop.f32.mrb[117].mxu1  ;;  %v3230_v28 = vadd.f32 %v5483_v35, %v9498_v2  ;;  %v5486_v59 = vadd.f32 %v5485_v20, %v5484_v47  ;;  %v3541_v11 = vpack.c.bf16 %v3510_v63, %v3509_v12 }
 0x3d0   : > { %v9685_v32 = vpop.f32.mrb[118].mxu1 }
 0x3d1   : > { %v9687_v27 = vpop.f32.mrb[119].mxu1  ;;  %v3391_v13 = vadd.f32 %v9628_v23, %v3230_v28  ;;  %v3233_v50 = vadd.f32 %v5486_v59, %v9501_v19  ;;  %5759 = vmatprep.mubr.bf16.mxu1 %v3541_v11  ;;  %v6152_v19 = vld [vmem:[#allocation11 + $0x8] sm:$0xff]  }
 0x3d3   : > { %v3394_v0 = vadd.f32 %v9632_v52, %v3233_v50  ;;  %v5487_v33 = vpop.f32.mrb[136].mxu0  ;;  %v3511_v24 = vmax.f32 %v3391_v13, 0.0  ;;  %v6153_v50 = vld [vmem:[#allocation11 + $0x10] sm:$0xff]  }
 0x3d4   : > { %v5488_v49 = vpop.f32.mrb[137].mxu0 }
 0x3d5   : > { %v3512_v40 = vmax.f32 %v3394_v0, 0.0  ;;  %v5489_v6 = vadd.f32 %v5488_v49, %v5487_v33  ;;  %v5490_v2 = vpop.f32.mrb[138].mxu0 }
 0x3d6   : > { %v9692_v1 = vpop.f32.mrb[120].mxu1  ;;  %v5491_v12 = vpop.f32.mrb[139].mxu0 }
 0x3d7   : > { %v9694_v35 = vpop.f32.mrb[121].mxu1  ;;  %v3542_v63 = vpack.c.bf16 %v3512_v40, %v3511_v24  ;;  %v3238_v47 = vadd.f32 %v5489_v6, %v9518_v3  ;;  %v5492_v23 = vadd.f32 %v5491_v12, %v5490_v2  ;;  %v6154_v12 = vld [vmem:[#allocation11 + $0x18] sm:$0xff]  }
 0x3d8   : > { %v9697_v20 = vpop.f32.mrb[122].mxu1 }
 0x3d9   : > { %v9699_v28 = vpop.f32.mrb[123].mxu1  ;;  %v3399_v52 = vadd.f32 %v9642_v9, %v3238_v47  ;;  %v3241_v59 = vadd.f32 %v5492_v23, %v9521_v39  ;;  %5760 = vmatmul.mubr.bf16.vlgmr.msra.gmra.mrb[132].mxu1 %v3542_v63 }
 0x3da   : > { %5792 = vmatpush3.bf16.msra.mxu1 %v9601_v57 }
 0x3db   : > { %v3402_v11 = vadd.f32 %v9648_v36, %v3241_v59  ;;  %v5493_v13 = vpop.f32.mrb[140].mxu0  ;;  %5793 = vmatprep.subr.bf16.mxu1 %v6152_v19  ;;  %v3513_v3 = vmax.f32 %v3399_v52, 0.0 }
 0x3dc   : > { %v5494_v0 = vpop.f32.mrb[141].mxu0 }
 0x3dd   : > { %v3514_v33 = vmax.f32 %v3402_v11, 0.0  ;;  %v5495_v49 = vadd.f32 %v5494_v0, %v5493_v13  ;;  %v5496_v40 = vpop.f32.mrb[142].mxu0 }
 0x3de   : > { %v9705_v24 = vpop.f32.mrb[124].mxu1  ;;  %v5497_v9 = vpop.f32.mrb[143].mxu0  ;;  %5794 = vmatpush3.bf16.msra.mxu1 %v6152_v19  ;;  %v6155_v19 = vld [vmem:[#allocation11 + $0x20] sm:$0xff]  }
 0x3df   : > { %v9707_v6 = vpop.f32.mrb[125].mxu1  ;;  %v3246_v39 = vadd.f32 %v5495_v49, %v9536_v56  ;;  %v5498_v2 = vadd.f32 %v5497_v9, %v5496_v40  ;;  %v3543_v36 = vpack.c.bf16 %v3514_v33, %v3513_v3  ;;  %5795 = vmatprep.subr.bf16.mxu1 %v6153_v50  ;;  %v6156_v9 = vld [vmem:[#allocation11 + $0x28] sm:$0xff]  }
 0x3e0   : > { %v9710_v57 = vpop.f32.mrb[126].mxu1 }
 0x3e1   : > { %v9712_v63 = vpop.f32.mrb[127].mxu1  ;;  %v3407_v47 = vadd.f32 %v9640_v14, %v3246_v39  ;;  %v3249_v23 = vadd.f32 %v5498_v2, %v9539_v61  ;;  %5763 = vmatprep.mubr.bf16.mxu1 %v3543_v36 }
 0x3e2   : > { %5796 = vmatpush3.bf16.msra.mxu1 %v6153_v50 }
 0x3e3   : > { %v3410_v52 = vadd.f32 %v9646_v31, %v3249_v23  ;;  %v5499_v59 = vpop.f32.mrb[144].mxu0  ;;  %5797 = vmatprep.subr.bf16.mxu1 %v6154_v12  ;;  %v3515_v11 = vmax.f32 %v3407_v47, 0.0 }
 0x3e4   : > { %v5500_v56 = vpop.f32.mrb[145].mxu0 }
 0x3e5   : > { %v3516_v13 = vmax.f32 %v3410_v52, 0.0  ;;  %v5501_v0 = vadd.f32 %v5500_v56, %v5499_v59  ;;  %v5502_v33 = vpop.f32.mrb[146].mxu0 }
 0x3e6   : > { %v9717_v3 = vpop.f32.mrb[128].mxu1  ;;  %v5503_v40 = vpop.f32.mrb[147].mxu0  ;;  %5798 = vmatpush3.bf16.msra.mxu1 %v6154_v12  ;;  %v6157_v12 = vld [vmem:[#allocation11 + $0x30] sm:$0xff]  }
 0x3e7   : > { %v9719_v49 = vpop.f32.mrb[129].mxu1  ;;  %v3254_v61 = vadd.f32 %v5501_v0, %v9551_v42  ;;  %v5504_v14 = vadd.f32 %v5503_v40, %v5502_v33  ;;  %v3544_v31 = vpack.c.bf16 %v3516_v13, %v3515_v11  ;;  %5799 = vmatprep.subr.bf16.mxu1 %v6155_v19 }
 0x3e8   : > { %v9722_v50 = vpop.f32.mrb[130].mxu1 }
 0x3e9   : > { %v9724_v39 = vpop.f32.mrb[131].mxu1  ;;  %v3415_v2 = vadd.f32 %v9658_v7, %v3254_v61  ;;  %v3257_v36 = vadd.f32 %v5504_v14, %v9554_v53  ;;  %5764 = vmatmul.mubr.bf16.gmra.mrb[136].mxu1 %v3544_v31  ;;  %v6158_v53 = vld [vmem:[#allocation11 + $0x38] sm:$0xff]  }
 0x3ea   : > { %5800 = vmatpush3.bf16.msra.mxu1 %v6155_v19 }
 0x3eb   : > { %v3418_v47 = vadd.f32 %v9664_v43, %v3257_v36  ;;  %v5505_v23 = vpop.f32.mrb[148].mxu0  ;;  %5801 = vmatprep.subr.bf16.mxu1 %v6156_v9  ;;  %v3517_v52 = vmax.f32 %v3415_v2, 0.0 }
 0x3ec   : > { %v5506_v42 = vpop.f32.mrb[149].mxu0 }
 0x3ed   : > { %v3518_v59 = vmax.f32 %v3418_v47, 0.0  ;;  %v5507_v56 = vadd.f32 %v5506_v42, %v5505_v23  ;;  %v5508_v11 = vpop.f32.mrb[150].mxu0 }
 0x3ee   : > { %v5509_v13 = vpop.f32.mrb[151].mxu0  ;;  %5802 = vmatpush3.bf16.msra.mxu1 %v6156_v9 }
 0x3ef   : > { %v3262_v0 = vadd.f32 %v5507_v56, %v9561_v62  ;;  %v5510_v33 = vadd.f32 %v5509_v13, %v5508_v11  ;;  %v3545_v7 = vpack.c.bf16 %v3518_v59, %v3517_v52  ;;  %5803 = vmatprep.subr.bf16.mxu1 %v6157_v12 }
 0x3f1   : > { %v3423_v19 = vadd.f32 %v9656_v41, %v3262_v0  ;;  %v3265_v43 = vadd.f32 %v5510_v33, %v9564_v60  ;;  %5767 = vmatprep.mubr.bf16.mxu1 %v3545_v7 }
 0x3f2   : > { %5804 = vmatpush3.bf16.msra.mxu1 %v6157_v12 }
 0x3f3   : > { %v3426_v40 = vadd.f32 %v9662_v54, %v3265_v43  ;;  %v5511_v61 = vpop.f32.mrb[152].mxu0  ;;  %5805 = vmatprep.subr.bf16.mxu1 %v6158_v53  ;;  %v3519_v31 = vmax.f32 %v3423_v19, 0.0 }
 0x3f4   : > { %v5512_v14 = vpop.f32.mrb[153].mxu0 }
 0x3f5   : > { %v3520_v2 = vmax.f32 %v3426_v40, 0.0  ;;  %v5513_v9 = vadd.f32 %v5512_v14, %v5511_v61  ;;  %v5514_v36 = vpop.f32.mrb[154].mxu0 }
 0x3f6   : > { %v5515_v62 = vpop.f32.mrb[155].mxu0  ;;  %5806 = vmatpush3.bf16.msra.mxu1 %v6158_v53 }
 0x3f7   : > { %v3270_v47 = vadd.f32 %v5513_v9, %v9571_v10  ;;  %v5516_v23 = vadd.f32 %v5515_v62, %v5514_v36  ;;  %v3546_v42 = vpack.c.bf16 %v3520_v2, %v3519_v31 }
 0x3f9   : > { %v3431_v41 = vadd.f32 %v9672_v46, %v3270_v47  ;;  %v3273_v60 = vadd.f32 %v5516_v23, %v9573_v26  ;;  %5768 = vmatmul.mubr.bf16.gmra.mrb[140].mxu1 %v3546_v42 }
 0x3fb   : > { %v3434_v54 = vadd.f32 %v9677_v5, %v3273_v60  ;;  %v5517_v12 = vpop.f32.mrb[156].mxu0  ;;  %v3521_v59 = vmax.f32 %v3431_v41, 0.0 }
 0x3fc   : > { %v5518_v52 = vpop.f32.mrb[157].mxu0 }
 0x3fd   : > { %v3522_v56 = vmax.f32 %v3434_v54, 0.0  ;;  %v5519_v11 = vadd.f32 %v5518_v52, %v5517_v12  ;;  %v5520_v13 = vpop.f32.mrb[158].mxu0 }
 0x3fe   : > { %v5521_v0 = vpop.f32.mrb[159].mxu0 }
 0x3ff   : > { %v3278_v33 = vadd.f32 %v5519_v11, %v9579_v44  ;;  %v5522_v7 = vadd.f32 %v5521_v0, %v5520_v13  ;;  %v3547_v10 = vpack.c.bf16 %v3522_v56, %v3521_v59 }
 0x401   : > { %v3439_v53 = vadd.f32 %v9670_v58, %v3278_v33  ;;  %v3281_v46 = vadd.f32 %v5522_v7, %v9581_v17  ;;  %5771 = vmatprep.mubr.bf16.mxu1 %v3547_v10 }
 0x403   : > { %v3442_v26 = vadd.f32 %v9675_v16, %v3281_v46  ;;  %v5523_v19 = vpop.f32.mrb[160].mxu0  ;;  %v3523_v43 = vmax.f32 %v3439_v53, 0.0 }
 0x404   : > { %v5524_v5 = vpop.f32.mrb[161].mxu0 }
 0x405   : > { %v3524_v40 = vmax.f32 %v3442_v26, 0.0  ;;  %v5525_v61 = vadd.f32 %v5524_v5, %v5523_v19  ;;  %v5526_v14 = vpop.f32.mrb[162].mxu0 }
 0x406   : > { %v5527_v31 = vpop.f32.mrb[163].mxu0 }
 0x407   : > { %v3286_v2 = vadd.f32 %v5525_v61, %v9587_v25  ;;  %v5528_v9 = vadd.f32 %v5527_v31, %v5526_v14  ;;  %v3548_v44 = vpack.c.bf16 %v3524_v40, %v3523_v43 }
 0x409   : > { %v3447_v36 = vadd.f32 %v9682_v37, %v3286_v2  ;;  %v3289_v58 = vadd.f32 %v5528_v9, %v9589_v30  ;;  %5772 = vmatmul.mubr.bf16.gmra.mrb[144].mxu1 %v3548_v44 }
 0x40b   : > { %v3450_v17 = vadd.f32 %v9687_v27, %v3289_v58  ;;  %v5529_v62 = vpop.f32.mrb[164].mxu0  ;;  %v3525_v47 = vmax.f32 %v3447_v36, 0.0 }
 0x40c   : > { %v5530_v16 = vpop.f32.mrb[165].mxu0 }
 0x40d   : > { %v3526_v23 = vmax.f32 %v3450_v17, 0.0  ;;  %v5531_v42 = vadd.f32 %v5530_v16, %v5529_v62  ;;  %v5532_v41 = vpop.f32.mrb[166].mxu0 }
 0x40e   : > { %v5533_v60 = vpop.f32.mrb[167].mxu0 }
 0x40f   : > { %v3294_v54 = vadd.f32 %v5531_v42, %v9595_v4  ;;  %v5534_v12 = vadd.f32 %v5533_v60, %v5532_v41  ;;  %v3549_v25 = vpack.c.bf16 %v3526_v23, %v3525_v47 }
 0x411   : > { %v3455_v52 = vadd.f32 %v9680_v21, %v3294_v54  ;;  %v3297_v37 = vadd.f32 %v5534_v12, %v9597_v34  ;;  %5775 = vmatprep.mubr.bf16.mxu1 %v3549_v25 }
 0x413   : > { %v3458_v30 = vadd.f32 %v9685_v32, %v3297_v37  ;;  %v5535_v59 = vpop.f32.mrb[168].mxu0  ;;  %v3527_v56 = vmax.f32 %v3455_v52, 0.0 }
 0x414   : > { %v5536_v27 = vpop.f32.mrb[169].mxu0 }
 0x415   : > { %v3528_v11 = vmax.f32 %v3458_v30, 0.0  ;;  %v5537_v13 = vadd.f32 %v5536_v27, %v5535_v59  ;;  %v5538_v0 = vpop.f32.mrb[170].mxu0 }
 0x416   : > { %v5539_v33 = vpop.f32.mrb[171].mxu0 }
 0x417   : > { %v3302_v7 = vadd.f32 %v5537_v13, %v9606_v29  ;;  %v5540_v10 = vadd.f32 %v5539_v33, %v5538_v0  ;;  %v3550_v4 = vpack.c.bf16 %v3528_v11, %v3527_v56 }
 0x419   : > { %v3463_v53 = vadd.f32 %v9694_v35, %v3302_v7  ;;  %v3305_v21 = vadd.f32 %v5540_v10, %v9608_v51  ;;  %5776 = vmatmul.mubr.bf16.gmra.mrb[148].mxu1 %v3550_v4 }
 0x41b   : > { %v3466_v34 = vadd.f32 %v9699_v28, %v3305_v21  ;;  %v5541_v46 = vpop.f32.mrb[172].mxu0  ;;  %v3529_v26 = vmax.f32 %v3463_v53, 0.0 }
 0x41c   : > { %v5542_v32 = vpop.f32.mrb[173].mxu0 }
 0x41d   : > { %v3530_v19 = vmax.f32 %v3466_v34, 0.0  ;;  %v5543_v5 = vadd.f32 %v5542_v32, %v5541_v46  ;;  %v5544_v43 = vpop.f32.mrb[174].mxu0  ;;  %v10883_v32 = vld [vmem:[#allocation94_spill] sm:$0xff] }
 0x41e   : > { %v5545_v40 = vpop.f32.mrb[175].mxu0 }
 0x41f   : > { %v3310_v61 = vadd.f32 %v5543_v5, %v9614_v8  ;;  %v5546_v14 = vadd.f32 %v5545_v40, %v5544_v43  ;;  %v3551_v29 = vpack.c.bf16 %v3530_v19, %v3529_v26  ;;  %v10884_v43 = vld [vmem:[#allocation130_spill] sm:$0xff] }
 0x421   : > { %v3471_v31 = vadd.f32 %v9692_v1, %v3310_v61  ;;  %v3313_v35 = vadd.f32 %v5546_v14, %v9616_v22  ;;  %5779 = vmatprep.mubr.bf16.mxu1 %v3551_v29  ;;  %v10885_v14 = vld [vmem:[#allocation28_spill] sm:$0xff]  ;;  %v10886_v29 = vld [vmem:[#allocation29_spill] sm:$0xff] }
 0x423   : > { %v3474_v51 = vadd.f32 %v9697_v20, %v3313_v35  ;;  %v5547_v2 = vpop.f32.mrb[176].mxu0  ;;  %v3531_v9 = vmax.f32 %v3471_v31, 0.0  ;;  %v10887_v31 = vld [vmem:[#allocation30_spill] sm:$0xff]  ;;  %v10888_v35 = vld [vmem:[#allocation31_spill] sm:$0xff] }
 0x424   : > { %v5548_v28 = vpop.f32.mrb[177].mxu0 }
 0x425   : > { %v3532_v44 = vmax.f32 %v3474_v51, 0.0  ;;  %v5549_v36 = vadd.f32 %v5548_v28, %v5547_v2  ;;  %v5550_v58 = vpop.f32.mrb[178].mxu0  ;;  %v10889_v51 = vld [vmem:[#allocation32_spill] sm:$0xff]  ;;  %v10891_v2 = vld [vmem:[#allocation34_spill] sm:$0xff]  ;;  %v10892_v28 = vld [vmem:[#allocation35_spill] sm:$0xff] }
 0x426   : > { %v5551_v17 = vpop.f32.mrb[179].mxu0 }
 0x427   : > { %v3318_v62 = vadd.f32 %v5549_v36, %v9622_v18  ;;  %v5552_v16 = vadd.f32 %v5551_v17, %v5550_v58  ;;  %v3552_v8 = vpack.c.bf16 %v3532_v44, %v3531_v9  ;;  %v10894_v9 = vld [vmem:[#allocation37_spill] sm:$0xff]  ;;  %v10895_v44 = vld [vmem:[#allocation38_spill] sm:$0xff]  ;;  %v10896_v36 = vld [vmem:[#allocation39_spill] sm:$0xff] }
 0x428   : > { %v10897_v58 = vld [vmem:[#allocation40_spill] sm:$0xff]  ;;  %v10898_v17 = vld [vmem:[#allocation41_spill] sm:$0xff] }
 0x429   : > { %v3479_v47 = vadd.f32 %v9707_v6, %v3318_v62  ;;  %v3321_v1 = vadd.f32 %v5552_v16, %v9624_v38  ;;  %5780 = vmatmul.mubr.bf16.gmra.mrb[152].mxu1 %v3552_v8  ;;  %v10899_v62 = vld [vmem:[#allocation42_spill] sm:$0xff]  ;;  %v10900_v16 = vld [vmem:[#allocation43_spill] sm:$0xff]  ;;  %v4996_v8 = vld [vmem:[%s10901_s7] ss:$0 sm:$0xff] }
 0x42b   : > { %v3482_v22 = vadd.f32 %v9712_v63, %v3321_v1  ;;  %v5553_v23 = vpop.f32.mrb[180].mxu0  ;;  %v3533_v42 = vmax.f32 %v3479_v47, 0.0  ;;  %v5005_v47 = vld [vmem:[%s10902_s18] ss:$0 sm:$0xff] }
 0x42c   : > { %v5554_v20 = vpop.f32.mrb[181].mxu0  ;;  %v9795_v1 = vadd.f32 %v5005_v47, %v4996_v8 }
 0x42d   : > { %v3534_v41 = vmax.f32 %v3482_v22, 0.0  ;;  %v5555_v60 = vadd.f32 %v5554_v20, %v5553_v23  ;;  %v5556_v54 = vpop.f32.mrb[182].mxu0 }
 0x42e   : > { %v5557_v12 = vpop.f32.mrb[183].mxu0 }
 0x42f   : > { %v3326_v25 = vadd.f32 %v5555_v60, %v9634_v48  ;;  %v5558_v52 = vadd.f32 %v5557_v12, %v5556_v54  ;;  %v3553_v18 = vpack.c.bf16 %v3534_v41, %v3533_v42 }
 0x431   : > { %v3487_v37 = vadd.f32 %v9705_v24, %v3326_v25  ;;  %v3329_v6 = vadd.f32 %v5558_v52, %v9636_v45  ;;  %5783 = vmatprep.mubr.bf16.mxu1 %v3553_v18 }
 0x433   : > { %v3490_v38 = vadd.f32 %v9710_v57, %v3329_v6  ;;  %v5559_v30 = vpop.f32.mrb[184].mxu0  ;;  %v3535_v59 = vmax.f32 %v3487_v37, 0.0 }
 0x434   : > { %v5560_v63 = vpop.f32.mrb[185].mxu0 }
 0x435   : > { %v3536_v27 = vmax.f32 %v3490_v38, 0.0  ;;  %v5561_v56 = vadd.f32 %v5560_v63, %v5559_v30  ;;  %v5562_v11 = vpop.f32.mrb[186].mxu0 }
 0x436   : > { %v5563_v13 = vpop.f32.mrb[187].mxu0 }
 0x437   : > { %v3334_v0 = vadd.f32 %v5561_v56, %v9650_v15  ;;  %v5564_v33 = vadd.f32 %v5563_v13, %v5562_v11  ;;  %v3554_v48 = vpack.c.bf16 %v3536_v27, %v3535_v59 }
 0x439   : > { %v3495_v7 = vadd.f32 %v9719_v49, %v3334_v0  ;;  %v3337_v24 = vadd.f32 %v5564_v33, %v9652_v55  ;;  %5784 = vmatmul.mubr.bf16.gmra.mrb[156].mxu1 %v3554_v48 }
 0x43b   : > { %v3498_v45 = vadd.f32 %v9724_v39, %v3337_v24  ;;  %v5565_v10 = vpop.f32.mrb[188].mxu0  ;;  %v3537_v4 = vmax.f32 %v3495_v7, 0.0 }
 0x43c   : > { %v5566_v57 = vpop.f32.mrb[189].mxu0 }
 0x43d   : > { %v3538_v53 = vmax.f32 %v3498_v45, 0.0  ;;  %v5567_v21 = vadd.f32 %v5566_v57, %v5565_v10  ;;  %v5568_v34 = vpop.f32.mrb[190].mxu0 }
 0x43e   : > { %v5569_v46 = vpop.f32.mrb[191].mxu0 }
 0x43f   : > { %v3342_v26 = vadd.f32 %v5567_v21, %v10883_v32  ;;  %v5570_v19 = vadd.f32 %v5569_v46, %v5568_v34  ;;  %v3555_v15 = vpack.c.bf16 %v3538_v53, %v3537_v4 }
 0x441   : > { %v3503_v5 = vadd.f32 %v9717_v3, %v3342_v26  ;;  %v3345_v49 = vadd.f32 %v5570_v19, %v10884_v43  ;;  %5787 = vmatprep.mubr.bf16.mxu1 %v3555_v15  ;;  %v10890_v3 = vld [vmem:[#allocation33_spill] sm:$0xff] }
 0x443   : > { %v3506_v55 = vadd.f32 %v9722_v50, %v3345_v49  ;;  %v3539_v40 = vmax.f32 %v3503_v5, 0.0  ;;  %v10893_v50 = vld [vmem:[#allocation36_spill] sm:$0xff] }
 0x445   : > { %v3540_v39 = vmax.f32 %v3506_v55, 0.0 }
 0x447   : > { %v3556_v61 = vpack.c.bf16 %v3540_v39, %v3539_v40 }
 0x449   : > { %5788 = vmatmul.mubr.bf16.gmra.mrb[160].mxu1 %v3556_v61 }
 0x44a   : > { %5807 = vmatprep.mubr.bf16.mxu1 %v10885_v14 }
 0x451   : > { %5808 = vmatmul.mubr.bf16.vlgmr.msra.gmra.mrb[132].mxu1 %v10886_v29 }
 0x452   : > { %5811 = vmatprep.mubr.bf16.mxu1 %v10887_v31 }
 0x459   : > { %5812 = vmatmul.mubr.bf16.gmra.mrb[136].mxu1 %v10888_v35 }
 0x45a   : > { %5815 = vmatprep.mubr.bf16.mxu1 %v10889_v51 }
 0x461   : > { %5816 = vmatmul.mubr.bf16.gmra.mrb[140].mxu1 %v10890_v3 }
 0x462   : > { %5819 = vmatprep.mubr.bf16.mxu1 %v10891_v2 }
 0x469   : > { %5820 = vmatmul.mubr.bf16.gmra.mrb[144].mxu1 %v10892_v28 }
 0x46a   : > { %5823 = vmatprep.mubr.bf16.mxu1 %v10893_v50 }
 0x471   : > { %5824 = vmatmul.mubr.bf16.gmra.mrb[148].mxu1 %v10894_v9 }
 0x472   : > { %5827 = vmatprep.mubr.bf16.mxu1 %v10895_v44 }
 0x479   : > { %5828 = vmatmul.mubr.bf16.gmra.mrb[152].mxu1 %v10896_v36 }
 0x47a   : > { %5831 = vmatprep.mubr.bf16.mxu1 %v10897_v58 }
 0x481   : > { %5832 = vmatmul.mubr.bf16.gmra.mrb[156].mxu1 %v10898_v17 }
 0x482   : > { %5835 = vmatprep.mubr.bf16.mxu1 %v10899_v62 }
 0x489   : > { %5836 = vmatmul.mubr.bf16.gmra.mrb[160].mxu1 %v10900_v16 }
 0x524   : > { %v5809_v22 = vpop.f32.mrb[132].mxu1 }
 0x525   : > { %v5855_v23 = vadd.f32 %v5809_v22, %v4996_v8  ;;  %v3894_v20 = vpop.f32.mrb[133].mxu1 }
 0x526   : > { %v5857_v42 = vadd.f32 %v4996_v8, %v3894_v20  ;;  %v5810_v41 = vpop.f32.mrb[134].mxu1 }
 0x527   : > { %v5856_v60 = vadd.f32 %v5855_v23, %v5005_v47  ;;  %v5860_v54 = vadd.f32 %v9795_v1, %v5810_v41  ;;  %v3897_v12 = vpop.f32.mrb[135].mxu1 }
 0x528   : > { %v5858_v25 = vadd.f32 %v5857_v42, %v5005_v47  ;;  %v5862_v52 = vadd.f32 %v9795_v1, %v3897_v12 }
 0x529   : > { %4055 = vst [vmem:[%s9801_s13 + $0x10] sm:$0xff] %v5856_v60  ;;  %4056 = vst [vmem:[%s9801_s13 + $0x18] sm:$0xff] %v5860_v54 }
 0x52a   : > { %4053 = vst [vmem:[%s9801_s13] sm:$0xff] %v5858_v25  ;;  %4054 = vst [vmem:[%s9801_s13 + $0x8] sm:$0xff] %v5862_v52 }
 0x52c   : > { %v5813_v18 = vpop.f32.mrb[136].mxu1 }
 0x52d   : > { %v5864_v37 = vadd.f32 %v9795_v1, %v5813_v18  ;;  %v3910_v6 = vpop.f32.mrb[137].mxu1 }
 0x52e   : > { %v5866_v38 = vadd.f32 %v9795_v1, %v3910_v6  ;;  %v5814_v30 = vpop.f32.mrb[138].mxu1 }
 0x52f   : > { %4059 = vst [vmem:[%s9801_s13 + $0x30] sm:$0xff] %v5864_v37  ;;  %v5868_v63 = vadd.f32 %v9795_v1, %v5814_v30  ;;  %v3913_v59 = vpop.f32.mrb[139].mxu1 }
 0x530   : > { %4057 = vst [vmem:[%s9801_s13 + $0x20] sm:$0xff] %v5866_v38  ;;  %v5870_v27 = vadd.f32 %v9795_v1, %v3913_v59 }
 0x531   : > { %4060 = vst [vmem:[%s9801_s13 + $0x38] sm:$0xff] %v5868_v63 }
 0x532   : > { %4058 = vst [vmem:[%s9801_s13 + $0x28] sm:$0xff] %v5870_v27 }
 0x534   : > { %v5817_v56 = vpop.f32.mrb[140].mxu1 }
 0x535   : > { %v5872_v11 = vadd.f32 %v9795_v1, %v5817_v56  ;;  %v3926_v13 = vpop.f32.mrb[141].mxu1 }
 0x536   : > { %v5874_v0 = vadd.f32 %v9795_v1, %v3926_v13  ;;  %v5818_v33 = vpop.f32.mrb[142].mxu1 }
 0x537   : > { %4063 = vst [vmem:[%s9801_s13 + $0x50] sm:$0xff] %v5872_v11  ;;  %v5876_v48 = vadd.f32 %v9795_v1, %v5818_v33  ;;  %v3929_v7 = vpop.f32.mrb[143].mxu1 }
 0x538   : > { %4061 = vst [vmem:[%s9801_s13 + $0x40] sm:$0xff] %v5874_v0  ;;  %v5878_v24 = vadd.f32 %v9795_v1, %v3929_v7 }
 0x539   : > { %4064 = vst [vmem:[%s9801_s13 + $0x58] sm:$0xff] %v5876_v48 }
 0x53a   : > { %4062 = vst [vmem:[%s9801_s13 + $0x48] sm:$0xff] %v5878_v24 }
 0x53c   : > { %v5821_v45 = vpop.f32.mrb[144].mxu1 }
 0x53d   : > { %v5880_v10 = vadd.f32 %v9795_v1, %v5821_v45  ;;  %v3942_v57 = vpop.f32.mrb[145].mxu1 }
 0x53e   : > { %v5882_v4 = vadd.f32 %v9795_v1, %v3942_v57  ;;  %v5822_v53 = vpop.f32.mrb[146].mxu1 }
 0x53f   : > { %4067 = vst [vmem:[%s9801_s13 + $0x70] sm:$0xff] %v5880_v10  ;;  %v5884_v21 = vadd.f32 %v9795_v1, %v5822_v53  ;;  %v3945_v34 = vpop.f32.mrb[147].mxu1 }
 0x540   : > { %4065 = vst [vmem:[%s9801_s13 + $0x60] sm:$0xff] %v5882_v4  ;;  %v5886_v46 = vadd.f32 %v9795_v1, %v3945_v34 }
 0x541   : > { %4068 = vst [vmem:[%s9801_s13 + $0x78] sm:$0xff] %v5884_v21 }
 0x542   : > { %4066 = vst [vmem:[%s9801_s13 + $0x68] sm:$0xff] %v5886_v46 }
 0x544   : > { %v5825_v32 = vpop.f32.mrb[148].mxu1 }
 0x545   : > { %v5888_v26 = vadd.f32 %v9795_v1, %v5825_v32  ;;  %v3958_v19 = vpop.f32.mrb[149].mxu1 }
 0x546   : > { %v5890_v15 = vadd.f32 %v9795_v1, %v3958_v19  ;;  %v5826_v5 = vpop.f32.mrb[150].mxu1 }
 0x547   : > { %4071 = vst [vmem:[%s9801_s13 + $0x90] sm:$0xff] %v5888_v26  ;;  %v5892_v43 = vadd.f32 %v9795_v1, %v5826_v5  ;;  %v3961_v49 = vpop.f32.mrb[151].mxu1 }
 0x548   : > { %4069 = vst [vmem:[%s9801_s13 + $0x80] sm:$0xff] %v5890_v15  ;;  %v5894_v55 = vadd.f32 %v9795_v1, %v3961_v49 }
 0x549   : > { %4072 = vst [vmem:[%s9801_s13 + $0x98] sm:$0xff] %v5892_v43 }
 0x54a   : > { %4070 = vst [vmem:[%s9801_s13 + $0x88] sm:$0xff] %v5894_v55 }
 0x54c   : > { %v5829_v40 = vpop.f32.mrb[152].mxu1 }
 0x54d   : > { %v5896_v39 = vadd.f32 %v9795_v1, %v5829_v40  ;;  %v3974_v61 = vpop.f32.mrb[153].mxu1 }
 0x54e   : > { %v5898_v14 = vadd.f32 %v9795_v1, %v3974_v61  ;;  %v5830_v29 = vpop.f32.mrb[154].mxu1 }
 0x54f   : > { %4075 = vst [vmem:[%s9801_s13 + $0xb0] sm:$0xff] %v5896_v39  ;;  %v5900_v31 = vadd.f32 %v9795_v1, %v5830_v29  ;;  %v3977_v35 = vpop.f32.mrb[155].mxu1 }
 0x550   : > { %4073 = vst [vmem:[%s9801_s13 + $0xa0] sm:$0xff] %v5898_v14  ;;  %v5902_v51 = vadd.f32 %v9795_v1, %v3977_v35 }
 0x551   : > { %4076 = vst [vmem:[%s9801_s13 + $0xb8] sm:$0xff] %v5900_v31 }
 0x552   : > { %4074 = vst [vmem:[%s9801_s13 + $0xa8] sm:$0xff] %v5902_v51 }
 0x554   : > { %v5833_v3 = vpop.f32.mrb[156].mxu1 }
 0x555   : > { %v5904_v2 = vadd.f32 %v9795_v1, %v5833_v3  ;;  %v3990_v28 = vpop.f32.mrb[157].mxu1 }
 0x556   : > { %v5906_v50 = vadd.f32 %v9795_v1, %v3990_v28  ;;  %v5834_v9 = vpop.f32.mrb[158].mxu1 }
 0x557   : > { %4079 = vst [vmem:[%s9801_s13 + $0xd0] sm:$0xff] %v5904_v2  ;;  %v5908_v44 = vadd.f32 %v9795_v1, %v5834_v9  ;;  %v3993_v36 = vpop.f32.mrb[159].mxu1 }
 0x558   : > { %4077 = vst [vmem:[%s9801_s13 + $0xc0] sm:$0xff] %v5906_v50  ;;  %v5910_v58 = vadd.f32 %v9795_v1, %v3993_v36 }
 0x559   : > { %4080 = vst [vmem:[%s9801_s13 + $0xd8] sm:$0xff] %v5908_v44 }
 0x55a   : > { %4078 = vst [vmem:[%s9801_s13 + $0xc8] sm:$0xff] %v5910_v58 }
 0x55c   : > { %v5837_v17 = vpop.f32.mrb[160].mxu1 }
 0x55d   : > { %v5912_v62 = vadd.f32 %v9795_v1, %v5837_v17  ;;  %v4006_v16 = vpop.f32.mrb[161].mxu1 }
 0x55e   : > { %v5914_v8 = vadd.f32 %v9795_v1, %v4006_v16  ;;  %v5838_v47 = vpop.f32.mrb[162].mxu1 }
 0x55f   : > { %4083 = vst [vmem:[%s9801_s13 + $0xf0] sm:$0xff] %v5912_v62  ;;  %v5916_v22 = vadd.f32 %v9795_v1, %v5838_v47  ;;  %v4009_v23 = vpop.f32.mrb[163].mxu1 }
 0x560   : > { %4081 = vst [vmem:[%s9801_s13 + $0xe0] sm:$0xff] %v5914_v8  ;;  %v5918_v20 = vadd.f32 %v9795_v1, %v4009_v23 }
 0x561   : > { %4084 = vst [vmem:[%s9801_s13 + $0xf8] sm:$0xff] %v5916_v22 }
 0x562   : > { %4082 = vst [vmem:[%s9801_s13 + $0xe8] sm:$0xff] %v5918_v20 }
 0x563   : > { %6346 = shalt.err (!%p6343_p6)
}
 0x564   : > { %s6347_s29 = scalar_lea.hbm %s9864_s8, 4096  ;;  %s6351_s15 = scalar_lea.hbm %s10905_s5, 8192 }
 0x565   : > { %p6348_p7 = scmp.ne.s32.totalorder %s9864_s8, %s6347_s29  ;;  %p6352_p4 = scmp.lt.u32.totalorder %s9864_s8, %s10905_s5 }
 0x566   : > { %p6353_p12 = scmp.lt.u32.totalorder %s6351_s15, %s6347_s29  ;;  %p6355_p11 = scmp.lt.u32.totalorder %s6347_s29, %s9864_s8 }
 0x567   : > { %p6349_p9 = pnand %p6348_p7, %p10906_p10 }
 0x568   : > { %p6354_p2 = por %p6353_p12, %p6352_p4 }
 0x569   : > { %p6350_p8 = pneg %p6349_p9 }
 0x56a   : > { %p6356_p1 = por %p6355_p11, %p6354_p2 }
 0x56c   : > { %p6357_p0 = pnand %p6356_p1, %p6350_p8 }
 0x56e   : > { %6360 = shalt.err (!%p6357_p0)
}
 0x56f   : > { %s6441_s24 = smov 128   ;;  %s6442_s18 = smov 8  }
 0x570   : > { %5969 = dma.vmem_to_hbm [thread:$0]  (%p10906_p10), %s9866_s22, 4096, %s9864_s8, %s4086_s28, %s6441_s24, %s6441_s24, %s6442_s18  }
 0x571 PF: > { %s10907_s13 = sld [smem:[#allocation19_spill]]  ;;  %s10908_s20 = sld [smem:[#allocation25_spill]] }
 0x572   : > { %s10909_s27 = sld [smem:[#allocation23_spill]] }
 0x577   : > { %s4116_s12 = sand.u32 1, %s10907_s13   ;;  %p10910_p13 = scmp.ne.s32.totalorder %s10908_s20, 0 }
 0x578   : > { %p10911_p5 = scmp.ge.s32.totalorder %s10909_s27, 2  ;;  %s4117_s16 = scalar_lea.sflag [#allocation4], %s4116_s12 }
 0x57a   : > { %p5992_p3 = pnand %p10911_p5, %p10910_p13 }
 0x57c   : > { %6402 = dma.done.wait (!%p5992_p3), %s4117_s16, 4096  }
 0x57d   : > { %6404 = vsyncadd (!%p5992_p3), %s4117_s16, 4294963200  ;;  %s34_s30 = sadd.s32 1, %s10909_s27   ;;  %s10912_s17 = sld [smem:[#allocation20_spill]] }
 0x57e   : > { %p31_p6 = scmp.ge.s32.totalorder %s34_s30, 4   ;;  %s10913_s27 = sld [smem:[#allocation27_spill]] }
 0x57f   : > { %s10914_s28 = sld [smem:[#allocation22_spill]]  ;;  %s10915_s29 = sld [smem:[#allocation26_spill]] }
 0x580   : > { %s10916_s25 = smov %s6411_s26  ;;  %33 = sbr.rel (!%p31_p6) target bundleno = 19 (0x13), region = 153 }
 0x583   : > { %s10917_s26 = smov %s10912_s17 }
 0x587   :  { %4122 = vsyncpa [#allocation3], 1 }
 0x588   :  { %4124 = vsyncpa [#allocation3 + $0x1], 1 }
 0x589   :  { %4125 = vsyncpa [#allocation6], 1 }
 0x58a   :  { %4127 = vsyncpa [#allocation6 + $0x1], 1 }
 0x58b   :  { %4128 = vsyncpa [#allocation9], 1 }
 0x58c   :  { %4129 = vsyncpa [#allocation12], 1 }
 0x58d   :  { %4130 = vsyncpa [#allocation4], 1 }
 0x58e   :  { %4132 = vsyncpa [#allocation4 + $0x1], 1 }

</bundles_post_ra>
